<compile_context>
chip_gen: v7x
topology: tpu7x:2x2x1
jax: 0.10.0
libtpu: 0.0.40
codegen_flags: <defaults>
</compile_context>

<pallas_src>
import functools

import numpy as np

import jax
import jax.numpy as jnp
from jax import lax
from jax.experimental import pallas as pl
from jax.experimental.pallas import tpu as pltpu

LN_EPS = 1e-6          # nn.LayerNorm(hidden_size, eps=1e-06)
LEAKY_SLOPE = 0.01
NEG_INF = -1e30


def _round_up(x, m):
    return ((x + m - 1) // m) * m


# -----------------------------------------------------------------------------
# Fused all-layers kernel: one batch block per grid step, layer loop in-kernel.
# All channel dims are zero-padded to P (a multiple of 128 lanes).
# -----------------------------------------------------------------------------
def _star_transformer_kernel(
        embed_ref, pad_ref, nfirst_ref, nlast_ref, expand_ref, bsum_ref, hsum_ref,
        gamma_ref, beta_ref,
        rwqkv_ref, rbqkv_ref, rwo_ref, rbo_ref,
        swqkv_ref, sbqkv_ref, swo_ref, sbo_ref,
        nodes_out_ref, relay_out_ref,
        *, hidden):
    bl, P = embed_ref.shape[1], embed_ref.shape[2]     # bl = bt * L rows per block
    bt = expand_ref.shape[1]                           # sequences per block
    L = bl // bt
    num_layers = gamma_ref.shape[0]
    w_dtype = rwqkv_ref.dtype

    if w_dtype == jnp.float32:
        def dot(a, b):                                 # DEFAULT precision (no HIGHEST)
            return jnp.dot(a, b, preferred_element_type=jnp.float32)
    else:
        def dot(a, b):                                 # bf16 operands, f32 accumulate
            return jnp.dot(a.astype(w_dtype), b.astype(w_dtype),
                           preferred_element_type=jnp.float32)

    inv_h = 1.0 / float(hidden)

    def layer_norm(x, gamma, beta):
        # Channels beyond `hidden` are exactly zero, so plain sums give the real
        # statistics; E[x^2]-mu^2 keeps padded lanes out of the variance and the
        # zero-padded gamma/beta keep padded output lanes at zero.
        mu = jnp.sum(x, axis=-1, keepdims=True) * inv_h
        ex2 = jnp.sum(x * x, axis=-1, keepdims=True) * inv_h
        return (x - mu) * lax.rsqrt(ex2 - mu * mu + LN_EPS) * gamma + beta

    def leaky(x):
        return jnp.where(x >= 0.0, x, LEAKY_SLOPE * x)

    embed = embed_ref[0]                 # (bl, P)  layer-invariant r_embs source
    pad = pad_ref[0]                     # (bl, P)  1.0 at padding positions (lane-dense)
    hsum = hsum_ref[...]                 # (P, P)   per-head "sum + broadcast" selector

    if bt == 1:
        def expand_rows(x):              # (1, P): rely on implicit row broadcasting
            return x

        def seg_sum(x):                  # (bl, P) -> (1, P)
            return jnp.sum(x, axis=0, keepdims=True)
    else:
        not_first = nfirst_ref[...]      # zero rows that wrapped across sequences
        not_last = nlast_ref[...]
        expand_m = expand_ref[...]       # (bl, bt) one-hot sequence-of-row
        bsum_m = bsum_ref[...]           # (bt, bl) per-sequence row sums

        def expand_rows(x):              # (bt, P) -> (bl, P)
            return dot(expand_m, x)

        def seg_sum(x):                  # (bl, P) -> (bt, P)
            return dot(bsum_m, x)

    zrow = jnp.zeros((1, P), jnp.float32)

    nodes0 = embed
    relay0 = seg_sum(embed) * (1.0 / float(L))   # per-sequence mean (incl. pads, as in torch)

    def layer_body(l, carry):
        nodes, relay = carry
        gamma, beta = gamma_ref[l], beta_ref[l]                     # (1, P)

        # ======================= ring attention (_MSA1) =======================
        x_ln = layer_norm(nodes, gamma, beta)
        rows = jnp.concatenate([x_ln, embed, relay], axis=0)        # (2*bl+bt, P)
        proj = dot(rows, rwqkv_ref[l]) + rbqkv_ref[l]               # (2*bl+bt, 3P)

        q = proj[0:bl, 0:P]                    # 1/sqrt(head_dim) folded into WQ/bq
        k = proj[0:bl, P:2 * P]
        v = proj[0:bl, 2 * P:3 * P]
        ak_e = proj[bl:2 * bl, P:2 * P]        # embed aux key / value
        av_e = proj[bl:2 * bl, 2 * P:3 * P]
        k_r = proj[2 * bl:, P:2 * P]           # (bt, P) relay aux key / value
        v_r = proj[2 * bl:, 2 * P:3 * P]

        # F.unfold(kernel=(3,1), padding=(1,0)) == +-1 neighbour shifts with zero
        # rows; edge masks kill rows that wrapped across flattened sequences.
        k_prev = jnp.concatenate([zrow, k[:bl - 1]], axis=0)
        k_next = jnp.concatenate([k[1:], zrow], axis=0)
        v_prev = jnp.concatenate([zrow, v[:bl - 1]], axis=0)
        v_next = jnp.concatenate([v[1:], zrow], axis=0)
        if bt > 1:
            k_prev, v_prev = k_prev * not_first, v_prev * not_first
            k_next, v_next = k_next * not_last, v_next * not_last

        ak_r = expand_rows(k_r)
        av_r = expand_rows(v_r)

        # Per-head scores in the expanded lane space (dense 128-lane vregs).
        s_p = dot(q * k_prev, hsum)
        s_c = dot(q * k, hsum)
        s_n = dot(q * k_next, hsum)
        s_e = dot(q * ak_e, hsum)
        s_r = dot(q * ak_r, hsum)

        m = jnp.maximum(jnp.maximum(jnp.maximum(s_p, s_c), jnp.maximum(s_n, s_e)), s_r)
        e_p, e_c, e_n = jnp.exp(s_p - m), jnp.exp(s_c - m), jnp.exp(s_n - m)
        e_e, e_r = jnp.exp(s_e - m), jnp.exp(s_r - m)
        inv_z = pl.reciprocal(e_p + e_c + e_n + e_e + e_r, approx=True)
        att = (e_p * v_prev + e_c * v + e_n * v_next + e_e * av_e + e_r * av_r) * inv_z
        nodes_new = leaky(dot(att, rwo_ref[l]) + rbo_ref[l])        # (bl, P)

        # ======================= star attention (_MSA2) =======================
        r_ln = layer_norm(relay, gamma, beta)
        rows2 = jnp.concatenate([r_ln, relay, nodes_new], axis=0)   # (2*bt+bl, P)
        proj2 = dot(rows2, swqkv_ref[l]) + sbqkv_ref[l]
        q_s = proj2[0:bt, 0:P]
        k_rel = proj2[bt:2 * bt, P:2 * P]
        v_rel = proj2[bt:2 * bt, 2 * P:3 * P]
        k_nod = proj2[2 * bt:, P:2 * P]                             # (bl, P)
        v_nod = proj2[2 * bt:, 2 * P:3 * P]

        q_exp = expand_rows(q_s)
        s_rel = dot(q_s * k_rel, hsum)                              # (bt, P)
        s_nod = dot(q_exp * k_nod, hsum)                            # (bl, P)
        s_nod = jnp.where(pad > 0.0, NEG_INF, s_nod)                # masked_fill(-inf)

        # Block-global per-lane max: cancels exactly in the softmax and is safe for
        # O(1) scores; equals the exact per-sequence max when bt == 1.
        m2 = jnp.maximum(jnp.max(s_rel, axis=0, keepdims=True),
                         jnp.max(s_nod, axis=0, keepdims=True))
        e_rel = jnp.exp(s_rel - m2)
        e_nod = jnp.exp(s_nod - m2)
        den = e_rel + seg_sum(e_nod)                                # (bt, P)
        num = e_rel * v_rel + seg_sum(e_nod * v_nod)
        att2 = num * pl.reciprocal(den, approx=True)
        relay_new = leaky(dot(att2, swo_ref[l]) + sbo_ref[l])       # (bt, P)

        nodes_masked = jnp.where(pad > 0.0, 0.0, nodes_new)         # masked_fill_(ex_mask, 0)
        return nodes_masked, relay_new

    nodes_fin, relay_fin = lax.fori_loop(0, num_layers, layer_body, (nodes0, relay0),
                                         unroll=num_layers <= 8)

    nodes_out_ref[0] = nodes_fin
    relay_out_ref[0] = relay_fin


# -----------------------------------------------------------------------------
# One-time parameter packing (hoisted out of the forward pass): pad to 128-lane
# channels, fuse QKV, fold 1/sqrt(head_dim) into WQ/bq, stack per-layer weights.
# -----------------------------------------------------------------------------
def pack_params(params, *, nhead, head_dim, mxu_dtype=jnp.float32):
    H = params['embedding'].shape[1]
    D = nhead * head_dim
    P = _round_up(max(H, D), 128)
    scale = 1.0 / float(head_dim) ** 0.5

    def place(w, rows, cols):
        return jnp.zeros((rows, cols), jnp.float32).at[:w.shape[0], :w.shape[1]].set(
            w.astype(jnp.float32))

    def fused_qkv(p):
        w = jnp.concatenate([place(p['wq'] * scale, P, P),
                             place(p['wk'], P, P),
                             place(p['wv'], P, P)], axis=1)
        b = jnp.concatenate([place(p['bq'] * scale, 1, P),
                             place(p['bk'], 1, P),
                             place(p['bv'], 1, P)], axis=1)
        return w, b

    g, be, rw, rb, rwo, rbo, sw, sb, swo, sbo = ([] for _ in range(10))
    for lp in params['layers']:
        g.append(place(lp['gamma'], 1, P))
        be.append(place(lp['beta'], 1, P))
        w, b = fused_qkv(lp['ring']); rw.append(w); rb.append(b)
        rwo.append(place(lp['ring']['wo'], P, P))
        rbo.append(place(lp['ring']['bo'], 1, P))
        w, b = fused_qkv(lp['star']); sw.append(w); sb.append(b)
        swo.append(place(lp['star']['wo'], P, P))
        sbo.append(place(lp['star']['bo'], 1, P))

    # per-head "sum over head lanes + broadcast back" selector
    idx = np.arange(P)
    hsum = ((idx[:, None] // head_dim == idx[None, :] // head_dim)
            & (idx[:, None] < D) & (idx[None, :] < D)).astype(np.float32)

    wstack = lambda xs: jnp.stack(xs).astype(mxu_dtype)
    fstack = lambda xs: jnp.stack(xs).astype(jnp.float32)
    return {
        'embedding': params['embedding'].astype(jnp.float32),
        'pos_emb': params['pos_emb'].astype(jnp.float32),
        'gamma': fstack(g), 'beta': fstack(be),
        'rwqkv': wstack(rw), 'rbqkv': fstack(rb), 'rwo': wstack(rwo), 'rbo': fstack(rbo),
        'swqkv': wstack(sw), 'sbqkv': fstack(sb), 'swo': wstack(swo), 'sbo': fstack(sbo),
        'hsum': jnp.asarray(hsum).astype(mxu_dtype),
    }


# -----------------------------------------------------------------------------
# Full StarTransformer forward (single pallas_call over batch blocks).
# -----------------------------------------------------------------------------
def star_transformer_forward(tokens, mask, packed, *, block_batch=None):
    emb = packed['embedding'][tokens]                          # (B, L, H)
    B, L, H = emb.shape
    P = packed['rwqkv'].shape[1]
    NL = packed['gamma'].shape[0]

    # PyTorch does `x.view(B, H, L, 1)` (a reshape, NOT a transpose) before adding
    # the positional embedding in channel-major layout; reproduce that exactly.
    embed_chan = emb.reshape(B, H, L) + packed['pos_emb'][:L].T[None]
    embed = jnp.transpose(embed_chan, (0, 2, 1)).astype(jnp.float32)   # (B, L, H)

    # ---- batch blocking: Bt sequences per grid step ----
    if block_batch is None:
        bt = max(1, min(B // 2, max(1, 128 // L)))   # keep >=2 parallel steps (v7x)
    else:
        bt = max(1, min(block_batch, B))
    B_pad = _round_up(B, bt)
    n_blocks = B_pad // bt

    pad_flag = (mask == 0).astype(jnp.float32)                 # 1.0 on padding
    if B_pad != B:
        embed = jnp.concatenate(
            [embed, jnp.zeros((B_pad - B, L, H), jnp.float32)], axis=0)
        pad_flag = jnp.concatenate(
            [pad_flag, jnp.ones((B_pad - B, L), jnp.float32)], axis=0)

    # lane-pad channels to P and lay out as (grid block, bt*L rows, P lanes)
    embed_p = jnp.zeros((B_pad, L, P), jnp.float32).at[:, :, :H].set(embed)
    embed_in = embed_p.reshape(n_blocks, bt * L, P)
    pad_in = jnp.broadcast_to(pad_flag.reshape(B_pad, L, 1),
                              (B_pad, L, P)).reshape(n_blocks, bt * L, P)

    # static per-block helper matrices (numpy at trace time -> constants)
    pos = np.arange(bt * L) % L
    not_first = jnp.asarray(np.tile((pos != 0).astype(np.float32)[:, None], (1, P)))
    not_last = jnp.asarray(np.tile((pos != L - 1).astype(np.float32)[:, None], (1, P)))
    seq_of_row = np.arange(bt * L) // L
    expand_np = (seq_of_row[:, None] == np.arange(bt)[None, :]).astype(np.float32)
    expand = jnp.asarray(expand_np)                            # (bt*L, bt)
    bsum = jnp.asarray(np.ascontiguousarray(expand_np.T))      # (bt, bt*L)

    kern = functools.partial(_star_transformer_kernel, hidden=H)

    def gblk(shape):                        # per-grid-step block
        return pl.BlockSpec((1,) + shape, lambda b: (b,) + (0,) * len(shape))

    def cblk(shape):                        # constant block (VMEM-resident, DMA'd once)
        return pl.BlockSpec(shape, lambda b: (0,) * len(shape))

    nodes_out, relay_out = pl.pallas_call(
        kern,
        out_shape=(jax.ShapeDtypeStruct((n_blocks, bt * L, P), jnp.float32),
                   jax.ShapeDtypeStruct((n_blocks, bt, P), jnp.float32)),
        grid=(n_blocks,),
        in_specs=[
            gblk((bt * L, P)),                           # embed (r_embs source)
            gblk((bt * L, P)),                           # padding mask (lane-dense)
            cblk((bt * L, P)), cblk((bt * L, P)),        # ring-shift edge masks
            cblk((bt * L, bt)), cblk((bt, bt * L)),      # sequence expand / segment-sum
            cblk((P, P)),                                # per-head sum+broadcast selector
            cblk((NL, 1, P)), cblk((NL, 1, P)),          # gamma, beta
            cblk((NL, P, 3 * P)), cblk((NL, 1, 3 * P)),  # ring fused WQ|WK|WV, bias
            cblk((NL, P, P)), cblk((NL, 1, P)),          # ring WO, bias
            cblk((NL, P, 3 * P)), cblk((NL, 1, 3 * P)),  # star fused WQ|WK|WV, bias
            cblk((NL, P, P)), cblk((NL, 1, P)),          # star WO, bias
        ],
        out_specs=(gblk((bt * L, P)), gblk((bt, P))),
        compiler_params=pltpu.CompilerParams(
            dimension_semantics=("parallel",),
            vmem_limit_bytes=32 * 1024 * 1024),
    )(embed_in, pad_in, not_first, not_last, expand, bsum, packed['hsum'],
      packed['gamma'], packed['beta'],
      packed['rwqkv'], packed['rbqkv'], packed['rwo'], packed['rbo'],
      packed['swqkv'], packed['sbqkv'], packed['swo'], packed['sbo'])

    nodes = nodes_out.reshape(B_pad, L, P)[:B, :, :H]
    relay = relay_out.reshape(B_pad, P)[:B, :H]
    return nodes, relay


# -----------------------------------------------------------------------------
# Pure-JAX reference (mirrors the PyTorch semantics) for the self-check.
# -----------------------------------------------------------------------------
def _layer_norm(x, gamma, beta):
    mu = jnp.mean(x, axis=-1, keepdims=True)
    xc = x - mu
    var = jnp.mean(xc * xc, axis=-1, keepdims=True)
    return xc * lax.rsqrt(var + LN_EPS) * gamma + beta


def _leaky_relu(x):
    return jnp.where(x >= 0.0, x, LEAKY_SLOPE * x)


def _ref_ring(nodes, embed, relay, gamma, beta, p, nhead, head_dim):
    B, L, H = nodes.shape
    D = nhead * head_dim
    x_ln = _layer_norm(nodes, gamma, beta)
    q = x_ln @ p['wq'] + p['bq']
    k = x_ln @ p['wk'] + p['bk']
    v = x_ln @ p['wv'] + p['bv']
    ak_e = embed @ p['wk'] + p['bk']
    av_e = embed @ p['wv'] + p['bv']
    ak_r = relay @ p['wk'] + p['bk']
    av_r = relay @ p['wv'] + p['bv']
    z = jnp.zeros((B, 1, D), jnp.float32)
    K = jnp.stack([jnp.concatenate([z, k[:, :-1]], 1), k,
                   jnp.concatenate([k[:, 1:], z], 1),
                   ak_e, jnp.broadcast_to(ak_r[:, None], (B, L, D))], axis=2)
    V = jnp.stack([jnp.concatenate([z, v[:, :-1]], 1), v,
                   jnp.concatenate([v[:, 1:], z], 1),
                   av_e, jnp.broadcast_to(av_r[:, None], (B, L, D))], axis=2)
    qh = q.reshape(B, L, 1, nhead, head_dim)
    Kh = K.reshape(B, L, 5, nhead, head_dim)
    Vh = V.reshape(B, L, 5, nhead, head_dim)
    s = (qh * Kh).sum(-1) / jnp.sqrt(jnp.float32(head_dim))
    a = jax.nn.softmax(s, axis=2)
    att = (a[..., None] * Vh).sum(2).reshape(B, L, D)
    return _leaky_relu(att @ p['wo'] + p['bo'])


def _ref_star(relay, nodes, pad, gamma, beta, p, nhead, head_dim):
    B, L, H = nodes.shape
    D = nhead * head_dim
    r_ln = _layer_norm(relay, gamma, beta)
    q = r_ln @ p['wq'] + p['bq']
    y = jnp.concatenate([relay[:, None, :], nodes], axis=1)
    k = y @ p['wk'] + p['bk']
    v = y @ p['wv'] + p['bv']
    qh = q.reshape(B, nhead, 1, head_dim)
    kh = k.reshape(B, 1 + L, nhead, head_dim).transpose(0, 2, 3, 1)
    vh = v.reshape(B, 1 + L, nhead, head_dim).transpose(0, 2, 1, 3)
    s = jnp.matmul(qh, kh) / jnp.sqrt(jnp.float32(head_dim))
    smask = jnp.concatenate([jnp.zeros((B, 1), bool), pad], axis=1)
    s = jnp.where(smask[:, None, None, :], -jnp.inf, s)
    a = jax.nn.softmax(s, axis=3)
    att = jnp.matmul(a, vh).reshape(B, D)
    return _leaky_relu(att @ p['wo'] + p['bo'])


def reference_forward(tokens, mask, params, *, nhead, head_dim):
    emb = params['embedding'][tokens]
    B, L, H = emb.shape
    embed_chan = emb.reshape(B, H, L) + params['pos_emb'][:L].T[None]
    embed = jnp.transpose(embed_chan, (0, 2, 1))
    pad = (mask == 0)
    nodes = embed
    relay = jnp.mean(embed, axis=1)
    for lp in params['layers']:
        nodes_new = _ref_ring(nodes, embed, relay, lp['gamma'], lp['beta'],
                              lp['ring'], nhead, head_dim)
        relay = _ref_star(relay, nodes_new, pad, lp['gamma'], lp['beta'],
                          lp['star'], nhead, head_dim)
        nodes = jnp.where(pad[:, :, None], 0.0, nodes_new)
    return nodes, relay


# -----------------------------------------------------------------------------
# Deterministic synthetic parameters (shapes dictated by the module __init__).
# -----------------------------------------------------------------------------
def init_params(key, *, num_layers, vocab_size, max_len, hidden, nhead, head_dim):
    D = nhead * head_dim
    keys = iter(jax.random.split(key, 2 + num_layers * 18))

    def nrm(shape, scale):
        return (scale * jax.random.normal(next(keys), shape)).astype(jnp.float32)

    embedding = nrm((vocab_size, hidden), 0.5).at[0].set(0.0)   # padding_idx=0
    pos_emb = nrm((max_len, hidden), 0.1)

    def msa(scale=0.15):
        # Conv2d(in, out, 1) weights stored pre-transposed as (in, out); bias (1, out).
        return {
            'wq': nrm((hidden, D), scale), 'bq': nrm((1, D), scale),
            'wk': nrm((hidden, D), scale), 'bk': nrm((1, D), scale),
            'wv': nrm((hidden, D), scale), 'bv': nrm((1, D), scale),
            'wo': nrm((D, hidden), scale), 'bo': nrm((1, hidden), scale),
        }

    layers = []
    for _ in range(num_layers):
        layers.append({
            'gamma': 1.0 + nrm((1, hidden), 0.1),
            'beta': nrm((1, hidden), 0.1),
            'ring': msa(),
            'star': msa(),
        })
    return {'embedding': embedding, 'pos_emb': pos_emb, 'layers': layers}


if __name__ == "__main__":
    B, L = 2, 8
    vocab_size, max_len = 20, 16
    hidden = 32                       # embedding_dim == hidden_size (forward requires this)
    nhead, head_dim = 4, 8            # nhead * head_dim = 32
    num_layers = 2

    key = jax.random.PRNGKey(0)
    k_tok, k_par = jax.random.split(key)
    params = init_params(k_par, num_layers=num_layers, vocab_size=vocab_size,
                         max_len=max_len, hidden=hidden, nhead=nhead, head_dim=head_dim)

    mask = jnp.array([[1] * 8, [1] * 5 + [0] * 3], dtype=jnp.int32)   # 1 = token, 0 = pad
    tokens = jax.random.randint(k_tok, (B, L), 1, vocab_size, dtype=jnp.int32) * mask

    nodes_ref, relay_ref = reference_forward(tokens, mask, params,
                                             nhead=nhead, head_dim=head_dim)

    fwd = jax.jit(star_transformer_forward)

    # f32 operand path (default-precision MXU; recommended on v5e).
    packed_f32 = pack_params(params, nhead=nhead, head_dim=head_dim,
                             mxu_dtype=jnp.float32)
    nodes, relay = fwd(tokens, mask, packed_f32)
    jax.block_until_ready((nodes, relay))
    assert nodes.shape == (B, L, hidden) and relay.shape == (B, hidden)
    # Tolerance covers DEFAULT matmul precision + EUP approx-reciprocal/rsqrt paths.
    assert jnp.allclose(nodes, nodes_ref, atol=5e-2, rtol=5e-2), "nodes mismatch (f32)"
    assert jnp.allclose(relay, relay_ref, atol=5e-2, rtol=5e-2), "relay mismatch (f32)"

    # bf16-operand / f32-accumulate path (recommended default on v6e/v7x).
    packed_bf16 = pack_params(params, nhead=nhead, head_dim=head_dim,
                              mxu_dtype=jnp.bfloat16)
    nodes_b, relay_b = fwd(tokens, mask, packed_bf16)
    jax.block_until_ready((nodes_b, relay_b))
    assert jnp.allclose(nodes_b, nodes_ref, atol=2e-1, rtol=2e-1), "nodes mismatch (bf16)"
    assert jnp.allclose(relay_b, relay_ref, atol=2e-1, rtol=2e-1), "relay mismatch (bf16)"

    print("KERNEL_OK")
</pallas_src>

<mosaic_0001>
module attributes {stable_mosaic.version = 11 : i64} {
  func.func @_star_transformer_kernel(%arg0: i32, %arg1: memref<1x8x128xf32, #tpu.memory_space<vmem>>, %arg2: memref<1x8x128xf32, #tpu.memory_space<vmem>>, %arg3: memref<8x128xf32, #tpu.memory_space<vmem>>, %arg4: memref<8x128xf32, #tpu.memory_space<vmem>>, %arg5: memref<8x1xf32, #tpu.memory_space<vmem>>, %arg6: memref<1x8xf32, #tpu.memory_space<vmem>>, %arg7: memref<128x128xf32, #tpu.memory_space<vmem>>, %arg8: memref<2x1x128xf32, #tpu.memory_space<vmem>>, %arg9: memref<2x1x128xf32, #tpu.memory_space<vmem>>, %arg10: memref<2x128x384xf32, #tpu.memory_space<vmem>>, %arg11: memref<2x1x384xf32, #tpu.memory_space<vmem>>, %arg12: memref<2x128x128xf32, #tpu.memory_space<vmem>>, %arg13: memref<2x1x128xf32, #tpu.memory_space<vmem>>, %arg14: memref<2x128x384xf32, #tpu.memory_space<vmem>>, %arg15: memref<2x1x384xf32, #tpu.memory_space<vmem>>, %arg16: memref<2x128x128xf32, #tpu.memory_space<vmem>>, %arg17: memref<2x1x128xf32, #tpu.memory_space<vmem>>, %arg18: memref<1x8x128xf32, #tpu.memory_space<vmem>>, %arg19: memref<1x1x128xf32, #tpu.memory_space<vmem>>) attributes {dimension_semantics = [#tpu.dimension_semantics<parallel>], iteration_bounds = array<i64: 2>, scalar_prefetch = 0 : i64, scratch_operands = 0 : i64, tpu.core_type = #tpu.core_type<tc>, window_params = [{transform_indices = @transform_0, window_bounds = array<i64: 1, 8, 128>}, {transform_indices = @transform_1, window_bounds = array<i64: 1, 8, 128>}, {pipeline_mode = #tpu.pipeline_mode<synchronous>, transform_indices = @transform_2, window_bounds = array<i64: 8, 128>}, {pipeline_mode = #tpu.pipeline_mode<synchronous>, transform_indices = @transform_3, window_bounds = array<i64: 8, 128>}, {pipeline_mode = #tpu.pipeline_mode<synchronous>, transform_indices = @transform_4, window_bounds = array<i64: 8, 1>}, {pipeline_mode = #tpu.pipeline_mode<synchronous>, transform_indices = @transform_5, window_bounds = array<i64: 1, 8>}, {pipeline_mode = #tpu.pipeline_mode<synchronous>, transform_indices = @transform_6, window_bounds = array<i64: 128, 128>}, {pipeline_mode = #tpu.pipeline_mode<synchronous>, transform_indices = @transform_7, window_bounds = array<i64: 2, 1, 128>}, {pipeline_mode = #tpu.pipeline_mode<synchronous>, transform_indices = @transform_8, window_bounds = array<i64: 2, 1, 128>}, {pipeline_mode = #tpu.pipeline_mode<synchronous>, transform_indices = @transform_9, window_bounds = array<i64: 2, 128, 384>}, {pipeline_mode = #tpu.pipeline_mode<synchronous>, transform_indices = @transform_10, window_bounds = array<i64: 2, 1, 384>}, {pipeline_mode = #tpu.pipeline_mode<synchronous>, transform_indices = @transform_11, window_bounds = array<i64: 2, 128, 128>}, {pipeline_mode = #tpu.pipeline_mode<synchronous>, transform_indices = @transform_12, window_bounds = array<i64: 2, 1, 128>}, {pipeline_mode = #tpu.pipeline_mode<synchronous>, transform_indices = @transform_13, window_bounds = array<i64: 2, 128, 384>}, {pipeline_mode = #tpu.pipeline_mode<synchronous>, transform_indices = @transform_14, window_bounds = array<i64: 2, 1, 384>}, {pipeline_mode = #tpu.pipeline_mode<synchronous>, transform_indices = @transform_15, window_bounds = array<i64: 2, 128, 128>}, {pipeline_mode = #tpu.pipeline_mode<synchronous>, transform_indices = @transform_16, window_bounds = array<i64: 2, 1, 128>}, {transform_indices = @transform_17, window_bounds = array<i64: 1, 8, 128>}, {transform_indices = @transform_18, window_bounds = array<i64: 1, 1, 128>}]} {
    %c0 = arith.constant 0 : index
    %c0_0 = arith.constant 0 : index
    %c0_1 = arith.constant 0 : index
    %0 = vector.load %arg1[%c0, %c0_0, %c0_1] : memref<1x8x128xf32, #tpu.memory_space<vmem>>, vector<1x8x128xf32>
    %1 = vector.shape_cast %0 : vector<1x8x128xf32> to vector<8x128xf32>
    %c0_2 = arith.constant 0 : index
    %c0_3 = arith.constant 0 : index
    %c0_4 = arith.constant 0 : index
    %2 = vector.load %arg2[%c0_2, %c0_3, %c0_4] : memref<1x8x128xf32, #tpu.memory_space<vmem>>, vector<1x8x128xf32>
    %3 = vector.shape_cast %2 : vector<1x8x128xf32> to vector<8x128xf32>
    %c0_5 = arith.constant 0 : index
    %c0_6 = arith.constant 0 : index
    %4 = vector.load %arg7[%c0_5, %c0_6] : memref<128x128xf32, #tpu.memory_space<vmem>>, vector<128x128xf32>
    %cst = arith.constant 0.000000e+00 : f32
    %5 = vector.broadcast %cst : f32 to vector<1x128xf32>
    %cst_7 = arith.constant dense<0.000000e+00> : vector<128xf32>
    %6 = vector.multi_reduction <add>, %1, %cst_7 [0] : vector<8x128xf32> to vector<128xf32>
    %7 = vector.shape_cast %6 : vector<128xf32> to vector<1x128xf32>
    %cst_8 = arith.constant 1.250000e-01 : f32
    %8 = vector.broadcast %cst_8 : f32 to vector<1x128xf32>
    %9 = arith.mulf %7, %8 : vector<1x128xf32>
    %c0_i32 = arith.constant 0 : i32
    %10 = arith.index_cast %c0_i32 : i32 to index
    %c0_9 = arith.constant 0 : index
    %c0_10 = arith.constant 0 : index
    %11 = vector.load %arg8[%10, %c0_9, %c0_10] : memref<2x1x128xf32, #tpu.memory_space<vmem>>, vector<1x1x128xf32>
    %12 = vector.shape_cast %11 : vector<1x1x128xf32> to vector<1x128xf32>
    %13 = arith.index_cast %c0_i32 : i32 to index
    %c0_11 = arith.constant 0 : index
    %c0_12 = arith.constant 0 : index
    %14 = vector.load %arg9[%13, %c0_11, %c0_12] : memref<2x1x128xf32, #tpu.memory_space<vmem>>, vector<1x1x128xf32>
    %15 = vector.shape_cast %14 : vector<1x1x128xf32> to vector<1x128xf32>
    %cst_13 = arith.constant dense<0.000000e+00> : vector<8xf32>
    %16 = vector.multi_reduction <add>, %1, %cst_13 [1] : vector<8x128xf32> to vector<8xf32>
    %17 = vector.shape_cast %16 : vector<8xf32> to vector<8x1xf32>
    %cst_14 = arith.constant 3.125000e-02 : f32
    %18 = vector.broadcast %cst_14 : f32 to vector<8x1xf32>
    %19 = arith.mulf %17, %18 : vector<8x1xf32>
    %20 = arith.mulf %1, %1 : vector<8x128xf32>
    %cst_15 = arith.constant dense<0.000000e+00> : vector<8xf32>
    %21 = vector.multi_reduction <add>, %20, %cst_15 [1] : vector<8x128xf32> to vector<8xf32>
    %22 = vector.shape_cast %21 : vector<8xf32> to vector<8x1xf32>
    %cst_16 = arith.constant 3.125000e-02 : f32
    %23 = vector.broadcast %cst_16 : f32 to vector<8x1xf32>
    %24 = arith.mulf %22, %23 : vector<8x1xf32>
    %25 = vector.broadcast %19 : vector<8x1xf32> to vector<8x128xf32>
    %26 = arith.subf %1, %25 : vector<8x128xf32>
    %27 = arith.mulf %19, %19 : vector<8x1xf32>
    %28 = arith.subf %24, %27 : vector<8x1xf32>
    %cst_17 = arith.constant 9.99999997E-7 : f32
    %29 = vector.broadcast %cst_17 : f32 to vector<8x1xf32>
    %30 = arith.addf %28, %29 : vector<8x1xf32>
    %31 = math.rsqrt %30 : vector<8x1xf32>
    %32 = vector.broadcast %31 : vector<8x1xf32> to vector<8x128xf32>
    %33 = arith.mulf %26, %32 : vector<8x128xf32>
    %34 = vector.broadcast %12 : vector<1x128xf32> to vector<8x128xf32>
    %35 = arith.mulf %33, %34 : vector<8x128xf32>
    %36 = vector.broadcast %15 : vector<1x128xf32> to vector<8x128xf32>
    %37 = arith.addf %35, %36 : vector<8x128xf32>
    %38 = tpu.concatenate %37, %1, %9 in 0 : vector<8x128xf32>, vector<8x128xf32>, vector<1x128xf32> -> vector<17x128xf32>
    %39 = arith.index_cast %c0_i32 : i32 to index
    %c0_18 = arith.constant 0 : index
    %c0_19 = arith.constant 0 : index
    %40 = vector.load %arg10[%39, %c0_18, %c0_19] : memref<2x128x384xf32, #tpu.memory_space<vmem>>, vector<1x128x384xf32>
    %41 = vector.shape_cast %40 : vector<1x128x384xf32> to vector<128x384xf32>
    %cst_20 = arith.constant dense<0.000000e+00> : vector<17x384xf32>
    %42 = tpu.matmul %38, %41, %cst_20 {dimension_numbers = #tpu.dot_dimension_numbers<[1], [0], [0], [1], [0, 0, 1, 1], [], []>} : vector<17x128xf32>, vector<128x384xf32>, vector<17x384xf32> -> vector<17x384xf32>
    %43 = arith.index_cast %c0_i32 : i32 to index
    %c0_21 = arith.constant 0 : index
    %c0_22 = arith.constant 0 : index
    %44 = vector.load %arg11[%43, %c0_21, %c0_22] : memref<2x1x384xf32, #tpu.memory_space<vmem>>, vector<1x1x384xf32>
    %45 = vector.shape_cast %44 : vector<1x1x384xf32> to vector<1x384xf32>
    %46 = vector.broadcast %45 : vector<1x384xf32> to vector<17x384xf32>
    %47 = arith.addf %42, %46 : vector<17x384xf32>
    %48 = vector.extract_strided_slice %47 {offsets = [0, 0], sizes = [8, 128], strides = [1, 1]} : vector<17x384xf32> to vector<8x128xf32>
    %49 = vector.extract_strided_slice %47 {offsets = [0, 128], sizes = [8, 128], strides = [1, 1]} : vector<17x384xf32> to vector<8x128xf32>
    %50 = vector.extract_strided_slice %47 {offsets = [0, 256], sizes = [8, 128], strides = [1, 1]} : vector<17x384xf32> to vector<8x128xf32>
    %51 = vector.extract_strided_slice %47 {offsets = [8, 128], sizes = [8, 128], strides = [1, 1]} : vector<17x384xf32> to vector<8x128xf32>
    %52 = vector.extract_strided_slice %47 {offsets = [8, 256], sizes = [8, 128], strides = [1, 1]} : vector<17x384xf32> to vector<8x128xf32>
    %53 = vector.extract_strided_slice %47 {offsets = [16, 128], sizes = [1, 128], strides = [1, 1]} : vector<17x384xf32> to vector<1x128xf32>
    %54 = vector.extract_strided_slice %47 {offsets = [16, 256], sizes = [1, 128], strides = [1, 1]} : vector<17x384xf32> to vector<1x128xf32>
    %55 = vector.extract_strided_slice %49 {offsets = [0, 0], sizes = [7, 128], strides = [1, 1]} : vector<8x128xf32> to vector<7x128xf32>
    %56 = tpu.concatenate %5, %55 in 0 : vector<1x128xf32>, vector<7x128xf32> -> vector<8x128xf32>
    %57 = vector.extract_strided_slice %49 {offsets = [1, 0], sizes = [7, 128], strides = [1, 1]} : vector<8x128xf32> to vector<7x128xf32>
    %58 = tpu.concatenate %57, %5 in 0 : vector<7x128xf32>, vector<1x128xf32> -> vector<8x128xf32>
    %59 = vector.extract_strided_slice %50 {offsets = [0, 0], sizes = [7, 128], strides = [1, 1]} : vector<8x128xf32> to vector<7x128xf32>
    %60 = tpu.concatenate %5, %59 in 0 : vector<1x128xf32>, vector<7x128xf32> -> vector<8x128xf32>
    %61 = vector.extract_strided_slice %50 {offsets = [1, 0], sizes = [7, 128], strides = [1, 1]} : vector<8x128xf32> to vector<7x128xf32>
    %62 = tpu.concatenate %61, %5 in 0 : vector<7x128xf32>, vector<1x128xf32> -> vector<8x128xf32>
    %63 = arith.mulf %48, %56 : vector<8x128xf32>
    %cst_23 = arith.constant dense<0.000000e+00> : vector<8x128xf32>
    %64 = tpu.matmul %63, %4, %cst_23 {dimension_numbers = #tpu.dot_dimension_numbers<[1], [0], [0], [1], [0, 0, 1, 1], [], []>} : vector<8x128xf32>, vector<128x128xf32>, vector<8x128xf32> -> vector<8x128xf32>
    %65 = arith.mulf %48, %49 : vector<8x128xf32>
    %cst_24 = arith.constant dense<0.000000e+00> : vector<8x128xf32>
    %66 = tpu.matmul %65, %4, %cst_24 {dimension_numbers = #tpu.dot_dimension_numbers<[1], [0], [0], [1], [0, 0, 1, 1], [], []>} : vector<8x128xf32>, vector<128x128xf32>, vector<8x128xf32> -> vector<8x128xf32>
    %67 = arith.mulf %48, %58 : vector<8x128xf32>
    %cst_25 = arith.constant dense<0.000000e+00> : vector<8x128xf32>
    %68 = tpu.matmul %67, %4, %cst_25 {dimension_numbers = #tpu.dot_dimension_numbers<[1], [0], [0], [1], [0, 0, 1, 1], [], []>} : vector<8x128xf32>, vector<128x128xf32>, vector<8x128xf32> -> vector<8x128xf32>
    %69 = arith.mulf %48, %51 : vector<8x128xf32>
    %cst_26 = arith.constant dense<0.000000e+00> : vector<8x128xf32>
    %70 = tpu.matmul %69, %4, %cst_26 {dimension_numbers = #tpu.dot_dimension_numbers<[1], [0], [0], [1], [0, 0, 1, 1], [], []>} : vector<8x128xf32>, vector<128x128xf32>, vector<8x128xf32> -> vector<8x128xf32>
    %71 = vector.broadcast %53 : vector<1x128xf32> to vector<8x128xf32>
    %72 = arith.mulf %48, %71 : vector<8x128xf32>
    %cst_27 = arith.constant dense<0.000000e+00> : vector<8x128xf32>
    %73 = tpu.matmul %72, %4, %cst_27 {dimension_numbers = #tpu.dot_dimension_numbers<[1], [0], [0], [1], [0, 0, 1, 1], [], []>} : vector<8x128xf32>, vector<128x128xf32>, vector<8x128xf32> -> vector<8x128xf32>
    %74 = arith.maximumf %64, %66 : vector<8x128xf32>
    %75 = arith.maximumf %68, %70 : vector<8x128xf32>
    %76 = arith.maximumf %74, %75 : vector<8x128xf32>
    %77 = arith.maximumf %76, %73 : vector<8x128xf32>
    %78 = arith.subf %64, %77 : vector<8x128xf32>
    %79 = math.exp %78 : vector<8x128xf32>
    %80 = arith.subf %66, %77 : vector<8x128xf32>
    %81 = math.exp %80 : vector<8x128xf32>
    %82 = arith.subf %68, %77 : vector<8x128xf32>
    %83 = math.exp %82 : vector<8x128xf32>
    %84 = arith.subf %70, %77 : vector<8x128xf32>
    %85 = math.exp %84 : vector<8x128xf32>
    %86 = arith.subf %73, %77 : vector<8x128xf32>
    %87 = math.exp %86 : vector<8x128xf32>
    %88 = arith.addf %79, %81 : vector<8x128xf32>
    %89 = arith.addf %88, %83 : vector<8x128xf32>
    %90 = arith.addf %89, %85 : vector<8x128xf32>
    %91 = arith.addf %90, %87 : vector<8x128xf32>
    %92 = tpu.reciprocal %91 {approx = true} : vector<8x128xf32> -> vector<8x128xf32>
    %93 = arith.mulf %79, %60 : vector<8x128xf32>
    %94 = arith.mulf %81, %50 : vector<8x128xf32>
    %95 = arith.addf %93, %94 : vector<8x128xf32>
    %96 = arith.mulf %83, %62 : vector<8x128xf32>
    %97 = arith.addf %95, %96 : vector<8x128xf32>
    %98 = arith.mulf %85, %52 : vector<8x128xf32>
    %99 = arith.addf %97, %98 : vector<8x128xf32>
    %100 = vector.broadcast %54 : vector<1x128xf32> to vector<8x128xf32>
    %101 = arith.mulf %87, %100 : vector<8x128xf32>
    %102 = arith.addf %99, %101 : vector<8x128xf32>
    %103 = arith.mulf %102, %92 : vector<8x128xf32>
    %104 = arith.index_cast %c0_i32 : i32 to index
    %c0_28 = arith.constant 0 : index
    %c0_29 = arith.constant 0 : index
    %105 = vector.load %arg12[%104, %c0_28, %c0_29] : memref<2x128x128xf32, #tpu.memory_space<vmem>>, vector<1x128x128xf32>
    %106 = vector.shape_cast %105 : vector<1x128x128xf32> to vector<128x128xf32>
    %cst_30 = arith.constant dense<0.000000e+00> : vector<8x128xf32>
    %107 = tpu.matmul %103, %106, %cst_30 {dimension_numbers = #tpu.dot_dimension_numbers<[1], [0], [0], [1], [0, 0, 1, 1], [], []>} : vector<8x128xf32>, vector<128x128xf32>, vector<8x128xf32> -> vector<8x128xf32>
    %108 = arith.index_cast %c0_i32 : i32 to index
    %c0_31 = arith.constant 0 : index
    %c0_32 = arith.constant 0 : index
    %109 = vector.load %arg13[%108, %c0_31, %c0_32] : memref<2x1x128xf32, #tpu.memory_space<vmem>>, vector<1x1x128xf32>
    %110 = vector.shape_cast %109 : vector<1x1x128xf32> to vector<1x128xf32>
    %111 = vector.broadcast %110 : vector<1x128xf32> to vector<8x128xf32>
    %112 = arith.addf %107, %111 : vector<8x128xf32>
    %cst_33 = arith.constant 0.000000e+00 : f32
    %113 = vector.broadcast %cst_33 : f32 to vector<8x128xf32>
    %114 = arith.cmpf oge, %112, %113 : vector<8x128xf32>
    %cst_34 = arith.constant 0.00999999977 : f32
    %115 = vector.broadcast %cst_34 : f32 to vector<8x128xf32>
    %116 = arith.mulf %115, %112 : vector<8x128xf32>
    %117 = arith.select %114, %112, %116 : vector<8x128xi1>, vector<8x128xf32>
    %cst_35 = arith.constant dense<0.000000e+00> : vector<1xf32>
    %118 = vector.multi_reduction <add>, %9, %cst_35 [1] : vector<1x128xf32> to vector<1xf32>
    %119 = vector.shape_cast %118 : vector<1xf32> to vector<1x1xf32>
    %cst_36 = arith.constant 3.125000e-02 : f32
    %120 = vector.broadcast %cst_36 : f32 to vector<1x1xf32>
    %121 = arith.mulf %119, %120 : vector<1x1xf32>
    %122 = arith.mulf %9, %9 : vector<1x128xf32>
    %cst_37 = arith.constant dense<0.000000e+00> : vector<1xf32>
    %123 = vector.multi_reduction <add>, %122, %cst_37 [1] : vector<1x128xf32> to vector<1xf32>
    %124 = vector.shape_cast %123 : vector<1xf32> to vector<1x1xf32>
    %cst_38 = arith.constant 3.125000e-02 : f32
    %125 = vector.broadcast %cst_38 : f32 to vector<1x1xf32>
    %126 = arith.mulf %124, %125 : vector<1x1xf32>
    %127 = vector.broadcast %121 : vector<1x1xf32> to vector<1x128xf32>
    %128 = arith.subf %9, %127 : vector<1x128xf32>
    %129 = arith.mulf %121, %121 : vector<1x1xf32>
    %130 = arith.subf %126, %129 : vector<1x1xf32>
    %cst_39 = arith.constant 9.99999997E-7 : f32
    %131 = vector.broadcast %cst_39 : f32 to vector<1x1xf32>
    %132 = arith.addf %130, %131 : vector<1x1xf32>
    %133 = math.rsqrt %132 : vector<1x1xf32>
    %134 = vector.broadcast %133 : vector<1x1xf32> to vector<1x128xf32>
    %135 = arith.mulf %128, %134 : vector<1x128xf32>
    %136 = arith.mulf %135, %12 : vector<1x128xf32>
    %137 = arith.addf %136, %15 : vector<1x128xf32>
    %138 = tpu.concatenate %137, %9, %117 in 0 : vector<1x128xf32>, vector<1x128xf32>, vector<8x128xf32> -> vector<10x128xf32>
    %139 = arith.index_cast %c0_i32 : i32 to index
    %c0_40 = arith.constant 0 : index
    %c0_41 = arith.constant 0 : index
    %140 = vector.load %arg14[%139, %c0_40, %c0_41] : memref<2x128x384xf32, #tpu.memory_space<vmem>>, vector<1x128x384xf32>
    %141 = vector.shape_cast %140 : vector<1x128x384xf32> to vector<128x384xf32>
    %cst_42 = arith.constant dense<0.000000e+00> : vector<10x384xf32>
    %142 = tpu.matmul %138, %141, %cst_42 {dimension_numbers = #tpu.dot_dimension_numbers<[1], [0], [0], [1], [0, 0, 1, 1], [], []>} : vector<10x128xf32>, vector<128x384xf32>, vector<10x384xf32> -> vector<10x384xf32>
    %143 = arith.index_cast %c0_i32 : i32 to index
    %c0_43 = arith.constant 0 : index
    %c0_44 = arith.constant 0 : index
    %144 = vector.load %arg15[%143, %c0_43, %c0_44] : memref<2x1x384xf32, #tpu.memory_space<vmem>>, vector<1x1x384xf32>
    %145 = vector.shape_cast %144 : vector<1x1x384xf32> to vector<1x384xf32>
    %146 = vector.broadcast %145 : vector<1x384xf32> to vector<10x384xf32>
    %147 = arith.addf %142, %146 : vector<10x384xf32>
    %148 = vector.extract_strided_slice %147 {offsets = [0, 0], sizes = [1, 128], strides = [1, 1]} : vector<10x384xf32> to vector<1x128xf32>
    %149 = vector.extract_strided_slice %147 {offsets = [1, 128], sizes = [1, 128], strides = [1, 1]} : vector<10x384xf32> to vector<1x128xf32>
    %150 = vector.extract_strided_slice %147 {offsets = [1, 256], sizes = [1, 128], strides = [1, 1]} : vector<10x384xf32> to vector<1x128xf32>
    %151 = vector.extract_strided_slice %147 {offsets = [2, 128], sizes = [8, 128], strides = [1, 1]} : vector<10x384xf32> to vector<8x128xf32>
    %152 = vector.extract_strided_slice %147 {offsets = [2, 256], sizes = [8, 128], strides = [1, 1]} : vector<10x384xf32> to vector<8x128xf32>
    %153 = arith.mulf %148, %149 : vector<1x128xf32>
    %cst_45 = arith.constant dense<0.000000e+00> : vector<1x128xf32>
    %154 = tpu.matmul %153, %4, %cst_45 {dimension_numbers = #tpu.dot_dimension_numbers<[1], [0], [0], [1], [0, 0, 1, 1], [], []>} : vector<1x128xf32>, vector<128x128xf32>, vector<1x128xf32> -> vector<1x128xf32>
    %155 = vector.broadcast %148 : vector<1x128xf32> to vector<8x128xf32>
    %156 = arith.mulf %155, %151 : vector<8x128xf32>
    %cst_46 = arith.constant dense<0.000000e+00> : vector<8x128xf32>
    %157 = tpu.matmul %156, %4, %cst_46 {dimension_numbers = #tpu.dot_dimension_numbers<[1], [0], [0], [1], [0, 0, 1, 1], [], []>} : vector<8x128xf32>, vector<128x128xf32>, vector<8x128xf32> -> vector<8x128xf32>
    %cst_47 = arith.constant 0.000000e+00 : f32
    %158 = vector.broadcast %cst_47 : f32 to vector<8x128xf32>
    %159 = arith.cmpf ogt, %3, %158 : vector<8x128xf32>
    %cst_48 = arith.constant -1.000000e+30 : f32
    %160 = vector.broadcast %cst_48 : f32 to vector<8x128xf32>
    %161 = arith.select %159, %160, %157 : vector<8x128xi1>, vector<8x128xf32>
    %cst_49 = arith.constant dense<0xFF800000> : vector<128xf32>
    %162 = vector.multi_reduction <maximumf>, %154, %cst_49 [0] : vector<1x128xf32> to vector<128xf32>
    %163 = vector.shape_cast %162 : vector<128xf32> to vector<1x128xf32>
    %cst_50 = arith.constant dense<0xFF800000> : vector<128xf32>
    %164 = vector.multi_reduction <maximumf>, %161, %cst_50 [0] : vector<8x128xf32> to vector<128xf32>
    %165 = vector.shape_cast %164 : vector<128xf32> to vector<1x128xf32>
    %166 = arith.maximumf %163, %165 : vector<1x128xf32>
    %167 = arith.subf %154, %166 : vector<1x128xf32>
    %168 = math.exp %167 : vector<1x128xf32>
    %169 = vector.broadcast %166 : vector<1x128xf32> to vector<8x128xf32>
    %170 = arith.subf %161, %169 : vector<8x128xf32>
    %171 = math.exp %170 : vector<8x128xf32>
    %cst_51 = arith.constant dense<0.000000e+00> : vector<128xf32>
    %172 = vector.multi_reduction <add>, %171, %cst_51 [0] : vector<8x128xf32> to vector<128xf32>
    %173 = vector.shape_cast %172 : vector<128xf32> to vector<1x128xf32>
    %174 = arith.addf %168, %173 : vector<1x128xf32>
    %175 = arith.mulf %168, %150 : vector<1x128xf32>
    %176 = arith.mulf %171, %152 : vector<8x128xf32>
    %cst_52 = arith.constant dense<0.000000e+00> : vector<128xf32>
    %177 = vector.multi_reduction <add>, %176, %cst_52 [0] : vector<8x128xf32> to vector<128xf32>
    %178 = vector.shape_cast %177 : vector<128xf32> to vector<1x128xf32>
    %179 = arith.addf %175, %178 : vector<1x128xf32>
    %180 = tpu.reciprocal %174 {approx = true} : vector<1x128xf32> -> vector<1x128xf32>
    %181 = arith.mulf %179, %180 : vector<1x128xf32>
    %182 = arith.index_cast %c0_i32 : i32 to index
    %c0_53 = arith.constant 0 : index
    %c0_54 = arith.constant 0 : index
    %183 = vector.load %arg16[%182, %c0_53, %c0_54] : memref<2x128x128xf32, #tpu.memory_space<vmem>>, vector<1x128x128xf32>
    %184 = vector.shape_cast %183 : vector<1x128x128xf32> to vector<128x128xf32>
    %cst_55 = arith.constant dense<0.000000e+00> : vector<1x128xf32>
    %185 = tpu.matmul %181, %184, %cst_55 {dimension_numbers = #tpu.dot_dimension_numbers<[1], [0], [0], [1], [0, 0, 1, 1], [], []>} : vector<1x128xf32>, vector<128x128xf32>, vector<1x128xf32> -> vector<1x128xf32>
    %186 = arith.index_cast %c0_i32 : i32 to index
    %c0_56 = arith.constant 0 : index
    %c0_57 = arith.constant 0 : index
    %187 = vector.load %arg17[%186, %c0_56, %c0_57] : memref<2x1x128xf32, #tpu.memory_space<vmem>>, vector<1x1x128xf32>
    %188 = vector.shape_cast %187 : vector<1x1x128xf32> to vector<1x128xf32>
    %189 = arith.addf %185, %188 : vector<1x128xf32>
    %cst_58 = arith.constant 0.000000e+00 : f32
    %190 = vector.broadcast %cst_58 : f32 to vector<1x128xf32>
    %191 = arith.cmpf oge, %189, %190 : vector<1x128xf32>
    %cst_59 = arith.constant 0.00999999977 : f32
    %192 = vector.broadcast %cst_59 : f32 to vector<1x128xf32>
    %193 = arith.mulf %192, %189 : vector<1x128xf32>
    %194 = arith.select %191, %189, %193 : vector<1x128xi1>, vector<1x128xf32>
    %cst_60 = arith.constant 0.000000e+00 : f32
    %195 = vector.broadcast %cst_60 : f32 to vector<8x128xf32>
    %196 = arith.cmpf ogt, %3, %195 : vector<8x128xf32>
    %cst_61 = arith.constant 0.000000e+00 : f32
    %197 = vector.broadcast %cst_61 : f32 to vector<8x128xf32>
    %198 = arith.select %196, %197, %117 : vector<8x128xi1>, vector<8x128xf32>
    %c1_i32 = arith.constant 1 : i32
    %199 = arith.index_cast %c1_i32 : i32 to index
    %c0_62 = arith.constant 0 : index
    %c0_63 = arith.constant 0 : index
    %200 = vector.load %arg8[%199, %c0_62, %c0_63] : memref<2x1x128xf32, #tpu.memory_space<vmem>>, vector<1x1x128xf32>
    %201 = vector.shape_cast %200 : vector<1x1x128xf32> to vector<1x128xf32>
    %202 = arith.index_cast %c1_i32 : i32 to index
    %c0_64 = arith.constant 0 : index
    %c0_65 = arith.constant 0 : index
    %203 = vector.load %arg9[%202, %c0_64, %c0_65] : memref<2x1x128xf32, #tpu.memory_space<vmem>>, vector<1x1x128xf32>
    %204 = vector.shape_cast %203 : vector<1x1x128xf32> to vector<1x128xf32>
    %cst_66 = arith.constant dense<0.000000e+00> : vector<8xf32>
    %205 = vector.multi_reduction <add>, %198, %cst_66 [1] : vector<8x128xf32> to vector<8xf32>
    %206 = vector.shape_cast %205 : vector<8xf32> to vector<8x1xf32>
    %cst_67 = arith.constant 3.125000e-02 : f32
    %207 = vector.broadcast %cst_67 : f32 to vector<8x1xf32>
    %208 = arith.mulf %206, %207 : vector<8x1xf32>
    %209 = arith.mulf %198, %198 : vector<8x128xf32>
    %cst_68 = arith.constant dense<0.000000e+00> : vector<8xf32>
    %210 = vector.multi_reduction <add>, %209, %cst_68 [1] : vector<8x128xf32> to vector<8xf32>
    %211 = vector.shape_cast %210 : vector<8xf32> to vector<8x1xf32>
    %cst_69 = arith.constant 3.125000e-02 : f32
    %212 = vector.broadcast %cst_69 : f32 to vector<8x1xf32>
    %213 = arith.mulf %211, %212 : vector<8x1xf32>
    %214 = vector.broadcast %208 : vector<8x1xf32> to vector<8x128xf32>
    %215 = arith.subf %198, %214 : vector<8x128xf32>
    %216 = arith.mulf %208, %208 : vector<8x1xf32>
    %217 = arith.subf %213, %216 : vector<8x1xf32>
    %cst_70 = arith.constant 9.99999997E-7 : f32
    %218 = vector.broadcast %cst_70 : f32 to vector<8x1xf32>
    %219 = arith.addf %217, %218 : vector<8x1xf32>
    %220 = math.rsqrt %219 : vector<8x1xf32>
    %221 = vector.broadcast %220 : vector<8x1xf32> to vector<8x128xf32>
    %222 = arith.mulf %215, %221 : vector<8x128xf32>
    %223 = vector.broadcast %201 : vector<1x128xf32> to vector<8x128xf32>
    %224 = arith.mulf %222, %223 : vector<8x128xf32>
    %225 = vector.broadcast %204 : vector<1x128xf32> to vector<8x128xf32>
    %226 = arith.addf %224, %225 : vector<8x128xf32>
    %227 = tpu.concatenate %226, %1, %194 in 0 : vector<8x128xf32>, vector<8x128xf32>, vector<1x128xf32> -> vector<17x128xf32>
    %228 = arith.index_cast %c1_i32 : i32 to index
    %c0_71 = arith.constant 0 : index
    %c0_72 = arith.constant 0 : index
    %229 = vector.load %arg10[%228, %c0_71, %c0_72] : memref<2x128x384xf32, #tpu.memory_space<vmem>>, vector<1x128x384xf32>
    %230 = vector.shape_cast %229 : vector<1x128x384xf32> to vector<128x384xf32>
    %cst_73 = arith.constant dense<0.000000e+00> : vector<17x384xf32>
    %231 = tpu.matmul %227, %230, %cst_73 {dimension_numbers = #tpu.dot_dimension_numbers<[1], [0], [0], [1], [0, 0, 1, 1], [], []>} : vector<17x128xf32>, vector<128x384xf32>, vector<17x384xf32> -> vector<17x384xf32>
    %232 = arith.index_cast %c1_i32 : i32 to index
    %c0_74 = arith.constant 0 : index
    %c0_75 = arith.constant 0 : index
    %233 = vector.load %arg11[%232, %c0_74, %c0_75] : memref<2x1x384xf32, #tpu.memory_space<vmem>>, vector<1x1x384xf32>
    %234 = vector.shape_cast %233 : vector<1x1x384xf32> to vector<1x384xf32>
    %235 = vector.broadcast %234 : vector<1x384xf32> to vector<17x384xf32>
    %236 = arith.addf %231, %235 : vector<17x384xf32>
    %237 = vector.extract_strided_slice %236 {offsets = [0, 0], sizes = [8, 128], strides = [1, 1]} : vector<17x384xf32> to vector<8x128xf32>
    %238 = vector.extract_strided_slice %236 {offsets = [0, 128], sizes = [8, 128], strides = [1, 1]} : vector<17x384xf32> to vector<8x128xf32>
    %239 = vector.extract_strided_slice %236 {offsets = [0, 256], sizes = [8, 128], strides = [1, 1]} : vector<17x384xf32> to vector<8x128xf32>
    %240 = vector.extract_strided_slice %236 {offsets = [8, 128], sizes = [8, 128], strides = [1, 1]} : vector<17x384xf32> to vector<8x128xf32>
    %241 = vector.extract_strided_slice %236 {offsets = [8, 256], sizes = [8, 128], strides = [1, 1]} : vector<17x384xf32> to vector<8x128xf32>
    %242 = vector.extract_strided_slice %236 {offsets = [16, 128], sizes = [1, 128], strides = [1, 1]} : vector<17x384xf32> to vector<1x128xf32>
    %243 = vector.extract_strided_slice %236 {offsets = [16, 256], sizes = [1, 128], strides = [1, 1]} : vector<17x384xf32> to vector<1x128xf32>
    %244 = vector.extract_strided_slice %238 {offsets = [0, 0], sizes = [7, 128], strides = [1, 1]} : vector<8x128xf32> to vector<7x128xf32>
    %245 = tpu.concatenate %5, %244 in 0 : vector<1x128xf32>, vector<7x128xf32> -> vector<8x128xf32>
    %246 = vector.extract_strided_slice %238 {offsets = [1, 0], sizes = [7, 128], strides = [1, 1]} : vector<8x128xf32> to vector<7x128xf32>
    %247 = tpu.concatenate %246, %5 in 0 : vector<7x128xf32>, vector<1x128xf32> -> vector<8x128xf32>
    %248 = vector.extract_strided_slice %239 {offsets = [0, 0], sizes = [7, 128], strides = [1, 1]} : vector<8x128xf32> to vector<7x128xf32>
    %249 = tpu.concatenate %5, %248 in 0 : vector<1x128xf32>, vector<7x128xf32> -> vector<8x128xf32>
    %250 = vector.extract_strided_slice %239 {offsets = [1, 0], sizes = [7, 128], strides = [1, 1]} : vector<8x128xf32> to vector<7x128xf32>
    %251 = tpu.concatenate %250, %5 in 0 : vector<7x128xf32>, vector<1x128xf32> -> vector<8x128xf32>
    %252 = arith.mulf %237, %245 : vector<8x128xf32>
    %cst_76 = arith.constant dense<0.000000e+00> : vector<8x128xf32>
    %253 = tpu.matmul %252, %4, %cst_76 {dimension_numbers = #tpu.dot_dimension_numbers<[1], [0], [0], [1], [0, 0, 1, 1], [], []>} : vector<8x128xf32>, vector<128x128xf32>, vector<8x128xf32> -> vector<8x128xf32>
    %254 = arith.mulf %237, %238 : vector<8x128xf32>
    %cst_77 = arith.constant dense<0.000000e+00> : vector<8x128xf32>
    %255 = tpu.matmul %254, %4, %cst_77 {dimension_numbers = #tpu.dot_dimension_numbers<[1], [0], [0], [1], [0, 0, 1, 1], [], []>} : vector<8x128xf32>, vector<128x128xf32>, vector<8x128xf32> -> vector<8x128xf32>
    %256 = arith.mulf %237, %247 : vector<8x128xf32>
    %cst_78 = arith.constant dense<0.000000e+00> : vector<8x128xf32>
    %257 = tpu.matmul %256, %4, %cst_78 {dimension_numbers = #tpu.dot_dimension_numbers<[1], [0], [0], [1], [0, 0, 1, 1], [], []>} : vector<8x128xf32>, vector<128x128xf32>, vector<8x128xf32> -> vector<8x128xf32>
    %258 = arith.mulf %237, %240 : vector<8x128xf32>
    %cst_79 = arith.constant dense<0.000000e+00> : vector<8x128xf32>
    %259 = tpu.matmul %258, %4, %cst_79 {dimension_numbers = #tpu.dot_dimension_numbers<[1], [0], [0], [1], [0, 0, 1, 1], [], []>} : vector<8x128xf32>, vector<128x128xf32>, vector<8x128xf32> -> vector<8x128xf32>
    %260 = vector.broadcast %242 : vector<1x128xf32> to vector<8x128xf32>
    %261 = arith.mulf %237, %260 : vector<8x128xf32>
    %cst_80 = arith.constant dense<0.000000e+00> : vector<8x128xf32>
    %262 = tpu.matmul %261, %4, %cst_80 {dimension_numbers = #tpu.dot_dimension_numbers<[1], [0], [0], [1], [0, 0, 1, 1], [], []>} : vector<8x128xf32>, vector<128x128xf32>, vector<8x128xf32> -> vector<8x128xf32>
    %263 = arith.maximumf %253, %255 : vector<8x128xf32>
    %264 = arith.maximumf %257, %259 : vector<8x128xf32>
    %265 = arith.maximumf %263, %264 : vector<8x128xf32>
    %266 = arith.maximumf %265, %262 : vector<8x128xf32>
    %267 = arith.subf %253, %266 : vector<8x128xf32>
    %268 = math.exp %267 : vector<8x128xf32>
    %269 = arith.subf %255, %266 : vector<8x128xf32>
    %270 = math.exp %269 : vector<8x128xf32>
    %271 = arith.subf %257, %266 : vector<8x128xf32>
    %272 = math.exp %271 : vector<8x128xf32>
    %273 = arith.subf %259, %266 : vector<8x128xf32>
    %274 = math.exp %273 : vector<8x128xf32>
    %275 = arith.subf %262, %266 : vector<8x128xf32>
    %276 = math.exp %275 : vector<8x128xf32>
    %277 = arith.addf %268, %270 : vector<8x128xf32>
    %278 = arith.addf %277, %272 : vector<8x128xf32>
    %279 = arith.addf %278, %274 : vector<8x128xf32>
    %280 = arith.addf %279, %276 : vector<8x128xf32>
    %281 = tpu.reciprocal %280 {approx = true} : vector<8x128xf32> -> vector<8x128xf32>
    %282 = arith.mulf %268, %249 : vector<8x128xf32>
    %283 = arith.mulf %270, %239 : vector<8x128xf32>
    %284 = arith.addf %282, %283 : vector<8x128xf32>
    %285 = arith.mulf %272, %251 : vector<8x128xf32>
    %286 = arith.addf %284, %285 : vector<8x128xf32>
    %287 = arith.mulf %274, %241 : vector<8x128xf32>
    %288 = arith.addf %286, %287 : vector<8x128xf32>
    %289 = vector.broadcast %243 : vector<1x128xf32> to vector<8x128xf32>
    %290 = arith.mulf %276, %289 : vector<8x128xf32>
    %291 = arith.addf %288, %290 : vector<8x128xf32>
    %292 = arith.mulf %291, %281 : vector<8x128xf32>
    %293 = arith.index_cast %c1_i32 : i32 to index
    %c0_81 = arith.constant 0 : index
    %c0_82 = arith.constant 0 : index
    %294 = vector.load %arg12[%293, %c0_81, %c0_82] : memref<2x128x128xf32, #tpu.memory_space<vmem>>, vector<1x128x128xf32>
    %295 = vector.shape_cast %294 : vector<1x128x128xf32> to vector<128x128xf32>
    %cst_83 = arith.constant dense<0.000000e+00> : vector<8x128xf32>
    %296 = tpu.matmul %292, %295, %cst_83 {dimension_numbers = #tpu.dot_dimension_numbers<[1], [0], [0], [1], [0, 0, 1, 1], [], []>} : vector<8x128xf32>, vector<128x128xf32>, vector<8x128xf32> -> vector<8x128xf32>
    %297 = arith.index_cast %c1_i32 : i32 to index
    %c0_84 = arith.constant 0 : index
    %c0_85 = arith.constant 0 : index
    %298 = vector.load %arg13[%297, %c0_84, %c0_85] : memref<2x1x128xf32, #tpu.memory_space<vmem>>, vector<1x1x128xf32>
    %299 = vector.shape_cast %298 : vector<1x1x128xf32> to vector<1x128xf32>
    %300 = vector.broadcast %299 : vector<1x128xf32> to vector<8x128xf32>
    %301 = arith.addf %296, %300 : vector<8x128xf32>
    %cst_86 = arith.constant 0.000000e+00 : f32
    %302 = vector.broadcast %cst_86 : f32 to vector<8x128xf32>
    %303 = arith.cmpf oge, %301, %302 : vector<8x128xf32>
    %cst_87 = arith.constant 0.00999999977 : f32
    %304 = vector.broadcast %cst_87 : f32 to vector<8x128xf32>
    %305 = arith.mulf %304, %301 : vector<8x128xf32>
    %306 = arith.select %303, %301, %305 : vector<8x128xi1>, vector<8x128xf32>
    %cst_88 = arith.constant dense<0.000000e+00> : vector<1xf32>
    %307 = vector.multi_reduction <add>, %194, %cst_88 [1] : vector<1x128xf32> to vector<1xf32>
    %308 = vector.shape_cast %307 : vector<1xf32> to vector<1x1xf32>
    %cst_89 = arith.constant 3.125000e-02 : f32
    %309 = vector.broadcast %cst_89 : f32 to vector<1x1xf32>
    %310 = arith.mulf %308, %309 : vector<1x1xf32>
    %311 = arith.mulf %194, %194 : vector<1x128xf32>
    %cst_90 = arith.constant dense<0.000000e+00> : vector<1xf32>
    %312 = vector.multi_reduction <add>, %311, %cst_90 [1] : vector<1x128xf32> to vector<1xf32>
    %313 = vector.shape_cast %312 : vector<1xf32> to vector<1x1xf32>
    %cst_91 = arith.constant 3.125000e-02 : f32
    %314 = vector.broadcast %cst_91 : f32 to vector<1x1xf32>
    %315 = arith.mulf %313, %314 : vector<1x1xf32>
    %316 = vector.broadcast %310 : vector<1x1xf32> to vector<1x128xf32>
    %317 = arith.subf %194, %316 : vector<1x128xf32>
    %318 = arith.mulf %310, %310 : vector<1x1xf32>
    %319 = arith.subf %315, %318 : vector<1x1xf32>
    %cst_92 = arith.constant 9.99999997E-7 : f32
    %320 = vector.broadcast %cst_92 : f32 to vector<1x1xf32>
    %321 = arith.addf %319, %320 : vector<1x1xf32>
    %322 = math.rsqrt %321 : vector<1x1xf32>
    %323 = vector.broadcast %322 : vector<1x1xf32> to vector<1x128xf32>
    %324 = arith.mulf %317, %323 : vector<1x128xf32>
    %325 = arith.mulf %324, %201 : vector<1x128xf32>
    %326 = arith.addf %325, %204 : vector<1x128xf32>
    %327 = tpu.concatenate %326, %194, %306 in 0 : vector<1x128xf32>, vector<1x128xf32>, vector<8x128xf32> -> vector<10x128xf32>
    %328 = arith.index_cast %c1_i32 : i32 to index
    %c0_93 = arith.constant 0 : index
    %c0_94 = arith.constant 0 : index
    %329 = vector.load %arg14[%328, %c0_93, %c0_94] : memref<2x128x384xf32, #tpu.memory_space<vmem>>, vector<1x128x384xf32>
    %330 = vector.shape_cast %329 : vector<1x128x384xf32> to vector<128x384xf32>
    %cst_95 = arith.constant dense<0.000000e+00> : vector<10x384xf32>
    %331 = tpu.matmul %327, %330, %cst_95 {dimension_numbers = #tpu.dot_dimension_numbers<[1], [0], [0], [1], [0, 0, 1, 1], [], []>} : vector<10x128xf32>, vector<128x384xf32>, vector<10x384xf32> -> vector<10x384xf32>
    %332 = arith.index_cast %c1_i32 : i32 to index
    %c0_96 = arith.constant 0 : index
    %c0_97 = arith.constant 0 : index
    %333 = vector.load %arg15[%332, %c0_96, %c0_97] : memref<2x1x384xf32, #tpu.memory_space<vmem>>, vector<1x1x384xf32>
    %334 = vector.shape_cast %333 : vector<1x1x384xf32> to vector<1x384xf32>
    %335 = vector.broadcast %334 : vector<1x384xf32> to vector<10x384xf32>
    %336 = arith.addf %331, %335 : vector<10x384xf32>
    %337 = vector.extract_strided_slice %336 {offsets = [0, 0], sizes = [1, 128], strides = [1, 1]} : vector<10x384xf32> to vector<1x128xf32>
    %338 = vector.extract_strided_slice %336 {offsets = [1, 128], sizes = [1, 128], strides = [1, 1]} : vector<10x384xf32> to vector<1x128xf32>
    %339 = vector.extract_strided_slice %336 {offsets = [1, 256], sizes = [1, 128], strides = [1, 1]} : vector<10x384xf32> to vector<1x128xf32>
    %340 = vector.extract_strided_slice %336 {offsets = [2, 128], sizes = [8, 128], strides = [1, 1]} : vector<10x384xf32> to vector<8x128xf32>
    %341 = vector.extract_strided_slice %336 {offsets = [2, 256], sizes = [8, 128], strides = [1, 1]} : vector<10x384xf32> to vector<8x128xf32>
    %342 = arith.mulf %337, %338 : vector<1x128xf32>
    %cst_98 = arith.constant dense<0.000000e+00> : vector<1x128xf32>
    %343 = tpu.matmul %342, %4, %cst_98 {dimension_numbers = #tpu.dot_dimension_numbers<[1], [0], [0], [1], [0, 0, 1, 1], [], []>} : vector<1x128xf32>, vector<128x128xf32>, vector<1x128xf32> -> vector<1x128xf32>
    %344 = vector.broadcast %337 : vector<1x128xf32> to vector<8x128xf32>
    %345 = arith.mulf %344, %340 : vector<8x128xf32>
    %cst_99 = arith.constant dense<0.000000e+00> : vector<8x128xf32>
    %346 = tpu.matmul %345, %4, %cst_99 {dimension_numbers = #tpu.dot_dimension_numbers<[1], [0], [0], [1], [0, 0, 1, 1], [], []>} : vector<8x128xf32>, vector<128x128xf32>, vector<8x128xf32> -> vector<8x128xf32>
    %cst_100 = arith.constant 0.000000e+00 : f32
    %347 = vector.broadcast %cst_100 : f32 to vector<8x128xf32>
    %348 = arith.cmpf ogt, %3, %347 : vector<8x128xf32>
    %cst_101 = arith.constant -1.000000e+30 : f32
    %349 = vector.broadcast %cst_101 : f32 to vector<8x128xf32>
    %350 = arith.select %348, %349, %346 : vector<8x128xi1>, vector<8x128xf32>
    %cst_102 = arith.constant dense<0xFF800000> : vector<128xf32>
    %351 = vector.multi_reduction <maximumf>, %343, %cst_102 [0] : vector<1x128xf32> to vector<128xf32>
    %352 = vector.shape_cast %351 : vector<128xf32> to vector<1x128xf32>
    %cst_103 = arith.constant dense<0xFF800000> : vector<128xf32>
    %353 = vector.multi_reduction <maximumf>, %350, %cst_103 [0] : vector<8x128xf32> to vector<128xf32>
    %354 = vector.shape_cast %353 : vector<128xf32> to vector<1x128xf32>
    %355 = arith.maximumf %352, %354 : vector<1x128xf32>
    %356 = arith.subf %343, %355 : vector<1x128xf32>
    %357 = math.exp %356 : vector<1x128xf32>
    %358 = vector.broadcast %355 : vector<1x128xf32> to vector<8x128xf32>
    %359 = arith.subf %350, %358 : vector<8x128xf32>
    %360 = math.exp %359 : vector<8x128xf32>
    %cst_104 = arith.constant dense<0.000000e+00> : vector<128xf32>
    %361 = vector.multi_reduction <add>, %360, %cst_104 [0] : vector<8x128xf32> to vector<128xf32>
    %362 = vector.shape_cast %361 : vector<128xf32> to vector<1x128xf32>
    %363 = arith.addf %357, %362 : vector<1x128xf32>
    %364 = arith.mulf %357, %339 : vector<1x128xf32>
    %365 = arith.mulf %360, %341 : vector<8x128xf32>
    %cst_105 = arith.constant dense<0.000000e+00> : vector<128xf32>
    %366 = vector.multi_reduction <add>, %365, %cst_105 [0] : vector<8x128xf32> to vector<128xf32>
    %367 = vector.shape_cast %366 : vector<128xf32> to vector<1x128xf32>
    %368 = arith.addf %364, %367 : vector<1x128xf32>
    %369 = tpu.reciprocal %363 {approx = true} : vector<1x128xf32> -> vector<1x128xf32>
    %370 = arith.mulf %368, %369 : vector<1x128xf32>
    %371 = arith.index_cast %c1_i32 : i32 to index
    %c0_106 = arith.constant 0 : index
    %c0_107 = arith.constant 0 : index
    %372 = vector.load %arg16[%371, %c0_106, %c0_107] : memref<2x128x128xf32, #tpu.memory_space<vmem>>, vector<1x128x128xf32>
    %373 = vector.shape_cast %372 : vector<1x128x128xf32> to vector<128x128xf32>
    %cst_108 = arith.constant dense<0.000000e+00> : vector<1x128xf32>
    %374 = tpu.matmul %370, %373, %cst_108 {dimension_numbers = #tpu.dot_dimension_numbers<[1], [0], [0], [1], [0, 0, 1, 1], [], []>} : vector<1x128xf32>, vector<128x128xf32>, vector<1x128xf32> -> vector<1x128xf32>
    %375 = arith.index_cast %c1_i32 : i32 to index
    %c0_109 = arith.constant 0 : index
    %c0_110 = arith.constant 0 : index
    %376 = vector.load %arg17[%375, %c0_109, %c0_110] : memref<2x1x128xf32, #tpu.memory_space<vmem>>, vector<1x1x128xf32>
    %377 = vector.shape_cast %376 : vector<1x1x128xf32> to vector<1x128xf32>
    %378 = arith.addf %374, %377 : vector<1x128xf32>
    %cst_111 = arith.constant 0.000000e+00 : f32
    %379 = vector.broadcast %cst_111 : f32 to vector<1x128xf32>
    %380 = arith.cmpf oge, %378, %379 : vector<1x128xf32>
    %cst_112 = arith.constant 0.00999999977 : f32
    %381 = vector.broadcast %cst_112 : f32 to vector<1x128xf32>
    %382 = arith.mulf %381, %378 : vector<1x128xf32>
    %383 = arith.select %380, %378, %382 : vector<1x128xi1>, vector<1x128xf32>
    %cst_113 = arith.constant 0.000000e+00 : f32
    %384 = vector.broadcast %cst_113 : f32 to vector<8x128xf32>
    %385 = arith.cmpf ogt, %3, %384 : vector<8x128xf32>
    %cst_114 = arith.constant 0.000000e+00 : f32
    %386 = vector.broadcast %cst_114 : f32 to vector<8x128xf32>
    %387 = arith.select %385, %386, %306 : vector<8x128xi1>, vector<8x128xf32>
    %c2_i32 = arith.constant 2 : i32
    %c0_115 = arith.constant 0 : index
    %c0_116 = arith.constant 0 : index
    %c0_117 = arith.constant 0 : index
    %388 = vector.load %arg18[%c0_115, %c0_116, %c0_117] : memref<1x8x128xf32, #tpu.memory_space<vmem>>, vector<1x8x128xf32>
    %389 = vector.shape_cast %388 : vector<1x8x128xf32> to vector<8x128xf32>
    %390 = vector.shape_cast %387 : vector<8x128xf32> to vector<1x8x128xf32>
    tpu.vector_store %arg18[%c0_115, %c0_116, %c0_117], %390 {strides = array<i32>} : memref<1x8x128xf32, #tpu.memory_space<vmem>>, vector<1x8x128xf32>,
    %c0_118 = arith.constant 0 : index
    %c0_119 = arith.constant 0 : index
    %c0_120 = arith.constant 0 : index
    %391 = vector.load %arg19[%c0_118, %c0_119, %c0_120] : memref<1x1x128xf32, #tpu.memory_space<vmem>>, vector<1x1x128xf32>
    %392 = vector.shape_cast %391 : vector<1x1x128xf32> to vector<1x128xf32>
    %393 = vector.shape_cast %383 : vector<1x128xf32> to vector<1x1x128xf32>
    tpu.vector_store %arg19[%c0_118, %c0_119, %c0_120], %393 {strides = array<i32>} : memref<1x1x128xf32, #tpu.memory_space<vmem>>, vector<1x1x128xf32>,
    return
  }
  func.func @transform_0(%arg0: i32) -> (i32, i32, i32) {
    %c0_i32 = arith.constant 0 : i32
    %c0_i32_0 = arith.constant 0 : i32
    %c0_i32_1 = arith.constant 0 : i32
    return %arg0, %c0_i32, %c0_i32_0 : i32, i32, i32
  }
  func.func @transform_1(%arg0: i32) -> (i32, i32, i32) {
    %c0_i32 = arith.constant 0 : i32
    %c0_i32_0 = arith.constant 0 : i32
    %c0_i32_1 = arith.constant 0 : i32
    return %arg0, %c0_i32, %c0_i32_0 : i32, i32, i32
  }
  func.func @transform_2(%arg0: i32) -> (i32, i32) {
    %c0_i32 = arith.constant 0 : i32
    %c0_i32_0 = arith.constant 0 : i32
    %c0_i32_1 = arith.constant 0 : i32
    return %c0_i32, %c0_i32_0 : i32, i32
  }
  func.func @transform_3(%arg0: i32) -> (i32, i32) {
    %c0_i32 = arith.constant 0 : i32
    %c0_i32_0 = arith.constant 0 : i32
    %c0_i32_1 = arith.constant 0 : i32
    return %c0_i32, %c0_i32_0 : i32, i32
  }
  func.func @transform_4(%arg0: i32) -> (i32, i32) {
    %c0_i32 = arith.constant 0 : i32
    %c0_i32_0 = arith.constant 0 : i32
    %c0_i32_1 = arith.constant 0 : i32
    return %c0_i32, %c0_i32_0 : i32, i32
  }
  func.func @transform_5(%arg0: i32) -> (i32, i32) {
    %c0_i32 = arith.constant 0 : i32
    %c0_i32_0 = arith.constant 0 : i32
    %c0_i32_1 = arith.constant 0 : i32
    return %c0_i32, %c0_i32_0 : i32, i32
  }
  func.func @transform_6(%arg0: i32) -> (i32, i32) {
    %c0_i32 = arith.constant 0 : i32
    %c0_i32_0 = arith.constant 0 : i32
    %c0_i32_1 = arith.constant 0 : i32
    return %c0_i32, %c0_i32_0 : i32, i32
  }
  func.func @transform_7(%arg0: i32) -> (i32, i32, i32) {
    %c0_i32 = arith.constant 0 : i32
    %c0_i32_0 = arith.constant 0 : i32
    %c0_i32_1 = arith.constant 0 : i32
    %c0_i32_2 = arith.constant 0 : i32
    return %c0_i32, %c0_i32_0, %c0_i32_1 : i32, i32, i32
  }
  func.func @transform_8(%arg0: i32) -> (i32, i32, i32) {
    %c0_i32 = arith.constant 0 : i32
    %c0_i32_0 = arith.constant 0 : i32
    %c0_i32_1 = arith.constant 0 : i32
    %c0_i32_2 = arith.constant 0 : i32
    return %c0_i32, %c0_i32_0, %c0_i32_1 : i32, i32, i32
  }
  func.func @transform_9(%arg0: i32) -> (i32, i32, i32) {
    %c0_i32 = arith.constant 0 : i32
    %c0_i32_0 = arith.constant 0 : i32
    %c0_i32_1 = arith.constant 0 : i32
    %c0_i32_2 = arith.constant 0 : i32
    return %c0_i32, %c0_i32_0, %c0_i32_1 : i32, i32, i32
  }
  func.func @transform_10(%arg0: i32) -> (i32, i32, i32) {
    %c0_i32 = arith.constant 0 : i32
    %c0_i32_0 = arith.constant 0 : i32
    %c0_i32_1 = arith.constant 0 : i32
    %c0_i32_2 = arith.constant 0 : i32
    return %c0_i32, %c0_i32_0, %c0_i32_1 : i32, i32, i32
  }
  func.func @transform_11(%arg0: i32) -> (i32, i32, i32) {
    %c0_i32 = arith.constant 0 : i32
    %c0_i32_0 = arith.constant 0 : i32
    %c0_i32_1 = arith.constant 0 : i32
    %c0_i32_2 = arith.constant 0 : i32
    return %c0_i32, %c0_i32_0, %c0_i32_1 : i32, i32, i32
  }
  func.func @transform_12(%arg0: i32) -> (i32, i32, i32) {
    %c0_i32 = arith.constant 0 : i32
    %c0_i32_0 = arith.constant 0 : i32
    %c0_i32_1 = arith.constant 0 : i32
    %c0_i32_2 = arith.constant 0 : i32
    return %c0_i32, %c0_i32_0, %c0_i32_1 : i32, i32, i32
  }
  func.func @transform_13(%arg0: i32) -> (i32, i32, i32) {
    %c0_i32 = arith.constant 0 : i32
    %c0_i32_0 = arith.constant 0 : i32
    %c0_i32_1 = arith.constant 0 : i32
    %c0_i32_2 = arith.constant 0 : i32
    return %c0_i32, %c0_i32_0, %c0_i32_1 : i32, i32, i32
  }
  func.func @transform_14(%arg0: i32) -> (i32, i32, i32) {
    %c0_i32 = arith.constant 0 : i32
    %c0_i32_0 = arith.constant 0 : i32
    %c0_i32_1 = arith.constant 0 : i32
    %c0_i32_2 = arith.constant 0 : i32
    return %c0_i32, %c0_i32_0, %c0_i32_1 : i32, i32, i32
  }
  func.func @transform_15(%arg0: i32) -> (i32, i32, i32) {
    %c0_i32 = arith.constant 0 : i32
    %c0_i32_0 = arith.constant 0 : i32
    %c0_i32_1 = arith.constant 0 : i32
    %c0_i32_2 = arith.constant 0 : i32
    return %c0_i32, %c0_i32_0, %c0_i32_1 : i32, i32, i32
  }
  func.func @transform_16(%arg0: i32) -> (i32, i32, i32) {
    %c0_i32 = arith.constant 0 : i32
    %c0_i32_0 = arith.constant 0 : i32
    %c0_i32_1 = arith.constant 0 : i32
    %c0_i32_2 = arith.constant 0 : i32
    return %c0_i32, %c0_i32_0, %c0_i32_1 : i32, i32, i32
  }
  func.func @transform_17(%arg0: i32) -> (i32, i32, i32) {
    %c0_i32 = arith.constant 0 : i32
    %c0_i32_0 = arith.constant 0 : i32
    %c0_i32_1 = arith.constant 0 : i32
    return %arg0, %c0_i32, %c0_i32_0 : i32, i32, i32
  }
  func.func @transform_18(%arg0: i32) -> (i32, i32, i32) {
    %c0_i32 = arith.constant 0 : i32
    %c0_i32_0 = arith.constant 0 : i32
    %c0_i32_1 = arith.constant 0 : i32
    return %arg0, %c0_i32, %c0_i32_0 : i32, i32, i32
  }
}

</mosaic_0001>

<bundles_post_ra>
// kernel: star_transformer_forward.1
= control target key start
LH: loop header
LB: loop body
LE: loop exit
PB: predicated region body
PF: predicated region fallthrough
CT: control target
= control target key end

     0   :  { %s6724_s0 = inlined_call_operand.vmem [shape: f32[2,8,128], index: 0, kind: input, shape index: {}]   ;;  %s6725_s1 = inlined_call_operand.vmem [shape: f32[2,8,128], index: 1, kind: input, shape index: {}]   ;;  %s6726_s2 = inlined_call_operand.vmem [shape: f32[8,128], index: 2, kind: input, shape index: {}]   ;;  %s6727_s3 = inlined_call_operand.vmem [shape: f32[8,128], index: 3, kind: input, shape index: {}]   ;;  %s6728_s4 = inlined_call_operand.vmem [shape: f32[8,1], index: 4, kind: input, shape index: {}]   ;;  %s6729_s5 = inlined_call_operand.vmem [shape: f32[1,8], index: 5, kind: input, shape index: {}]   ;;  %s6730_s6 = inlined_call_operand.vmem [shape: f32[128,128], index: 6, kind: input, shape index: {}]   ;;  %s6731_s7 = inlined_call_operand.vmem [shape: f32[2,1,128], index: 7, kind: input, shape index: {}]   ;;  %s6732_s8 = inlined_call_operand.vmem [shape: f32[2,1,128], index: 8, kind: input, shape index: {}]   ;;  %s6733_s9 = inlined_call_operand.hbm [shape: f32[2,128,384], index: 9, kind: input, shape index: {}]   ;;  %s6734_s10 = inlined_call_operand.vmem [shape: f32[2,1,384], index: 10, kind: input, shape index: {}]   ;;  %s6735_s11 = inlined_call_operand.vmem [shape: f32[2,128,128], index: 11, kind: input, shape index: {}]   ;;  %s6736_s12 = inlined_call_operand.vmem [shape: f32[2,1,128], index: 12, kind: input, shape index: {}]   ;;  %s6737_s13 = inlined_call_operand.hbm [shape: f32[2,128,384], index: 13, kind: input, shape index: {}]   ;;  %s6738_s14 = inlined_call_operand.vmem [shape: f32[2,1,384], index: 14, kind: input, shape index: {}]   ;;  %s6739_s15 = inlined_call_operand.hbm [shape: f32[2,128,128], index: 15, kind: input, shape index: {}]   ;;  %s6740_s16 = inlined_call_operand.vmem [shape: f32[2,1,128], index: 16, kind: input, shape index: {}]   ;;  %s6741_s17 = inlined_call_operand.hbm [shape: f32[2,8,128], index: 17, kind: output, shape index: {0}]   ;;  %s6742_s18 = inlined_call_operand.hbm [shape: f32[2,1,128], index: 18, kind: output, shape index: {1}]  }
   0x1   :  { %6754 = sst [smem:[#allocation21_spill]] %s6724_s0 }
   0x2   :  { %6755 = sst [smem:[#allocation22_spill]] %s6725_s1 }
   0x3   :  { %6756 = sst [smem:[#allocation23_spill]] %s6741_s17 }
   0x4   :  { %6757 = sst [smem:[#allocation24_spill]] %s6742_s18 }
   0x5   :  { %24 = vsyncpa [#allocation3], 0 }
   0x6   :  { %25 = vsyncpa [#allocation6], 0 }
   0x7   :  { %26 = vsyncpa [#allocation4], 0 }
   0x8   :  { %28 = vsyncpa [#allocation4 + $0x1], 0 }
   0x9   :  { %29 = vsyncpa [#allocation10], 0 }
   0xa   :  { %31 = vsyncpa [#allocation10 + $0x1], 0  ;;  %s5726_s24 = smov 0   ;;  %s5728_s3 = smov 0  }
   0xb   :  { %s5730_s25 = smov 0   ;;  %s5732_s4 = smov 0  }
   0xc LB: > { %6758 = sst [smem:[#allocation15_spill]] %s5605_s24  ;;  %s5747_s26 = sadd.s32 4294967295, %s5617_s4   ;;  %s5617_s4 = sphi %s5732_s4, %s6784_s4   ;;  %s5613_s25 = sphi %s5730_s25, %s6786_s25   ;;  %s5609_s3 = sphi %s5728_s3, %s6788_s3   ;;  %s5605_s24 = sphi %s5726_s24, %s6787_s24  }
   0xd   : > { %6759 = sst [smem:[#allocation16_spill]] %s5613_s25  ;;  %s3428_s5 = sadd.s32 4294967294, %s5617_s4  }
   0xe   : > { %6760 = sst [smem:[#allocation17_spill]] %s5617_s4  ;;  %s5751_s27 = sadd.s32 1, %s5617_s4  }
   0xf   : > { %6761 = sst [smem:[#allocation18_spill]] %s5751_s27  ;;  %s411_s0 = sadd.s32 1, %s5613_s25 }
  0x10   : > { %s408_s28 = ssub.s32 %s5617_s4, %s5751_s27  ;;  %p421_p0 = scmp.ne.s32.totalorder %s5613_s25, %s5609_s3 }
  0x11   : > { %p409_p1 = scmp.eq.s32.totalorder %s408_s28, 0  ;;  %p422_p2 = scmp.eq.s32.totalorder %s5747_s26, 1 }
  0x12   : > { %p427_p3 = scmp.ne.s32.totalorder %s5609_s3, %s5605_s24  ;;  %p428_p4 = scmp.eq.s32.totalorder %s3428_s5, 1 }
  0x13   : > { %s5762_s1 = scalar_select %p409_p1, %s5613_s25, %s411_s0  }
  0x14   : > { %p5764_p5 = por %p422_p2, %p421_p0  ;;  %p5768_p6 = por %p428_p4, %p427_p3 }
  0x15   : > { %6762 = sst [smem:[#allocation19_spill]] %s5762_s1  ;;  %p3429_p7 = scmp.ge.s32.totalorder %s5617_s4, 1 }
  0x16   : > { %s6763_s29 = scalar_select %p5764_p5, 1, 0 }
  0x17   : > { %s6764_s30 = scalar_select %p5768_p6, 1, 0 }
  0x18   : > { %p461_p8 = scmp.lt.s32.totalorder %s5617_s4, 3  ;;  %p6747_p9 = scmp.eq.s32.totalorder %s5747_s26, 0 }
  0x19   : > { %6765 = sst [smem:[#allocation20_spill]] %s6764_s30  ;;  %s5619_s20 = smov [#allocation5]  }
  0x1a   : > { %p5775_p10 = pnand %p3429_p7, %p461_p8  ;;  %s516_s21 = sshll.u32 %s5619_s20, 4  ;;  %s5781_s21 = int_to_ptr.vmem [resolvable:$true] %s516_s21 }
  0x1b   : > { %s5620_s2 = smov [#allocation2]   ;;  %s5621_s5 = smov [#allocation7]  }
  0x1c   : > { %s6766_s19 = scalar_select %p5775_p10, 1, 0 }
  0x1d   : > { %p5320_p11 = pneg %p5775_p10  ;;  %s494_s23 = sshll.u32 %s5620_s2, 4  ;;  %s5789_s23 = int_to_ptr.vmem [resolvable:$true] %s494_s23 }
  0x1e   : > { %s5791_s0 = sshll.u32 %s5621_s5, 4  ;;  %s5431_s25 = scalar_lea.hbm %s6737_s13, 12288  ;;  %s533_s0 = int_to_ptr.vmem [resolvable:$true] %s5791_s0 }
  0x1f   : > { %p5785_p12 = pnand %p6747_p9, %p5320_p11  ;;  %p5432_p13 = scmp.ne.s32.totalorder %s6737_s13, %s5431_s25 }
  0x20   : > { %p5438_p3 = scmp.lt.u32.totalorder %s5431_s25, %s6737_s13 }
  0x21   : > { %p5801_p0 = pneg %p5785_p12 }
  0x23   : > { %p5434_p1 = pnand %p5801_p0, %p5432_p13 }
  0x25   : > { %p5435_p2 = pneg %p5434_p1 }
  0x27   : > { %p5440_p4 = pnand %p5438_p3, %p5435_p2 }
  0x29   : > { %5443 = shalt.err (!%p5440_p4)
}
  0x2a   : > { %s5444_s27 = scalar_lea.vmem %s5781_s21, 12288  ;;  %p5452_p9 = scmp.lt.s32.totalorder %s5781_s21, %s5781_s21 }
  0x2b   : > { %p5445_p7 = scmp.ne.s32.totalorder %s5781_s21, %s5444_s27  ;;  %p5453_p6 = scmp.lt.s32.totalorder %s5444_s27, %s5444_s27 }
  0x2d   : > { %p5447_p8 = pnand %p5445_p7, %p5801_p0  ;;  %p5454_p13 = por %p5453_p6, %p5452_p9 }
  0x2f   : > { %p5448_p11 = pneg %p5447_p8 }
  0x31   : > { %p5455_p1 = pnand %p5454_p13, %p5448_p11 }
  0x33   : > { %5458 = shalt.err (!%p5455_p1)
}
  0x34   : > { %s5622_s1 = smov 384   ;;  %s5623_s25 = smov 24  }
  0x35   : > { %5326 = dma.hbm_to_vmem [thread:$0]  (!%p5785_p12), %s6737_s13, 12288, %s5781_s21, [#allocation6], %s5622_s1, %s5622_s1, %s5623_s25  }
  0x36   : > { %s5459_s24 = scalar_lea.hbm %s6733_s9, 12288 }
  0x37   : > { %p5460_p6 = scmp.ne.s32.totalorder %s6733_s9, %s5459_s24  ;;  %p5466_p3 = scmp.lt.u32.totalorder %s5459_s24, %s6733_s9 }
  0x39   : > { %p5462_p9 = pnand %p5460_p6, %p5801_p0 }
  0x3b   : > { %p5463_p2 = pneg %p5462_p9 }
  0x3d   : > { %p5468_p4 = pnand %p5466_p3, %p5463_p2 }
  0x3f   : > { %5471 = shalt.err (!%p5468_p4)
}
  0x40   : > { %s5472_s21 = scalar_lea.vmem %s5789_s23, 12288  ;;  %p5480_p13 = scmp.lt.s32.totalorder %s5789_s23, %s5789_s23 }
  0x41   : > { %p5473_p7 = scmp.ne.s32.totalorder %s5789_s23, %s5472_s21  ;;  %p5481_p1 = scmp.lt.s32.totalorder %s5472_s21, %s5472_s21 }
  0x43   : > { %p5475_p8 = pnand %p5473_p7, %p5801_p0  ;;  %p5482_p6 = por %p5481_p1, %p5480_p13 }
  0x45   : > { %p5476_p11 = pneg %p5475_p8 }
  0x47   : > { %p5483_p9 = pnand %p5482_p6, %p5476_p11 }
  0x49   : > { %5486 = shalt.err (!%p5483_p9)
}
  0x4a   : > { %5323 = dma.hbm_to_vmem [thread:$0]  (!%p5785_p12), %s6733_s9, 12288, %s5789_s23, [#allocation3], %s5622_s1, %s5622_s1, %s5623_s25  }
  0x4b   : > { %s5487_s28 = scalar_lea.hbm %s6739_s15, 4096 }
  0x4c   : > { %p5488_p2 = scmp.ne.s32.totalorder %s6739_s15, %s5487_s28  ;;  %p5494_p7 = scmp.lt.u32.totalorder %s5487_s28, %s6739_s15 }
  0x4e   : > { %p5490_p3 = pnand %p5488_p2, %p5801_p0 }
  0x50   : > { %p5491_p4 = pneg %p5490_p3 }
  0x52   : > { %p5496_p8 = pnand %p5494_p7, %p5491_p4 }
  0x54   : > { %5499 = shalt.err (!%p5496_p8)
}
  0x55   : > { %s5500_s21 = scalar_lea.vmem %s533_s0, 4096  ;;  %p5508_p6 = scmp.lt.s32.totalorder %s533_s0, %s533_s0 }
  0x56   : > { %p5501_p11 = scmp.ne.s32.totalorder %s533_s0, %s5500_s21  ;;  %p5509_p9 = scmp.lt.s32.totalorder %s5500_s21, %s5500_s21 }
  0x58   : > { %p5503_p13 = pnand %p5501_p11, %p5801_p0  ;;  %p5510_p5 = por %p5509_p9, %p5508_p6 }
  0x5a   : > { %p5504_p1 = pneg %p5503_p13 }
  0x5c   : > { %p5511_p10 = pnand %p5510_p5, %p5504_p1 }
  0x5e   : > { %5514 = shalt.err (!%p5511_p10)
}
  0x5f   : > { %s5624_s23 = smov 128   ;;  %s5625_s1 = smov 8  }
  0x60   : > { %5329 = dma.hbm_to_vmem [thread:$0]  (!%p5785_p12), %s6739_s15, 4096, %s533_s0, [#allocation6], %s5624_s23, %s5624_s23, %s5625_s1  }
  0x61   : > { %p6769_p2 = scmp.ne.s32.totalorder %s6766_s19, 0 }
  0x62   : > { %p6770_p3 = scmp.eq.s32.totalorder (!%p6769_p2), %s5747_s26, 0 }
  0x63   : > { %565 = sbr.rel (%p6769_p2) target bundleno = 3171 (0xc63), region = 88 }
  0x6a   : > { %5588 = dma.done.wait (%p6770_p3), [#allocation3], 12288   ;;  %p6771_p0 = pmov %p6770_p3 }
  0x6c   : > { %5590 = vsyncadd (%p6771_p0), [#allocation3], 4294955008  ;;  %p6772_p5 = pmov %p6771_p0 }
  0x6d   : > { %p6773_p10 = pmov %p6771_p0 }
  0x6e   : > { %5592 = dma.done.wait (%p6772_p5), [#allocation6], 16384  }
  0x6f   : > { %5594 = vsyncadd (%p6773_p10), [#allocation6], 4294950912  ;;  %p634_p4 = scmp.lt.s32.totalorder %s5747_s26, 1  ;;  %v5626_v0 = vmov 0.0|0.0   ;;  %s6774_s18 = sld [smem:[#allocation21_spill]]  ;;  %v697_v2 = vld [vmem:[#allocation2 + $0x8] sm:$0xff] }
  0x70   : > { %4664 = vmatprep.subr.bf16.mxu1 %v5626_v0  ;;  %v700_v3 = vld [vmem:[#allocation2 + $0x20] sm:$0xff]  ;;  %v699_v7 = vld [vmem:[#allocation2 + $0x18] sm:$0xff]  ;;  %v698_v8 = vld [vmem:[#allocation2 + $0x10] sm:$0xff]  ;;  %v5627_v54 = vmov 0.0   ;;  %vm5628_vm0 = vmmov 0   ;;  %vm925_vm1 = vcmask 1040384  }
  0x71   : > { %s5877_s30 = scalar_select %p634_p4, %s5747_s26, 1  ;;  %v4632_v5 = vpack.c.bf16 %v700_v3, %v697_v2  ;;  %v696_v6 = vld [vmem:[#allocation2] sm:$0xff]  ;;  %v701_v10 = vld [vmem:[#allocation2 + $0x28] sm:$0xff]  ;;  %v703_v11 = vld [vmem:[#allocation2 + $0x38] sm:$0xff]  ;;  %825 = vmatprep.mubr.f32.mxu0 %v5627_v54  ;;  %3882 = vmatprep.mubr.msk.f32.mxu1 %vm5628_vm0, %v5627_v54  ;;  %vm929_vm2 = vcmask 1046528   ;;  %vm1450_vm5 = vcmask 1041408  }
  0x72   : > { %v4634_v9 = vpack.c.bf16 %v699_v7, %v696_v6  ;;  %v706_v12 = vld [vmem:[#allocation2 + $0x50] sm:$0xff]  ;;  %v4665_v13 = vpack.c.bf16 %v701_v10, %v698_v8  ;;  %v705_v16 = vld [vmem:[#allocation2 + $0x48] sm:$0xff]  ;;  %v704_v17 = vld [vmem:[#allocation2 + $0x40] sm:$0xff]  ;;  %s6775_s20 = sld [smem:[#allocation22_spill]]  ;;  %vm1750_vm6 = vcmask 1045504   ;;  %s3466_s5 = sshll.u32 %s5747_s26, 7 }
  0x73   : > { %s3439_s19 = sshll.u32 %s5877_s30, 3  ;;  %4633 = vmatprep.subr.bf16.mxu0 %v4632_v5  ;;  %v4636_v14 = vpack.c.bf16 %v706_v12, %v703_v11  ;;  %v702_v15 = vld [vmem:[#allocation2 + $0x30] sm:$0xff]  ;;  %v707_v19 = vld [vmem:[#allocation2 + $0x58] sm:$0xff]  ;;  %v709_v21 = vld [vmem:[#allocation2 + $0x68] sm:$0xff]  ;;  %p6777_p7 = scmp.ne.s32.totalorder %s6763_s29, 0 }
  0x74   : > { %4635 = vmatpush1.bf16.msra.mxu0 %v4634_v9  ;;  %4666 = vmatpush3.bf16.msra.mxu1 %v4665_v13  ;;  %v4638_v18 = vpack.c.bf16 %v705_v16, %v702_v15  ;;  %v4668_v20 = vpack.c.bf16 %v707_v19, %v704_v17  ;;  %v712_v22 = vld [vmem:[#allocation2 + $0x80] sm:$0xff]  ;;  %v711_v25 = vld [vmem:[#allocation2 + $0x78] sm:$0xff]  ;;  %v710_v26 = vld [vmem:[#allocation2 + $0x70] sm:$0xff] }
  0x75   : > { %s5885_s24 = scalar_lea.vmem %s6774_s18, %s3439_s19  ;;  %4637 = vmatprep.subr.bf16.mxu0 %v4636_v14  ;;  %4667 = vmatprep.subr.bf16.mxu1 %v5626_v0  ;;  %v4640_v23 = vpack.c.bf16 %v712_v22, %v709_v21  ;;  %v708_v24 = vld [vmem:[#allocation2 + $0x60] sm:$0xff]  ;;  %v713_v28 = vld [vmem:[#allocation2 + $0x88] sm:$0xff]  ;;  %v715_v30 = vld [vmem:[#allocation2 + $0x98] sm:$0xff]  ;;  %s6571_s18 = sand.u32 1, %s5609_s3  }
  0x76   : > { %v5888_v1 = vld [vmem:[%s5885_s24] sm:$0xff]  ;;  %v4642_v27 = vpack.c.bf16 %v711_v25, %v708_v24  ;;  %v4671_v29 = vpack.c.bf16 %v713_v28, %v710_v26  ;;  %v718_v31 = vld [vmem:[#allocation2 + $0xb0] sm:$0xff]  ;;  %v717_v34 = vld [vmem:[#allocation2 + $0xa8] sm:$0xff]  ;;  %s3438_s4 = sshll.u32 %s6571_s18, 3  ;;  %s3268_s1 = scalar_lea.sflag [#allocation4], %s6571_s18 }
  0x77   : > { %669 = vadd.xlane.f32.xlu0 %v5888_v1  ;;  %v672_v4 = vmul.f32 %v5888_v1, %v5888_v1  ;;  %v4644_v32 = vpack.c.bf16 %v718_v31, %v715_v30  ;;  %v714_v33 = vld [vmem:[#allocation2 + $0x90] sm:$0xff]  ;;  %v716_v35 = vld [vmem:[#allocation2 + $0xa0] sm:$0xff]  ;;  %v719_v37 = vld [vmem:[#allocation2 + $0xb8] sm:$0xff]  ;;  %v660_v14 = vrot.slane %v5888_v1, 4  ;;  %s6580_s28 = scalar_lea.vmem [#allocation8], %s3438_s4 }
  0x78   : > { %4639 = vmatpush1.bf16.msra.mxu0 %v4638_v18  ;;  %4669 = vmatpush3.bf16.msra.mxu1 %v4668_v20  ;;  %v4646_v36 = vpack.c.bf16 %v717_v34, %v714_v33  ;;  %v4674_v38 = vpack.c.bf16 %v719_v37, %v716_v35  ;;  %v721_v39 = vld [vmem:[#allocation2 + $0xc8] sm:$0xff]  ;;  %v724_v40 = vld [vmem:[#allocation2 + $0xe0] sm:$0xff]  ;;  %v723_v43 = vld [vmem:[#allocation2 + $0xd8] sm:$0xff]  ;;  %s641_s2 = scalar_lea.vmem %s6775_s20, %s3439_s19  ;;  %s6776_s19 = sld [smem:[#allocation23_spill]] }
  0x79   : > { %4670 = vmatprep.subr.bf16.mxu1 %v5626_v0  ;;  %4641 = vmatprep.subr.bf16.mxu0 %v4640_v23  ;;  %v4648_v41 = vpack.c.bf16 %v724_v40, %v721_v39  ;;  %v720_v42 = vld [vmem:[#allocation2 + $0xc0] sm:$0xff]  ;;  %v722_v44 = vld [vmem:[#allocation2 + $0xd0] sm:$0xff]  ;;  %v725_v46 = vld [vmem:[#allocation2 + $0xe8] sm:$0xff]  ;;  %v661_v15 = vadd.f32 %v660_v14, %v5888_v1  ;;  %s3285_s23 = sshll.u32 %s6580_s28, 4  ;;  %s3286_s23 = int_to_ptr.vmem [resolvable:$true] %s3285_s23 }
  0x7a   : > { %v4650_v45 = vpack.c.bf16 %v723_v43, %v720_v42  ;;  %v727_v47 = vld [vmem:[#allocation2 + $0xf8] sm:$0xff]  ;;  %v730_v48 = vld [vmem:[#allocation2 + $0x110] sm:$0xff]  ;;  %v4677_v49 = vpack.c.bf16 %v725_v46, %v722_v44  ;;  %v729_v52 = vld [vmem:[#allocation2 + $0x108] sm:$0xff]  ;;  %s5515_s25 = scalar_lea.vmem %s3286_s23, 128 }
  0x7b   : > { %673 = vadd.xlane.f32.xlu0 %v672_v4  ;;  %v4652_v50 = vpack.c.bf16 %v730_v48, %v727_v47  ;;  %v726_v51 = vld [vmem:[#allocation2 + $0xf0] sm:$0xff]  ;;  %v728_v53 = vld [vmem:[#allocation2 + $0x100] sm:$0xff]  ;;  %v731_v56 = vld [vmem:[#allocation2 + $0x118] sm:$0xff]  ;;  %v662_v16 = vrot.slane %v661_v15, 2  ;;  %p5516_p12 = scmp.ne.s32.totalorder %s3286_s23, %s5515_s25 }
  0x7c   : > { %4643 = vmatpush1.bf16.msra.mxu0 %v4642_v27  ;;  %4672 = vmatpush3.bf16.msra.mxu1 %v4671_v29  ;;  %v4654_v55 = vpack.c.bf16 %v729_v52, %v726_v51  ;;  %v733_v57 = vld [vmem:[#allocation2 + $0x128] sm:$0xff]  ;;  %v736_v58 = vld [vmem:[#allocation2 + $0x140] sm:$0xff]  ;;  %v4680_v59 = vpack.c.bf16 %v731_v56, %v728_v53  ;;  %v735_v62 = vld [vmem:[#allocation2 + $0x138] sm:$0xff]  ;;  %v683_v27 = vlaneseq }
  0x7d   : > { %4673 = vmatprep.subr.bf16.mxu1 %v5626_v0  ;;  %4645 = vmatprep.subr.bf16.mxu0 %v4644_v32  ;;  %v4656_v60 = vpack.c.bf16 %v736_v58, %v733_v57  ;;  %v732_v61 = vld [vmem:[#allocation2 + $0x120] sm:$0xff]  ;;  %v734_v63 = vld [vmem:[#allocation2 + $0x130] sm:$0xff]  ;;  %v737_v2 = vld [vmem:[#allocation2 + $0x148] sm:$0xff]  ;;  %v663_v17 = vadd.f32 %v662_v16, %v661_v15  ;;  %p5517_p8 = pnand %p5516_p12, %p6777_p7 }
  0x7e   : > { %v739_v3 = vld [vmem:[#allocation2 + $0x158] sm:$0xff]  ;;  %v742_v4 = vld [vmem:[#allocation2 + $0x170] sm:$0xff]  ;;  %v4658_v5 = vpack.c.bf16 %v735_v62, %v732_v61  ;;  %v4683_v6 = vpack.c.bf16 %v737_v2, %v734_v63  ;;  %v741_v9 = vld [vmem:[#allocation2 + $0x168] sm:$0xff]  ;;  %v5910_v29 = vshrl.u32 %v683_v27, 7  ;;  %s6652_s21 = scalar_lea.hbm %s6776_s19, %s3466_s5 }
  0x7f   : > { %v4660_v7 = vpack.c.bf16 %v742_v4, %v739_v3  ;;  %v738_v8 = vld [vmem:[#allocation2 + $0x150] sm:$0xff]  ;;  %v740_v10 = vld [vmem:[#allocation2 + $0x160] sm:$0xff]  ;;  %v743_v11 = vld [vmem:[#allocation2 + $0x178] sm:$0xff]  ;;  %v664_v18 = vrot.slane %v663_v17, 1  ;;  %p5518_p11 = pneg %p5517_p8 }
  0x80   : > { %4647 = vmatpush1.bf16.msra.mxu0 %v4646_v36  ;;  %4675 = vmatpush3.bf16.msra.mxu1 %v4674_v38  ;;  %v4662_v12 = vpack.c.bf16 %v741_v9, %v738_v8  ;;  %v4686_v13 = vpack.c.bf16 %v743_v11, %v740_v10  ;;  %v5913_v30 = vsub.s32 0, %v5910_v29  ;;  %v5918_v31 = vld [vmem:[%s6731_s7] sm:$0x1]  ;;  %v645_v39 = vld [vmem:[%s6730_s6 + $0x8] sm:$0xff]  ;;  %v646_v43 = vld [vmem:[%s6730_s6 + $0x10] sm:$0xff]  ;;  %v6046_v3 = vsub.s32 1, %v5910_v29 }
  0x81   : > { %4676 = vmatprep.subr.bf16.mxu1 %v5626_v0  ;;  %4649 = vmatprep.subr.bf16.mxu0 %v4648_v41  ;;  %v665_v19 = vadd.f32 %v664_v18, %v663_v17  ;;  %v5923_v32 = vld [vmem:[%s6732_s8] sm:$0x1]  ;;  %v647_v44 = vld [vmem:[%s6730_s6 + $0x18] sm:$0xff]  ;;  %v649_v47 = vld [vmem:[%s6730_s6 + $0x28] sm:$0xff] }
  0x82   : > { %v686_v34 = vrot.slane %v5918_v31, %v5913_v30  ;;  %v693_v37 = vrot.slane %v5923_v32, %v5913_v30  ;;  %v644_v38 = vld [vmem:[%s6730_s6] sm:$0xff]  ;;  %v653_v52 = vld [vmem:[%s6730_s6 + $0x48] sm:$0xff]  ;;  %v655_v56 = vld [vmem:[%s6730_s6 + $0x58] sm:$0xff] }
  0x83   : > { %v5907_v20 = vmul.f32 0.125, %v665_v19  ;;  %v5936_v41 = vpack.c.bf16 %v645_v39, %v644_v38  ;;  %v648_v46 = vld [vmem:[%s6730_s6 + $0x20] sm:$0xff]  ;;  %v658_v61 = vld [vmem:[%s6730_s6 + $0x70] sm:$0xff]  ;;  %v659_v62 = vld [vmem:[%s6730_s6 + $0x78] sm:$0xff] }
  0x84   : > { %4651 = vmatpush1.bf16.msra.mxu0 %v4650_v45  ;;  %4678 = vmatpush3.bf16.msra.mxu1 %v4677_v49  ;;  %v5946_v45 = vpack.c.bf16 %v647_v44, %v646_v43  ;;  %v5963_v48 = vpack.c.bf16 %v649_v47, %v648_v46  ;;  %v650_v49 = vld [vmem:[%s6730_s6 + $0x30] sm:$0xff]  ;;  %v652_v51 = vld [vmem:[%s6730_s6 + $0x40] sm:$0xff]  ;;  %v6034_v63 = vpack.c.bf16 %v659_v62, %v658_v61  ;;  %v1336_v38 = vld [vmem:[%s6735_s11 + $0x8] sm:$0xff] }
  0x85   : > { %4653 = vmatprep.subr.bf16.mxu0 %v4652_v50  ;;  %4679 = vmatprep.subr.bf16.mxu1 %v5626_v0  ;;  %v651_v50 = vld [vmem:[%s6730_s6 + $0x38] sm:$0xff]  ;;  %v5995_v53 = vpack.c.bf16 %v653_v52, %v652_v51  ;;  %v656_v58 = vld [vmem:[%s6730_s6 + $0x60] sm:$0xff]  ;;  %v1340_v46 = vld [vmem:[%s6735_s11 + $0x28] sm:$0xff] }
  0x86   : > { %1431 = vadd.xlane.f32.xlu1 %v5907_v20  ;;  %v6043_v2 = vld [vmem:[%s6734_s10] sm:$0x7] }
  0x87   : > { %v749_v4 = vrot.slane %v6043_v2, %v5913_v30  ;;  %v1339_v44 = vld [vmem:[%s6735_s11 + $0x20] sm:$0xff] }
  0x88   : > { %4655 = vmatpush1.bf16.msra.mxu0 %v4654_v55  ;;  %4681 = vmatpush3.bf16.msra.mxu1 %v4680_v59  ;;  %v654_v55 = vld [vmem:[%s6730_s6 + $0x50] sm:$0xff]  ;;  %v657_v59 = vld [vmem:[%s6730_s6 + $0x68] sm:$0xff]  ;;  %v4815_v47 = vpack.c.bf16 %v1340_v46, %v1339_v44  ;;  %v1343_v52 = vld [vmem:[%s6735_s11 + $0x40] sm:$0xff] }
  0x89   : > { %4657 = vmatprep.subr.bf16.mxu0 %v4656_v60  ;;  %4682 = vmatprep.subr.bf16.mxu1 %v5626_v0  ;;  %v6007_v57 = vpack.c.bf16 %v655_v56, %v654_v55  ;;  %v6019_v60 = vpack.c.bf16 %v657_v59, %v656_v58  ;;  %v1344_v55 = vld [vmem:[%s6735_s11 + $0x48] sm:$0xff]  ;;  %v1345_v58 = vld [vmem:[%s6735_s11 + $0x50] sm:$0xff]  ;;  %v1346_v59 = vld [vmem:[%s6735_s11 + $0x58] sm:$0xff] }
  0x8a   : > { %v4821_v56 = vpack.c.bf16 %v1344_v55, %v1343_v52  ;;  %v4824_v61 = vpack.c.bf16 %v1346_v59, %v1345_v58  ;;  %v1347_v62 = vld [vmem:[%s6735_s11 + $0x60] sm:$0xff]  ;;  %v1471_v44 = vld [vmem:[#allocation5 + $0x98] sm:$0xff]  ;;  %v1474_v46 = vld [vmem:[#allocation5 + $0xb0] sm:$0xff] }
  0x8b   : > { %v1477_v52 = vld [vmem:[#allocation5 + $0xc8] sm:$0xff]  ;;  %v1480_v55 = vld [vmem:[#allocation5 + $0xe0] sm:$0xff] }
  0x8c   : > { %4659 = vmatpush1.bf16.msra.mxu0 %v4658_v5  ;;  %4684 = vmatpush3.bf16.msra.mxu1 %v4683_v6  ;;  %v753_v5 = vrot.slane %v6043_v2, %v6046_v3  ;;  %v4848_v58 = vpack.c.bf16 %v1480_v55, %v1477_v52  ;;  %v1476_v59 = vld [vmem:[#allocation5 + $0xc0] sm:$0xff] }
  0x8d   : > { %4661 = vmatprep.subr.bf16.mxu0 %v4660_v7  ;;  %4685 = vmatprep.subr.bf16.mxu1 %v5626_v0 }
  0x90   : > { %4663 = vmatpush1.bf16.msra.mxu0 %v4662_v12  ;;  %4687 = vmatpush3.bf16.msra.mxu1 %v4686_v13 }
  0x91   : > { %4688 = vmatprep.subr.bf16.mxu0 %v5626_v0  ;;  %4712 = vmatprep.subr.bf16.mxu1 %v5626_v0 }
 0x104   : > { %v670_v21 = vpop.xlane.xlu0 %669 }
 0x105   : > { %v671_v22 = vmul.f32 0.03125, %v670_v21 }
 0x107   : > { %v677_v24 = vmul.f32 %v671_v22, %v671_v22  ;;  %v676_v33 = vsub.f32 %v5888_v1, %v671_v22 }
 0x108   : > { %v674_v23 = vpop.xlane.xlu0 %673 }
 0x109   : > { %v675_v25 = vmul.f32 0.03125, %v674_v23 }
 0x10b   : > { %v678_v26 = vsub.f32 %v675_v25, %v677_v24 }
 0x10d   : > { %v679_v28 = vadd.f32 1e-06, %v678_v26 }
 0x10f   : > { %5386 = vrsqrt.f32 %v679_v28 }
 0x119   : > { %v5387_v35 = vpop.eup %5386 }
 0x11a   : > { %v681_v36 = vmul.f32 %v5387_v35, %v676_v33 }
 0x11c   : > { %v688_v40 = vmul.f32 %v686_v34, %v681_v36 }
 0x11e   : > { %v695_v42 = vadd.f32 %v693_v37, %v688_v40  ;;  %v1335_v37 = vld [vmem:[%s6735_s11] sm:$0xff]  ;;  %v1337_v40 = vld [vmem:[%s6735_s11 + $0x10] sm:$0xff] }
 0x11f   : > { %v4809_v39 = vpack.c.bf16 %v1336_v38, %v1335_v37  ;;  %v1465_v38 = vld [vmem:[#allocation5 + $0x68] sm:$0xff] }
 0x120   : > { %826 = vmatmul.mubr.f32.vlgmr.msra.gmra.mrb[0].mxu0 %v695_v42  ;;  %3883 = vmatmul.mubr.f32.vlgmr.msra.gmra.mrb[0].mxu1 %v695_v42  ;;  %v1338_v42 = vld [vmem:[%s6735_s11 + $0x18] sm:$0xff] }
 0x121   : > { %831 = vmatprep.mubr.f32.mxu0 %v5627_v54  ;;  %4714 = vmatpush3.bf16.msra.mxu1 %v5936_v41  ;;  %v4812_v43 = vpack.c.bf16 %v1338_v42, %v1337_v40  ;;  %v1464_v42 = vld [vmem:[#allocation5 + $0x60] sm:$0xff] }
 0x122   : > { %4690 = vmatpush3.bf16.msra.mxu0 %v5936_v41  ;;  %4715 = vmatprep.subr.bf16.mxu1 %v5626_v0 }
 0x123   : > { %4691 = vmatprep.subr.bf16.mxu0 %v5626_v0  ;;  %3885 = vmatprep.mubr.msk.f32.mxu1 %vm5628_vm0, %v5627_v54 }
 0x124   : > { %832 = vmatmul.mubr.f32.gmra.mrb[2].mxu0 %v5888_v1  ;;  %3886 = vmatmul.mubr.f32.gmra.mrb[2].mxu1 %v5888_v1  ;;  %v5979_v1 = vpack.c.bf16 %v651_v50, %v650_v49  ;;  %v1341_v49 = vld [vmem:[%s6735_s11 + $0x30] sm:$0xff]  ;;  %v1342_v50 = vld [vmem:[%s6735_s11 + $0x38] sm:$0xff] }
 0x125   : > { %836 = vmatprep.mubr.f32.mxu0 %v5627_v54  ;;  %4717 = vmatpush3.bf16.msra.mxu1 %v5946_v45  ;;  %v4818_v51 = vpack.c.bf16 %v1342_v50, %v1341_v49  ;;  %v4844_v49 = vpack.c.bf16 %v1474_v46, %v1471_v44  ;;  %v1470_v50 = vld [vmem:[#allocation5 + $0x90] sm:$0xff] }
 0x126   : > { %4693 = vmatpush3.bf16.msra.mxu0 %v5946_v45  ;;  %4718 = vmatprep.subr.bf16.mxu1 %v5626_v0 }
 0x127   : > { %4694 = vmatprep.subr.bf16.mxu0 %v5626_v0  ;;  %3888 = vmatprep.mubr.msk.f32.mxu1 %vm5628_vm0, %v5627_v54 }
 0x128   : > { %837 = vmatmul.mubr.f32.gmra.mrb[4].mxu0 %v5907_v20  ;;  %3889 = vmatmul.mubr.f32.gmra.mrb[4].mxu1 %v5907_v20 }
 0x129   : > { %4720 = vmatpush3.bf16.msra.mxu1 %v5963_v48  ;;  %3958 = vmatprep.mubr.msk.f32.mxu1 %vm5628_vm0, %v5627_v54 }
 0x12a   : > { %4696 = vmatpush3.bf16.msra.mxu0 %v5963_v48  ;;  %4721 = vmatprep.subr.bf16.mxu1 %v5626_v0 }
 0x12b   : > { %4697 = vmatprep.subr.bf16.mxu0 %v5626_v0  ;;  %3923 = vmatprep.mubr.msk.f32.mxu0 %vm5628_vm0, %v5627_v54 }
 0x12d   : > { %4723 = vmatpush3.bf16.msra.mxu1 %v5979_v1 }
 0x12e   : > { %4699 = vmatpush3.bf16.msra.mxu0 %v5979_v1  ;;  %4724 = vmatprep.subr.bf16.mxu1 %v5626_v0 }
 0x12f   : > { %4700 = vmatprep.subr.bf16.mxu0 %v5626_v0 }
 0x131   : > { %4726 = vmatpush3.bf16.msra.mxu1 %v5995_v53 }
 0x132   : > { %4702 = vmatpush3.bf16.msra.mxu0 %v5995_v53  ;;  %4727 = vmatprep.subr.bf16.mxu1 %v5626_v0 }
 0x133   : > { %4703 = vmatprep.subr.bf16.mxu0 %v5626_v0 }
 0x135   : > { %4729 = vmatpush3.bf16.msra.mxu1 %v6007_v57 }
 0x136   : > { %4705 = vmatpush3.bf16.msra.mxu0 %v6007_v57  ;;  %4730 = vmatprep.subr.bf16.mxu1 %v5626_v0 }
 0x137   : > { %4706 = vmatprep.subr.bf16.mxu0 %v5626_v0 }
 0x139   : > { %4732 = vmatpush3.bf16.msra.mxu1 %v6019_v60 }
 0x13a   : > { %4708 = vmatpush3.bf16.msra.mxu0 %v6019_v60  ;;  %4733 = vmatprep.subr.bf16.mxu1 %v5626_v0 }
 0x13b   : > { %4709 = vmatprep.subr.bf16.mxu0 %v5626_v0 }
 0x13d   : > { %4735 = vmatpush3.bf16.msra.mxu1 %v6034_v63 }
 0x13e   : > { %4711 = vmatpush3.bf16.msra.mxu0 %v6034_v63  ;;  %4760 = vmatprep.subr.bf16.mxu1 %v5626_v0 }
 0x13f   : > { %4736 = vmatprep.subr.bf16.mxu0 %v5626_v0 }
 0x1f3   : > { %v827_v6 = vpop.f32.mrb[0].mxu0  ;;  %v6052_v7 = vpop.f32.mrb[0].mxu1 }
 0x1f4   : > { %v828_v8 = vadd.f32 %v827_v6, %v749_v4  ;;  %v829_v9 = vpop.f32.mrb[1].mxu0  ;;  %v3884_v10 = vpop.f32.mrb[1].mxu1  ;;  %v1348_v4 = vld [vmem:[%s6735_s11 + $0x68] sm:$0xff]  ;;  %v1349_v6 = vld [vmem:[%s6735_s11 + $0x70] sm:$0xff] }
 0x1f5   : > { %v830_v11 = vadd.f32 %v829_v9, %v753_v5  ;;  %v1434_v10 = vmul.f32 %v5907_v20, %v5907_v20 }
 0x1f7   : > { %v923_v12 = vrot.slane %v830_v11, 7  ;;  %v927_v13 = vrot.slane %v830_v11, 1  ;;  %v1009_v14 = vmul.f32 %v830_v11, %v828_v8  ;;  %v833_v15 = vpop.f32.mrb[2].mxu0  ;;  %v6054_v16 = vpop.f32.mrb[2].mxu1  ;;  %1435 = vadd.xlane.f32.xlu1 %v1434_v10 }
 0x1f8   : > { %v834_v17 = vpop.f32.mrb[3].mxu0  ;;  %v3887_v18 = vpop.f32.mrb[3].mxu1  ;;  %v1452_v15 = vld [vmem:[#allocation5] sm:$0xff] }
 0x1f9   : > { %v926_v19 = vsel %vm925_vm1, 0.0, %v923_v12  ;;  %v930_v21 = vsel %vm929_vm2, %v927_v13, 0.0  ;;  %v835_v22 = vadd.f32 %v834_v17, %v753_v5  ;;  %3959 = vmatmul.mubr.f32.vlgmr.msra.gmra.mrb[6].mxu1 %v1009_v14  ;;  %v1453_v13 = vld [vmem:[#allocation5 + $0x8] sm:$0xff]  ;;  %v1456_v14 = vld [vmem:[#allocation5 + $0x20] sm:$0xff]  ;;  %v1455_v18 = vld [vmem:[#allocation5 + $0x18] sm:$0xff] }
 0x1fa   : > { %v938_v23 = vmul.f32 %v926_v19, %v828_v8  ;;  %4762 = vmatpush3.bf16.msra.mxu1 %v5936_v41  ;;  %4028 = vmatprep.mubr.msk.f32.mxu1 %vm5628_vm0, %v5627_v54  ;;  %v1080_v24 = vmul.f32 %v930_v21, %v828_v8  ;;  %v4832_v17 = vpack.c.bf16 %v1456_v14, %v1453_v13  ;;  %v1454_v19 = vld [vmem:[#allocation5 + $0x10] sm:$0xff]  ;;  %v1457_v21 = vld [vmem:[#allocation5 + $0x28] sm:$0xff] }
 0x1fb   : > { %v1151_v25 = vmul.f32 %v835_v22, %v828_v8  ;;  %v838_v26 = vpop.f32.mrb[4].mxu0  ;;  %4763 = vmatprep.subr.bf16.mxu1 %v5626_v0  ;;  %v6062_v27 = vpop.f32.mrb[4].mxu1 }
 0x1fc   : > { %v839_v28 = vpop.f32.mrb[5].mxu0  ;;  %3924 = vmatmul.mubr.f32.vlgmr.msra.gmra.mrb[6].mxu0 %v938_v23  ;;  %v3890_v33 = vpop.f32.mrb[5].mxu1  ;;  %v4834_v23 = vpack.c.bf16 %v1455_v18, %v1452_v15  ;;  %v1462_v26 = vld [vmem:[#allocation5 + $0x50] sm:$0xff] }
 0x1fd   : > { %v840_v34 = vadd.f32 %v839_v28, %v753_v5  ;;  %4738 = vmatpush3.bf16.msra.mxu0 %v5936_v41  ;;  %3993 = vmatprep.mubr.msk.f32.mxu0 %vm5628_vm0, %v5627_v54  ;;  %v4827_v5 = vpack.c.bf16 %v1348_v4, %v1347_v62  ;;  %v1458_v28 = vld [vmem:[#allocation5 + $0x30] sm:$0xff]  ;;  %v1483_v62 = vld [vmem:[#allocation5 + $0xf8] sm:$0xff] }
 0x1fe   : > { %4765 = vmatpush3.bf16.msra.mxu1 %v5946_v45  ;;  %4739 = vmatprep.subr.bf16.mxu0 %v5626_v0  ;;  %v1486_v4 = vld [vmem:[#allocation5 + $0x110] sm:$0xff] }
 0x1ff   : > { %v1225_v35 = vrot.slane %v840_v34, %v5913_v30  ;;  %4766 = vmatprep.subr.bf16.mxu1 %v5626_v0 }
 0x201   : > { %v1226_v36 = vmul.f32 %v1225_v35, %v828_v8  ;;  %4741 = vmatpush3.bf16.msra.mxu0 %v5946_v45  ;;  %v1350_v8 = vld [vmem:[%s6735_s11 + $0x78] sm:$0xff] }
 0x202   : > { %4768 = vmatpush3.bf16.msra.mxu1 %v5963_v48  ;;  %4742 = vmatprep.subr.bf16.mxu0 %v5626_v0  ;;  %v4830_v9 = vpack.c.bf16 %v1350_v8, %v1349_v6  ;;  %v4852_v6 = vpack.c.bf16 %v1486_v4, %v1483_v62  ;;  %v1482_v8 = vld [vmem:[#allocation5 + $0xf0] sm:$0xff] }
 0x203   : > { %4769 = vmatprep.subr.bf16.mxu1 %v5626_v0 }
 0x205   : > { %4744 = vmatpush3.bf16.msra.mxu0 %v5963_v48 }
 0x206   : > { %4771 = vmatpush3.bf16.msra.mxu1 %v5979_v1  ;;  %4745 = vmatprep.subr.bf16.mxu0 %v5626_v0 }
 0x207   : > { %4772 = vmatprep.subr.bf16.mxu1 %v5626_v0 }
 0x209   : > { %4747 = vmatpush3.bf16.msra.mxu0 %v5979_v1 }
 0x20a   : > { %4774 = vmatpush3.bf16.msra.mxu1 %v5995_v53  ;;  %4748 = vmatprep.subr.bf16.mxu0 %v5626_v0 }
 0x20b   : > { %4775 = vmatprep.subr.bf16.mxu1 %v5626_v0 }
 0x20d   : > { %4750 = vmatpush3.bf16.msra.mxu0 %v5995_v53 }
 0x20e   : > { %4777 = vmatpush3.bf16.msra.mxu1 %v6007_v57  ;;  %4751 = vmatprep.subr.bf16.mxu0 %v5626_v0 }
 0x20f   : > { %4778 = vmatprep.subr.bf16.mxu1 %v5626_v0 }
 0x211   : > { %4753 = vmatpush3.bf16.msra.mxu0 %v6007_v57 }
 0x212   : > { %4780 = vmatpush3.bf16.msra.mxu1 %v6019_v60  ;;  %4754 = vmatprep.subr.bf16.mxu0 %v5626_v0 }
 0x213   : > { %4781 = vmatprep.subr.bf16.mxu1 %v5626_v0 }
 0x215   : > { %4756 = vmatpush3.bf16.msra.mxu0 %v6019_v60 }
 0x216   : > { %4783 = vmatpush3.bf16.msra.mxu1 %v6034_v63  ;;  %4757 = vmatprep.subr.bf16.mxu0 %v5626_v0 }
 0x217   : > { %4808 = vmatprep.subr.bf16.mxu1 %v5626_v0 }
 0x219   : > { %4759 = vmatpush3.bf16.msra.mxu0 %v6034_v63  ;;  %4029 = vmatmul.mubr.f32.vlgmr.msra.gmra.mrb[8].mxu1 %v1151_v25  ;;  %v1459_v25 = vld [vmem:[#allocation5 + $0x38] sm:$0xff] }
 0x21a   : > { %4784 = vmatprep.subr.bf16.mxu0 %v5626_v0  ;;  %4098 = vmatprep.mubr.msk.f32.mxu1 %vm5628_vm0, %v5627_v54  ;;  %v4836_v35 = vpack.c.bf16 %v1462_v26, %v1459_v25 }
 0x21b   : > { %4810 = vmatpush3.bf16.msra.mxu1 %v4809_v39  ;;  %v1468_v39 = vld [vmem:[#allocation5 + $0x80] sm:$0xff] }
 0x21c   : > { %3994 = vmatmul.mubr.f32.vlgmr.msra.gmra.mrb[8].mxu0 %v1080_v24  ;;  %4811 = vmatprep.subr.bf16.mxu1 %v5626_v0  ;;  %v6178_v24 = vpack.c.bf16 %v1457_v21, %v1454_v19  ;;  %v4840_v40 = vpack.c.bf16 %v1468_v39, %v1465_v38  ;;  %v6184_v21 = vsub.s32 2, %v5910_v29 }
 0x21d   : > { %4786 = vmatpush3.bf16.msra.mxu0 %v5936_v41  ;;  %4063 = vmatprep.mubr.msk.f32.mxu0 %vm5628_vm0, %v5627_v54 }
 0x21e   : > { %4787 = vmatprep.subr.bf16.mxu0 %v5626_v0 }
 0x21f   : > { %4813 = vmatpush3.bf16.msra.mxu1 %v4812_v43  ;;  %v1467_v43 = vld [vmem:[#allocation5 + $0x78] sm:$0xff] }
 0x220   : > { %4814 = vmatprep.subr.bf16.mxu1 %v5626_v0 }
 0x221   : > { %4789 = vmatpush3.bf16.msra.mxu0 %v5946_v45 }
 0x222   : > { %4790 = vmatprep.subr.bf16.mxu0 %v5626_v0 }
 0x223   : > { %4816 = vmatpush3.bf16.msra.mxu1 %v4815_v47  ;;  %v4842_v47 = vpack.c.bf16 %v1467_v43, %v1464_v42 }
 0x224   : > { %4817 = vmatprep.subr.bf16.mxu1 %v5626_v0 }
 0x225   : > { %4792 = vmatpush3.bf16.msra.mxu0 %v5963_v48 }
 0x226   : > { %4793 = vmatprep.subr.bf16.mxu0 %v5626_v0 }
 0x227   : > { %4819 = vmatpush3.bf16.msra.mxu1 %v4818_v51  ;;  %v1473_v51 = vld [vmem:[#allocation5 + $0xa8] sm:$0xff] }
 0x228   : > { %4820 = vmatprep.subr.bf16.mxu1 %v5626_v0 }
 0x229   : > { %4795 = vmatpush3.bf16.msra.mxu0 %v5979_v1 }
 0x22a   : > { %4796 = vmatprep.subr.bf16.mxu0 %v5626_v0 }
 0x22b   : > { %4822 = vmatpush3.bf16.msra.mxu1 %v4821_v56  ;;  %v4846_v56 = vpack.c.bf16 %v1473_v51, %v1470_v50 }
 0x22c   : > { %4823 = vmatprep.subr.bf16.mxu1 %v5626_v0 }
 0x22d   : > { %4798 = vmatpush3.bf16.msra.mxu0 %v5995_v53 }
 0x22e   : > { %4799 = vmatprep.subr.bf16.mxu0 %v5626_v0 }
 0x22f   : > { %4825 = vmatpush3.bf16.msra.mxu1 %v4824_v61  ;;  %v1479_v61 = vld [vmem:[#allocation5 + $0xd8] sm:$0xff] }
 0x230   : > { %4826 = vmatprep.subr.bf16.mxu1 %v5626_v0 }
 0x231   : > { %4801 = vmatpush3.bf16.msra.mxu0 %v6007_v57 }
 0x232   : > { %4802 = vmatprep.subr.bf16.mxu0 %v5626_v0 }
 0x233   : > { %4828 = vmatpush3.bf16.msra.mxu1 %v4827_v5  ;;  %v4850_v5 = vpack.c.bf16 %v1479_v61, %v1476_v59 }
 0x234   : > { %4829 = vmatprep.subr.bf16.mxu1 %v5626_v0 }
 0x235   : > { %4804 = vmatpush3.bf16.msra.mxu0 %v6019_v60 }
 0x236   : > { %4805 = vmatprep.subr.bf16.mxu0 %v5626_v0 }
 0x237   : > { %4831 = vmatpush3.bf16.msra.mxu1 %v4830_v9  ;;  %v1485_v9 = vld [vmem:[#allocation5 + $0x108] sm:$0xff] }
 0x238   : > { %4865 = vmatprep.subr.bf16.mxu1 %v6178_v24  ;;  %v4854_v10 = vpack.c.bf16 %v1485_v9, %v1482_v8 }
 0x239   : > { %4807 = vmatpush3.bf16.msra.mxu0 %v6034_v63 }
 0x23a   : > { %4833 = vmatprep.subr.bf16.mxu0 %v4832_v17 }
 0x23c   : > { %4064 = vmatmul.mubr.f32.vlgmr.msra.gmra.mrb[10].mxu0 %v1226_v36  ;;  %v1461_v36 = vld [vmem:[#allocation5 + $0x48] sm:$0xff] }
 0x23d   : > { %1581 = vmatprep.mubr.f32.mxu0 %v5627_v54  ;;  %4835 = vmatpush1.bf16.msra.mxu0 %v4834_v23  ;;  %v4838_v37 = vpack.c.bf16 %v1461_v36, %v1458_v28 }
 0x23e   : > { %4837 = vmatprep.subr.bf16.mxu0 %v4836_v35 }
 0x241   : > { %4839 = vmatpush1.bf16.msra.mxu0 %v4838_v37  ;;  %v757_v37 = vrot.slane %v6043_v2, %v6184_v21 }
 0x242   : > { %4841 = vmatprep.subr.bf16.mxu0 %v4840_v40 }
 0x243   : > { %v909_v29 = vadd.f32 %v6052_v7, %v757_v37  ;;  %v919_v43 = vadd.f32 %v6062_v27, %v757_v37  ;;  %v914_v51 = vadd.f32 %v6054_v16, %v757_v37  ;;  %v1487_v37 = vld [vmem:[#allocation5 + $0x118] sm:$0xff] }
 0x245   : > { %4843 = vmatpush1.bf16.msra.mxu0 %v4842_v47 }
 0x246   : > { %4845 = vmatprep.subr.bf16.mxu0 %v4844_v49 }
 0x249   : > { %4847 = vmatpush1.bf16.msra.mxu0 %v4846_v56  ;;  %v1331_v56 = vrot.slane %v919_v43, %v5913_v30  ;;  %v1495_v43 = vld [vmem:[#allocation5 + $0x158] sm:$0xff] }
 0x24a   : > { %4849 = vmatprep.subr.bf16.mxu0 %v4848_v58 }
 0x24d   : > { %4851 = vmatpush1.bf16.msra.mxu0 %v4850_v5 }
 0x24e   : > { %4853 = vmatprep.subr.bf16.mxu0 %v4852_v6 }
 0x251   : > { %4855 = vmatpush1.bf16.msra.mxu0 %v4854_v10 }
 0x2cc   : > { %v6174_v11 = vpop.f32.mrb[6].mxu1 }
 0x2cd   : > { %v3960_v12 = vpop.f32.mrb[7].mxu1 }
 0x2cf   : > { %v6176_v22 = vpop.f32.mrb[6].mxu0 }
 0x2d0   : > { %v1297_v33 = vmax.f32 %v6176_v22, %v6174_v11  ;;  %v3925_v34 = vpop.f32.mrb[7].mxu0 }
 0x2ec   : > { %v1218_v12 = vpop.f32.mrb[8].mxu1 }
 0x2ed   : > { %v4030_v13 = vpop.f32.mrb[9].mxu1 }
 0x2ee   : > { %v1463_v13 = vld [vmem:[#allocation5 + $0x58] sm:$0xff] }
 0x2ef   : > { %v1147_v14 = vpop.f32.mrb[8].mxu0 }
 0x2f0   : > { %v1298_v15 = vmax.f32 %v1147_v14, %v1218_v12  ;;  %v3995_v17 = vpop.f32.mrb[9].mxu0 }
 0x2f1   : > { %v1466_v17 = vld [vmem:[#allocation5 + $0x70] sm:$0xff] }
 0x2f2   : > { %v1299_v18 = vmax.f32 %v1297_v33, %v1298_v15 }
 0x30f   : > { %v1293_v19 = vpop.f32.mrb[10].mxu0 }
 0x310   : > { %v1300_v23 = vmax.f32 %v1299_v18, %v1293_v19  ;;  %v4065_v25 = vpop.f32.mrb[11].mxu0  ;;  %v1469_v18 = vld [vmem:[#allocation5 + $0x88] sm:$0xff] }
 0x311   : > { %v1475_v25 = vld [vmem:[#allocation5 + $0xb8] sm:$0xff] }
 0x312   : > { %v1301_v26 = vsub.f32 %v6176_v22, %v1300_v23  ;;  %v1304_v28 = vsub.f32 %v6174_v11, %v1300_v23  ;;  %v1307_v34 = vsub.f32 %v1147_v14, %v1300_v23  ;;  %v1310_v35 = vsub.f32 %v1218_v12, %v1300_v23  ;;  %v1460_v12 = vld [vmem:[#allocation5 + $0x40] sm:$0xff] }
 0x313   : > { %v1313_v36 = vsub.f32 %v1293_v19, %v1300_v23  ;;  %v932_v22 = vrot.slane %v909_v29, 7  ;;  %v935_v11 = vrot.slane %v909_v29, 1  ;;  %v4868_v15 = vpack.c.bf16 %v1463_v13, %v1460_v12  ;;  %v1472_v23 = vld [vmem:[#allocation5 + $0xa0] sm:$0xff] }
 0x314   : > { %v1302_v38 = vmul.f32 1.442695, %v1301_v26  ;;  %v1305_v39 = vmul.f32 1.442695, %v1304_v28  ;;  %v1308_v40 = vmul.f32 1.442695, %v1307_v34  ;;  %v4872_v19 = vpack.c.bf16 %v1469_v18, %v1466_v17 }
 0x315   : > { %v1311_v33 = vmul.f32 1.442695, %v1310_v35  ;;  %v1314_v42 = vmul.f32 1.442695, %v1313_v36  ;;  %v934_v46 = vsel %vm925_vm1, 0.0, %v932_v22  ;;  %v937_v50 = vsel %vm929_vm2, %v935_v11, 0.0 }
 0x316   : > { %5388 = vpow2.f32 %v1302_v38  ;;  %v4876_v26 = vpack.c.bf16 %v1475_v25, %v1472_v23  ;;  %v1478_v28 = vld [vmem:[#allocation5 + $0xd0] sm:$0xff]  ;;  %v1481_v34 = vld [vmem:[#allocation5 + $0xe8] sm:$0xff]  ;;  %v1484_v36 = vld [vmem:[#allocation5 + $0x100] sm:$0xff] }
 0x317   : > { %5390 = vpow2.f32 %v1305_v39  ;;  %v4880_v35 = vpack.c.bf16 %v1481_v34, %v1478_v28  ;;  %v4884_v38 = vpack.c.bf16 %v1487_v37, %v1484_v36  ;;  %v1492_v39 = vld [vmem:[#allocation5 + $0x140] sm:$0xff]  ;;  %v1493_v11 = vld [vmem:[#allocation5 + $0x148] sm:$0xff] }
 0x318   : > { %5392 = vpow2.f32 %v1308_v40  ;;  %v6209_v12 = vld [vmem:[%s641_s2] sm:$0xff] }
 0x319   : > { %5394 = vpow2.f32 %v1311_v33  ;;  %v1488_v33 = vld [vmem:[#allocation5 + $0x120] sm:$0xff]  ;;  %vm1825_vm4 = vcmp.gt.f32.partialorder %v6209_v12, 0.0 }
 0x31a   : > { %5396 = vpow2.f32 %v1314_v42  ;;  %v1491_v42 = vld [vmem:[#allocation5 + $0x138] sm:$0xff]  ;;  %v1500_v28 = vld [vmem:[%s6738_s14] sm:$0x7] }
 0x31b   : > { %v4858_v22 = vpack.c.bf16 %v1491_v42, %v1488_v33  ;;  %v1505_v34 = vrot.slane %v1500_v28, %v5913_v30  ;;  %v1513_v36 = vrot.slane %v1500_v28, %v6184_v21 }
 0x320   : > { %v5389_v44 = vpop.eup %5388 }
 0x321   : > { %v5391_v2 = vpop.eup %5390  ;;  %v1321_v47 = vmul.f32 %v5389_v44, %v934_v46 }
 0x322   : > { %v5393_v49 = vpop.eup %5392  ;;  %v1316_v52 = vadd.f32 %v5391_v2, %v5389_v44  ;;  %v1322_v55 = vmul.f32 %v5391_v2, %v909_v29  ;;  %v1490_v29 = vld [vmem:[#allocation5 + $0x130] sm:$0xff] }
 0x323   : > { %v5395_v7 = vpop.eup %5394  ;;  %v1324_v58 = vmul.f32 %v5393_v49, %v937_v50  ;;  %v1498_v44 = vld [vmem:[#allocation5 + $0x170] sm:$0xff]  ;;  %v4888_v46 = vpack.c.bf16 %v1493_v11, %v1490_v29  ;;  %v1496_v50 = vld [vmem:[#allocation5 + $0x160] sm:$0xff] }
 0x324   : > { %v5397_v59 = vpop.eup %5396  ;;  %v1317_v61 = vadd.f32 %v5393_v49, %v1316_v52  ;;  %v1323_v62 = vadd.f32 %v1322_v55, %v1321_v47  ;;  %v1326_v27 = vmul.f32 %v5395_v7, %v914_v51  ;;  %v4860_v2 = vpack.c.bf16 %v1498_v44, %v1495_v43  ;;  %v1494_v47 = vld [vmem:[#allocation5 + $0x150] sm:$0xff]  ;;  %v1497_v49 = vld [vmem:[#allocation5 + $0x168] sm:$0xff]  ;;  %v1499_v52 = vld [vmem:[#allocation5 + $0x178] sm:$0xff] }
 0x325   : > { %v1332_v4 = vmul.f32 %v5397_v59, %v1331_v56  ;;  %v4862_v51 = vpack.c.bf16 %v1497_v49, %v1494_v47  ;;  %v4892_v55 = vpack.c.bf16 %v1499_v52, %v1496_v50 }
 0x326   : > { %v1318_v5 = vadd.f32 %v5395_v7, %v1317_v61  ;;  %v1325_v6 = vadd.f32 %v1324_v58, %v1323_v62  ;;  %v1432_v7 = vpop.xlane.xlu1 %1431 }
 0x327   : > { %v1433_v56 = vmul.f32 0.03125, %v1432_v7  ;;  %v1996_v7 = vld [vmem:[#allocation2 + $0x198] sm:$0xff] }
 0x328   : > { %v1319_v8 = vadd.f32 %v5397_v59, %v1318_v5  ;;  %v1327_v9 = vadd.f32 %v1326_v27, %v1325_v6 }
 0x329   : > { %v1439_v59 = vmul.f32 %v1433_v56, %v1433_v56 }
 0x32a   : > { %5398 = vrcp.f32 %v1319_v8  ;;  %v1333_v10 = vadd.f32 %v1332_v4, %v1327_v9  ;;  %v1436_v58 = vpop.xlane.xlu1 %1435  ;;  %v1438_v4 = vsub.f32 %v5907_v20, %v1433_v56  ;;  %v3441_v8 = vld [vmem:[%s6736_s12] ss:$0 sm:$0xff] }
 0x32b   : > { %v1437_v61 = vmul.f32 0.03125, %v1436_v58 }
 0x32d   : > { %v1440_v62 = vsub.f32 %v1437_v61, %v1439_v59  ;;  %v2000_v61 = vld [vmem:[#allocation2 + $0x1b8] sm:$0xff] }
 0x32f   : > { %v1441_v27 = vadd.f32 1e-06, %v1440_v62  ;;  %v2003_v62 = vld [vmem:[#allocation2 + $0x1d0] sm:$0xff] }
 0x331   : > { %5400 = vrsqrt.f32 %v1441_v27 }
 0x334   : > { %v5399_v16 = vpop.eup %5398 }
 0x335   : > { %v1334_v14 = vmul.f32 %v5399_v16, %v1333_v10 }
 0x337   : > { %4099 = vmatmul.mubr.f32.vlgmr.msra.gmra.mrb[10].mxu1 %v1334_v14 }
 0x338   : > { %4867 = vmatpush3.bf16.msra.mxu1 %v6178_v24  ;;  %v1489_v24 = vld [vmem:[#allocation5 + $0x128] sm:$0xff] }
 0x339   : > { %4869 = vmatprep.subr.bf16.mxu1 %v4868_v15  ;;  %v4856_v40 = vpack.c.bf16 %v1492_v39, %v1489_v24 }
 0x33b   : > { %4857 = vmatprep.subr.bf16.mxu0 %v4856_v40  ;;  %v5401_v5 = vpop.eup %5400 }
 0x33c   : > { %4871 = vmatpush3.bf16.msra.mxu1 %v4868_v15  ;;  %4859 = vmatpush1.bf16.msra.mxu0 %v4858_v22  ;;  %v1443_v6 = vmul.f32 %v5401_v5, %v1438_v4 }
 0x33d   : > { %4873 = vmatprep.subr.bf16.mxu1 %v4872_v19  ;;  %4861 = vmatprep.subr.bf16.mxu0 %v4860_v2 }
 0x33e   : > { %v1444_v9 = vmul.f32 %v1443_v6, %v5918_v31 }
 0x340   : > { %4875 = vmatpush3.bf16.msra.mxu1 %v4872_v19  ;;  %4863 = vmatpush1.bf16.msra.mxu0 %v4862_v51  ;;  %v1445_v15 = vadd.f32 %v1444_v9, %v5923_v32  ;;  %v1997_v32 = vld [vmem:[#allocation2 + $0x1a0] sm:$0xff]  ;;  %v4972_v9 = vpack.c.bf16 %v2003_v62, %v2000_v61 }
 0x341   : > { %4877 = vmatprep.subr.bf16.mxu1 %v4876_v26  ;;  %4896 = vmatprep.subr.bf16.mxu0 %v5626_v0  ;;  %v6283_v61 = vld [vmem:[%s6731_s7 + $0x1] sm:$0x1] }
 0x342   : > { %v1449_v23 = vsel %vm925_vm1, %v1445_v15, %v5907_v20  ;;  %v1994_v20 = vld [vmem:[#allocation2 + $0x188] sm:$0xff]  ;;  %v2009_v15 = vld [vmem:[#allocation2 + $0x200] sm:$0xff] }
 0x344   : > { %4879 = vmatpush3.bf16.msra.mxu1 %v4876_v26  ;;  %v4968_v26 = vpack.c.bf16 %v1997_v32, %v1994_v20  ;;  %v2012_v20 = vld [vmem:[#allocation2 + $0x218] sm:$0xff]  ;;  %v2015_v32 = vld [vmem:[#allocation2 + $0x230] sm:$0xff] }
 0x345   : > { %4881 = vmatprep.subr.bf16.mxu1 %v4880_v35 }
 0x348   : > { %4883 = vmatpush3.bf16.msra.mxu1 %v4880_v35  ;;  %v1509_v35 = vrot.slane %v1500_v28, %v6046_v3 }
 0x349   : > { %4885 = vmatprep.subr.bf16.mxu1 %v4884_v38 }
 0x34c   : > { %4887 = vmatpush3.bf16.msra.mxu1 %v4884_v38 }
 0x34d   : > { %4889 = vmatprep.subr.bf16.mxu1 %v4888_v46 }
 0x350   : > { %4891 = vmatpush3.bf16.msra.mxu1 %v4888_v46 }
 0x351   : > { %4893 = vmatprep.subr.bf16.mxu1 %v4892_v55 }
 0x354   : > { %4895 = vmatpush3.bf16.msra.mxu1 %v4892_v55  ;;  %v1993_v55 = vld [vmem:[#allocation2 + $0x180] sm:$0xff] }
 0x355   : > { %4920 = vmatprep.subr.bf16.mxu1 %v5626_v0  ;;  %v4970_v27 = vpack.c.bf16 %v1996_v7, %v1993_v55  ;;  %v2032_v55 = vld [vmem:[#allocation2 + $0x2b8] sm:$0xff] }
 0x40a   : > { %v1424_v10 = vpop.f32.mrb[10].mxu1 }
 0x40b   : > { %v1425_v13 = vadd.f32 %v3441_v8, %v1424_v10  ;;  %v4100_v16 = vpop.f32.mrb[11].mxu1  ;;  %v1999_v10 = vld [vmem:[#allocation2 + $0x1b0] sm:$0xff] }
 0x40d   : > { %v1429_v14 = vmul.f32 0.01, %v1425_v13  ;;  %vm1428_vm3 = vcmp.ge.f32.partialorder %v1425_v13, 0.0 }
 0x40f   : > { %v1430_v17 = vsel %vm1428_vm3, %v1425_v13, %v1429_v14  ;;  %v2002_v13 = vld [vmem:[#allocation2 + $0x1c8] sm:$0xff] }
 0x410   : > { %v6215_v18 = vsel %vm1825_vm4, 0.0, %v1430_v17  ;;  %v1447_v19 = vrot.slane %v1430_v17, 6  ;;  %v2006_v14 = vld [vmem:[#allocation2 + $0x1e8] sm:$0xff] }
 0x411   : > { %1965 = vadd.xlane.f32.xlu0 %v6215_v18  ;;  %v1968_v31 = vmul.f32 %v6215_v18, %v6215_v18 }
 0x412   : > { %v1451_v25 = vsel %vm1450_vm5, %v1449_v23, %v1447_v19  ;;  %v2005_v23 = vld [vmem:[#allocation2 + $0x1e0] sm:$0xff] }
 0x413   : > { %1969 = vadd.xlane.f32.xlu1 %v1968_v31  ;;  %1582 = vmatmul.mubr.f32.vlgmr.msra.gmra.mrb[12].mxu0 %v1451_v25  ;;  %v4976_v31 = vpack.c.bf16 %v2009_v15, %v2006_v14  ;;  %v6304_v14 = vld [vmem:[%s5885_s24] sm:$0xff]  ;;  %s5629_s24 = smov [#allocation8]  }
 0x414   : > { %4133 = vmatprep.mubr.f32.mxu1 %v1451_v25  ;;  %1587 = vmatprep.mubr.f32.mxu0 %v5627_v54  ;;  %v2008_v25 = vld [vmem:[#allocation2 + $0x1f8] sm:$0xff]  ;;  %v1870_v15 = vld [vmem:[#allocation7] sm:$0xff]  ;;  %s5519_s17 = sshll.u32 %s5629_s24, 4  ;;  %s5520_s17 = int_to_ptr.vmem [resolvable:$false] %s5519_s17 }
 0x415   : > { %4134 = vmatmul.mubr.f32.vlgmr.msra.gmra.mrb[12].mxu1 %v1447_v19  ;;  %4898 = vmatpush3.bf16.msra.mxu0 %v5936_v41  ;;  %v4978_v28 = vpack.c.bf16 %v2008_v25, %v2005_v23  ;;  %v1873_v23 = vld [vmem:[#allocation7 + $0x18] sm:$0xff]  ;;  %s5521_s22 = scalar_lea.vmem %s5520_s17, 256  ;;  %p5522_p13 = scmp.lt.s32.totalorder %s3286_s23, %s5520_s17 }
 0x416   : > { %4899 = vmatprep.subr.bf16.mxu0 %v5626_v0  ;;  %4922 = vmatpush3.bf16.msra.mxu1 %v5936_v41  ;;  %p5523_p1 = scmp.lt.s32.totalorder %s5521_s22, %s5515_s25 }
 0x417   : > { %1588 = vmatmul.mubr.f32.gmra.mrb[14].mxu0 %v1447_v19  ;;  %4923 = vmatprep.subr.bf16.mxu1 %v5626_v0  ;;  %v4974_v19 = vpack.c.bf16 %v2002_v13, %v1999_v10  ;;  %v6292_v10 = vld [vmem:[%s6732_s8 + $0x1] sm:$0x1] }
 0x418   : > { %4168 = vmatprep.mubr.msk.f32.mxu0 %vm5628_vm0, %v5627_v54  ;;  %4203 = vmatprep.mubr.msk.f32.mxu1 %vm5628_vm0, %v5627_v54  ;;  %p5524_p6 = por %p5523_p1, %p5522_p13 }
 0x419   : > { %4901 = vmatpush3.bf16.msra.mxu0 %v5946_v45 }
 0x41a   : > { %4902 = vmatprep.subr.bf16.mxu0 %v5626_v0  ;;  %4925 = vmatpush3.bf16.msra.mxu1 %v5946_v45  ;;  %p5525_p9 = pnand %p5524_p6, %p5518_p11 }
 0x41b   : > { %4926 = vmatprep.subr.bf16.mxu1 %v5626_v0 }
 0x41d   : > { %4904 = vmatpush3.bf16.msra.mxu0 %v5963_v48 }
 0x41e   : > { %4905 = vmatprep.subr.bf16.mxu0 %v5626_v0  ;;  %4928 = vmatpush3.bf16.msra.mxu1 %v5963_v48 }
 0x41f   : > { %4929 = vmatprep.subr.bf16.mxu1 %v5626_v0 }
 0x421   : > { %4907 = vmatpush3.bf16.msra.mxu0 %v5979_v1 }
 0x422   : > { %4908 = vmatprep.subr.bf16.mxu0 %v5626_v0  ;;  %4931 = vmatpush3.bf16.msra.mxu1 %v5979_v1 }
 0x423   : > { %4932 = vmatprep.subr.bf16.mxu1 %v5626_v0 }
 0x425   : > { %4910 = vmatpush3.bf16.msra.mxu0 %v5995_v53 }
 0x426   : > { %4911 = vmatprep.subr.bf16.mxu0 %v5626_v0  ;;  %4934 = vmatpush3.bf16.msra.mxu1 %v5995_v53 }
 0x427   : > { %4935 = vmatprep.subr.bf16.mxu1 %v5626_v0 }
 0x429   : > { %4913 = vmatpush3.bf16.msra.mxu0 %v6007_v57 }
 0x42a   : > { %4914 = vmatprep.subr.bf16.mxu0 %v5626_v0  ;;  %4937 = vmatpush3.bf16.msra.mxu1 %v6007_v57 }
 0x42b   : > { %4938 = vmatprep.subr.bf16.mxu1 %v5626_v0 }
 0x42d   : > { %4916 = vmatpush3.bf16.msra.mxu0 %v6019_v60 }
 0x42e   : > { %4917 = vmatprep.subr.bf16.mxu0 %v5626_v0  ;;  %4940 = vmatpush3.bf16.msra.mxu1 %v6019_v60 }
 0x42f   : > { %4941 = vmatprep.subr.bf16.mxu1 %v5626_v0 }
 0x431   : > { %4919 = vmatpush3.bf16.msra.mxu0 %v6034_v63 }
 0x432   : > { %4943 = vmatpush3.bf16.msra.mxu1 %v6034_v63  ;;  %4944 = vmatprep.subr.bf16.mxu0 %v5626_v0 }
 0x433   : > { %4969 = vmatprep.subr.bf16.mxu1 %v4968_v26 }
 0x49e   : > { %v1966_v33 = vpop.xlane.xlu0 %1965 }
 0x49f   : > { %v6268_v49 = vmul.f32 0.03125, %v1966_v33  ;;  %v2020_v33 = vld [vmem:[#allocation2 + $0x258] sm:$0xff] }
 0x4a0   : > { %v1970_v56 = vpop.xlane.xlu1 %1969 }
 0x4a1   : > { %v1973_v4 = vmul.f32 %v6268_v49, %v6268_v49  ;;  %v1971_v5 = vmul.f32 0.03125, %v1970_v56  ;;  %v2036_v56 = vld [vmem:[#allocation2 + $0x2d8] sm:$0xff]  ;;  %v1972_v62 = vsub.f32 %v6215_v18, %v6268_v49  ;;  %v1989_v49 = vrot.slane %v6292_v10, %v5913_v30 }
 0x4a3   : > { %v1974_v17 = vsub.f32 %v1971_v5, %v1973_v4  ;;  %v2035_v5 = vld [vmem:[#allocation2 + $0x2d0] sm:$0xff] }
 0x4a5   : > { %v1975_v26 = vadd.f32 1e-06, %v1974_v17  ;;  %v1871_v17 = vld [vmem:[#allocation7 + $0x8] sm:$0xff] }
 0x4a7   : > { %5402 = vrsqrt.f32 %v1975_v26 }
 0x4b1   : > { %v5403_v7 = vpop.eup %5402 }
 0x4e6   : > { %v1583_v37 = vpop.f32.mrb[12].mxu0 }
 0x4e7   : > { %v1584_v38 = vadd.f32 %v1583_v37, %v1505_v34  ;;  %v1585_v24 = vpop.f32.mrb[13].mxu0  ;;  %v4980_v34 = vpack.c.bf16 %v2015_v32, %v2012_v20  ;;  %v2018_v37 = vld [vmem:[#allocation2 + $0x248] sm:$0xff]  ;;  %v1874_v20 = vld [vmem:[#allocation7 + $0x20] sm:$0xff] }
 0x4e8   : > { %v1586_v39 = vadd.f32 %v1585_v24, %v1509_v35  ;;  %v4135_v40 = vpop.f32.mrb[12].mxu1  ;;  %v1875_v32 = vld [vmem:[#allocation7 + $0x28] sm:$0xff] }
 0x4e9   : > { %v1745_v42 = vrot.slane %v1584_v38, %v5913_v30  ;;  %v1665_v29 = vadd.f32 %v4135_v40, %v1513_v36  ;;  %v1659_v22 = vpop.f32.mrb[13].mxu1  ;;  %v2017_v40 = vld [vmem:[#allocation2 + $0x240] sm:$0xff]  ;;  %v4951_v26 = vpack.c.bf16 %v1875_v32, %v1874_v20 }
 0x4ea   : > { %v1669_v11 = vrot.slane %v1586_v39, 1  ;;  %v6266_v43 = vadd.f32 %v1659_v22, %v1513_v36  ;;  %v1589_v44 = vpop.f32.mrb[14].mxu0  ;;  %v2014_v36 = vld [vmem:[#allocation2 + $0x228] sm:$0xff]  ;;  %v4986_v22 = vpack.c.bf16 %v2020_v33, %v2017_v40  ;;  %v1882_v33 = vld [vmem:[#allocation7 + $0x60] sm:$0xff] }
 0x4eb   : > { %v1746_v46 = vmul.f32 %v1745_v42, %v1586_v39  ;;  %v1857_v2 = vrot.slane %v1665_v29, 2  ;;  %v1590_v47 = vpop.f32.mrb[15].mxu0  ;;  %v2027_v29 = vld [vmem:[#allocation2 + $0x290] sm:$0xff] }
 0x4ec   : > { %v1671_v50 = vmul.f32 %v1669_v11, %v1584_v38  ;;  %v1856_v51 = vrot.slane %v6266_v43, 2  ;;  %v1591_v52 = vadd.f32 %v1590_v47, %v1509_v35  ;;  %v2011_v35 = vld [vmem:[#allocation2 + $0x210] sm:$0xff]  ;;  %v2021_v38 = vld [vmem:[#allocation2 + $0x260] sm:$0xff] }
 0x4ed   : > { %v1751_v6 = vrot.slane %v1746_v46, 2  ;;  %v4982_v24 = vpack.c.bf16 %v2014_v36, %v2011_v35  ;;  %v4984_v39 = vpack.c.bf16 %v2021_v38, %v2018_v37  ;;  %v2023_v44 = vld [vmem:[#allocation2 + $0x270] sm:$0xff]  ;;  %v2026_v46 = vld [vmem:[#allocation2 + $0x288] sm:$0xff]  ;;  %v2033_v47 = vld [vmem:[#allocation2 + $0x2c0] sm:$0xff] }
 0x4ee   : > { %v6272_v58 = vsel %vm1750_vm6, %v1856_v51, %v1857_v2  ;;  %v1747_v59 = vmul.f32 %v1745_v42, %v1591_v52  ;;  %4169 = vmatmul.mubr.f32.vlgmr.msra.gmra.mrb[16].mxu0 %v1671_v50  ;;  %v2024_v42 = vld [vmem:[#allocation2 + $0x278] sm:$0xff]  ;;  %v2030_v2 = vld [vmem:[#allocation2 + $0x2a8] sm:$0xff]  ;;  %v4990_v50 = vpack.c.bf16 %v2026_v46, %v2023_v44  ;;  %v2029_v52 = vld [vmem:[#allocation2 + $0x2a0] sm:$0xff] }
 0x4ef   : > { %4238 = vmatprep.mubr.msk.f32.mxu0 %vm5628_vm0, %v5627_v54  ;;  %v4988_v11 = vpack.c.bf16 %v2027_v29, %v2024_v42  ;;  %v4992_v51 = vpack.c.bf16 %v2033_v47, %v2030_v2  ;;  %v1878_v35 = vld [vmem:[#allocation7 + $0x40] sm:$0xff]  ;;  %v1879_v37 = vld [vmem:[#allocation7 + $0x48] sm:$0xff] }
 0x4f0   : > { %v1752_v8 = vrot.slane %v1747_v59, 2  ;;  %v2039_v59 = vld [vmem:[#allocation2 + $0x2f0] sm:$0xff]  ;;  %v4957_v38 = vpack.c.bf16 %v1879_v37, %v1878_v35  ;;  %v1883_v42 = vld [vmem:[#allocation7 + $0x68] sm:$0xff] }
 0x4f1   : > { %v4996_v4 = vpack.c.bf16 %v2039_v59, %v2036_v56  ;;  %v4963_v29 = vpack.c.bf16 %v1883_v42, %v1882_v33  ;;  %v1995_v42 = vld [vmem:[#allocation2 + $0x190] sm:$0xff] }
 0x4f2   : > { %v1753_v16 = vsel %vm1750_vm6, %v1751_v6, %v1752_v8  ;;  %v2038_v6 = vld [vmem:[#allocation2 + $0x2e8] sm:$0xff]  ;;  %v1977_v8 = vmul.f32 %v5403_v7, %v1972_v62 }
 0x4f3   : > { %4204 = vmatmul.mubr.f32.vlgmr.msra.gmra.mrb[14].mxu1 %v1753_v16  ;;  %v4998_v13 = vpack.c.bf16 %v2038_v6, %v2035_v5 }
 0x4f4   : > { %4971 = vmatpush1.bf16.msra.mxu1 %v4970_v27  ;;  %2123 = vmatprep.mubr.f32.mxu1 %v5627_v54  ;;  %v4994_v27 = vpack.c.bf16 %v2032_v55, %v2029_v52 }
 0x4f5   : > { %4973 = vmatprep.subr.bf16.mxu1 %v4972_v9  ;;  %v1982_v9 = vrot.slane %v6283_v61, %v5913_v30 }
 0x4f7   : > { %v1984_v18 = vmul.f32 %v1982_v9, %v1977_v8 }
 0x4f8   : > { %4975 = vmatpush1.bf16.msra.mxu1 %v4974_v19  ;;  %v4945_v19 = vpack.c.bf16 %v1871_v17, %v1870_v15 }
 0x4f9   : > { %4977 = vmatprep.subr.bf16.mxu1 %v4976_v31  ;;  %v6296_v16 = vadd.f32 %v1989_v49, %v1984_v18  ;;  %v1872_v31 = vld [vmem:[#allocation7 + $0x10] sm:$0xff] }
 0x4fa   : > { %4946 = vmatpush3.bf16.msra.mxu0 %v4945_v19  ;;  %v4948_v25 = vpack.c.bf16 %v1873_v23, %v1872_v31 }
 0x4fb   : > { %4947 = vmatprep.subr.bf16.mxu0 %v5626_v0 }
 0x4fc   : > { %4979 = vmatpush1.bf16.msra.mxu1 %v4978_v28  ;;  %v1876_v28 = vld [vmem:[#allocation7 + $0x30] sm:$0xff] }
 0x4fd   : > { %4981 = vmatprep.subr.bf16.mxu1 %v4980_v34  ;;  %v1877_v34 = vld [vmem:[#allocation7 + $0x38] sm:$0xff] }
 0x4fe   : > { %4949 = vmatpush3.bf16.msra.mxu0 %v4948_v25  ;;  %v4954_v36 = vpack.c.bf16 %v1877_v34, %v1876_v28 }
 0x4ff   : > { %4950 = vmatprep.subr.bf16.mxu0 %v5626_v0 }
 0x500   : > { %4983 = vmatpush1.bf16.msra.mxu1 %v4982_v24  ;;  %v1880_v24 = vld [vmem:[#allocation7 + $0x50] sm:$0xff] }
 0x501   : > { %4985 = vmatprep.subr.bf16.mxu1 %v4984_v39  ;;  %v1881_v39 = vld [vmem:[#allocation7 + $0x58] sm:$0xff] }
 0x502   : > { %4952 = vmatpush3.bf16.msra.mxu0 %v4951_v26  ;;  %v4960_v40 = vpack.c.bf16 %v1881_v39, %v1880_v24 }
 0x503   : > { %4953 = vmatprep.subr.bf16.mxu0 %v5626_v0 }
 0x504   : > { %4987 = vmatpush1.bf16.msra.mxu1 %v4986_v22  ;;  %v1884_v22 = vld [vmem:[#allocation7 + $0x70] sm:$0xff] }
 0x505   : > { %4989 = vmatprep.subr.bf16.mxu1 %v4988_v11  ;;  %v1885_v11 = vld [vmem:[#allocation7 + $0x78] sm:$0xff] }
 0x506   : > { %4955 = vmatpush3.bf16.msra.mxu0 %v4954_v36  ;;  %v4966_v44 = vpack.c.bf16 %v1885_v11, %v1884_v22 }
 0x507   : > { %4956 = vmatprep.subr.bf16.mxu0 %v5626_v0 }
 0x508   : > { %4991 = vmatpush1.bf16.msra.mxu1 %v4990_v50 }
 0x509   : > { %4993 = vmatprep.subr.bf16.mxu1 %v4992_v51 }
 0x50a   : > { %4958 = vmatpush3.bf16.msra.mxu0 %v4957_v38 }
 0x50b   : > { %4959 = vmatprep.subr.bf16.mxu0 %v5626_v0 }
 0x50c   : > { %4995 = vmatpush1.bf16.msra.mxu1 %v4994_v27 }
 0x50d   : > { %4997 = vmatprep.subr.bf16.mxu1 %v4996_v4 }
 0x50e   : > { %4961 = vmatpush3.bf16.msra.mxu0 %v4960_v40 }
 0x50f   : > { %4962 = vmatprep.subr.bf16.mxu0 %v5626_v0 }
 0x510   : > { %4999 = vmatpush1.bf16.msra.mxu1 %v4998_v13  ;;  %v1852_v13 = vrot.slane %v6266_v43, 1 }
 0x511   : > { %5024 = vmatprep.subr.bf16.mxu1 %v5626_v0 }
 0x512   : > { %4964 = vmatpush3.bf16.msra.mxu0 %v4963_v29  ;;  %v1998_v29 = vld [vmem:[#allocation2 + $0x1a8] sm:$0xff] }
 0x513   : > { %2124 = vmatmul.mubr.f32.vlgmr.msra.gmra.mrb[16].mxu1 %v6296_v16  ;;  %4965 = vmatprep.subr.bf16.mxu0 %v5626_v0  ;;  %v5001_v22 = vpack.c.bf16 %v1998_v29, %v1995_v42 }
 0x514   : > { %2129 = vmatprep.mubr.f32.mxu1 %v5627_v54  ;;  %5026 = vmatpush3.bf16.msra.mxu1 %v5936_v41 }
 0x515   : > { %5027 = vmatprep.subr.bf16.mxu1 %v5626_v0 }
 0x516   : > { %4967 = vmatpush3.bf16.msra.mxu0 %v4966_v44  ;;  %v2001_v44 = vld [vmem:[#allocation2 + $0x1c0] sm:$0xff] }
 0x517   : > { %2130 = vmatmul.mubr.f32.gmra.mrb[18].mxu1 %v6304_v14  ;;  %5000 = vmatprep.subr.bf16.mxu0 %v5626_v0 }
 0x518   : > { %5029 = vmatpush3.bf16.msra.mxu1 %v5946_v45  ;;  %2134 = vmatprep.mubr.f32.mxu1 %v5627_v54 }
 0x519   : > { %5030 = vmatprep.subr.bf16.mxu1 %v5626_v0 }
 0x51c   : > { %5032 = vmatpush3.bf16.msra.mxu1 %v5963_v48 }
 0x51d   : > { %5033 = vmatprep.subr.bf16.mxu1 %v5626_v0 }
 0x520   : > { %5035 = vmatpush3.bf16.msra.mxu1 %v5979_v1 }
 0x521   : > { %5036 = vmatprep.subr.bf16.mxu1 %v5626_v0 }
 0x524   : > { %5038 = vmatpush3.bf16.msra.mxu1 %v5995_v53 }
 0x525   : > { %5039 = vmatprep.subr.bf16.mxu1 %v5626_v0 }
 0x528   : > { %5041 = vmatpush3.bf16.msra.mxu1 %v6007_v57 }
 0x529   : > { %5042 = vmatprep.subr.bf16.mxu1 %v5626_v0 }
 0x52c   : > { %5044 = vmatpush3.bf16.msra.mxu1 %v6019_v60 }
 0x52d   : > { %5045 = vmatprep.subr.bf16.mxu1 %v5626_v0 }
 0x530   : > { %5047 = vmatpush3.bf16.msra.mxu1 %v6034_v63 }
 0x531   : > { %5072 = vmatprep.subr.bf16.mxu1 %v5626_v0 }
 0x5c1   : > { %v1738_v46 = vpop.f32.mrb[16].mxu0 }
 0x5c2   : > { %v4170_v2 = vpop.f32.mrb[17].mxu0 }
 0x5c6   : > { %v1821_v47 = vpop.f32.mrb[14].mxu1 }
 0x5c7   : > { %v1826_v50 = vsel %vm1825_vm4, -1e+30, %v1821_v47  ;;  %v4205_v51 = vpop.f32.mrb[15].mxu1  ;;  %v2007_v47 = vld [vmem:[#allocation2 + $0x1f0] sm:$0xff] }
 0x5c8   : > { %v1827_v52 = vrot.slane %v1826_v50, 4 }
 0x5ca   : > { %v1828_v55 = vmax.f32 %v1826_v50, %v1827_v52  ;;  %v2013_v52 = vld [vmem:[#allocation2 + $0x220] sm:$0xff] }
 0x5cc   : > { %v1829_v7 = vrot.slane %v1828_v55, 2 }
 0x5ce   : > { %v1830_v56 = vmax.f32 %v1828_v55, %v1829_v7  ;;  %v2016_v55 = vld [vmem:[#allocation2 + $0x238] sm:$0xff] }
 0x5cf   : > { %v5010_v7 = vpack.c.bf16 %v2016_v55, %v2013_v52 }
 0x5d0   : > { %v1831_v59 = vrot.slane %v1830_v56, 1 }
 0x5d2   : > { %v1832_v62 = vmax.f32 %v1830_v56, %v1831_v59  ;;  %v2019_v56 = vld [vmem:[#allocation2 + $0x250] sm:$0xff]  ;;  %v2022_v59 = vld [vmem:[#allocation2 + $0x268] sm:$0xff] }
 0x5d4   : > { %v1833_v27 = vmax.f32 %v1738_v46, %v1832_v62  ;;  %v5013_v62 = vpack.c.bf16 %v2022_v59, %v2019_v56 }
 0x5d6   : > { %v1834_v4 = vsub.f32 %v1738_v46, %v1833_v27  ;;  %v1840_v5 = vrot.slane %v1833_v27, %v5913_v30  ;;  %v2004_v46 = vld [vmem:[#allocation2 + $0x1d8] sm:$0xff]  ;;  %v2025_v27 = vld [vmem:[#allocation2 + $0x280] sm:$0xff] }
 0x5d7   : > { %v5004_v2 = vpack.c.bf16 %v2004_v46, %v2001_v44 }
 0x5d8   : > { %v1835_v6 = vmul.f32 1.442695, %v1834_v4  ;;  %v1841_v8 = vsub.f32 %v1826_v50, %v1840_v5  ;;  %v2010_v50 = vld [vmem:[#allocation2 + $0x208] sm:$0xff]  ;;  %v2028_v4 = vld [vmem:[#allocation2 + $0x298] sm:$0xff] }
 0x5d9   : > { %v5007_v51 = vpack.c.bf16 %v2010_v50, %v2007_v47  ;;  %v5016_v5 = vpack.c.bf16 %v2028_v4, %v2025_v27 }
 0x5da   : > { %5404 = vpow2.f32 %v1835_v6  ;;  %v1842_v9 = vmul.f32 1.442695, %v1841_v8  ;;  %v2031_v6 = vld [vmem:[#allocation2 + $0x2b0] sm:$0xff]  ;;  %v2034_v8 = vld [vmem:[#allocation2 + $0x2c8] sm:$0xff] }
 0x5dc   : > { %5406 = vpow2.f32 %v1842_v9  ;;  %v5019_v9 = vpack.c.bf16 %v2034_v8, %v2031_v6 }
 0x5e4   : > { %v5405_v18 = vpop.eup %5404 }
 0x5e5   : > { %v1854_v49 = vmul.f32 %v5405_v18, %v1852_v13  ;;  %v2037_v13 = vld [vmem:[#allocation2 + $0x2e0] sm:$0xff] }
 0x5e6   : > { %v5407_v15 = vpop.eup %5406  ;;  %v6334_v17 = vpop.f32.mrb[16].mxu1 }
 0x5e7   : > { %v6336_v19 = vpop.f32.mrb[17].mxu1  ;;  %v1844_v31 = vrot.slane %v5407_v15, 4  ;;  %v1860_v23 = vmul.f32 %v5407_v15, %v6272_v58 }
 0x5e9   : > { %v1845_v25 = vadd.f32 %v5407_v15, %v1844_v31  ;;  %v1861_v20 = vrot.slane %v1860_v23, 4  ;;  %v1886_v31 = vld [vmem:[%s6740_s16] sm:$0x1] }
 0x5ea   : > { %v2131_v32 = vpop.f32.mrb[18].mxu1 }
 0x5eb   : > { %v6339_v26 = vpop.f32.mrb[19].mxu1  ;;  %v1846_v28 = vrot.slane %v1845_v25, 2  ;;  %v1862_v34 = vadd.f32 %v1861_v20, %v1860_v23 }
 0x5ed   : > { %v1847_v35 = vadd.f32 %v1846_v28, %v1845_v25  ;;  %v1863_v36 = vrot.slane %v1862_v34, 2 }
 0x5ef   : > { %v1848_v43 = vrot.slane %v1847_v35, 1  ;;  %v1864_v37 = vadd.f32 %v1863_v36, %v1862_v34 }
 0x5f1   : > { %v1849_v38 = vadd.f32 %v1848_v43, %v1847_v35  ;;  %v1865_v24 = vrot.slane %v1864_v37, 1 }
 0x5f3   : > { %v1850_v39 = vadd.f32 %v5405_v18, %v1849_v38  ;;  %v1866_v40 = vadd.f32 %v1865_v24, %v1864_v37  ;;  %v2040_v18 = vld [vmem:[#allocation2 + $0x2f8] sm:$0xff] }
 0x5f5   : > { %v1867_v33 = vadd.f32 %v1866_v40, %v1854_v49  ;;  %5408 = vrcp.f32 %v1850_v39  ;;  %v5022_v49 = vpack.c.bf16 %v2040_v18, %v2037_v13  ;;  %v3445_v13 = vld [vmem:[%s6735_s11 + $0x80] sm:$0xff]  ;;  %v3446_v18 = vld [vmem:[%s6735_s11 + $0x88] sm:$0xff] }
 0x5ff   : > { %v5409_v58 = vpop.eup %5408 }
 0x600   : > { %v1869_v11 = vmul.f32 %v5409_v58, %v1867_v33 }
 0x602   : > { %4239 = vmatmul.mubr.f32.vlgmr.msra.gmra.mrb[18].mxu0 %v1869_v11 }
 0x603   : > { %5002 = vmatpush3.bf16.msra.mxu0 %v5001_v22  ;;  %4273 = vmatprep.mubr.msk.f32.mxu0 %vm5628_vm0, %v5627_v54 }
 0x604   : > { %5003 = vmatprep.subr.bf16.mxu0 %v5626_v0 }
 0x607   : > { %5005 = vmatpush3.bf16.msra.mxu0 %v5004_v2 }
 0x608   : > { %5006 = vmatprep.subr.bf16.mxu0 %v5626_v0 }
 0x60b   : > { %5008 = vmatpush3.bf16.msra.mxu0 %v5007_v51 }
 0x60c   : > { %5009 = vmatprep.subr.bf16.mxu0 %v5626_v0 }
 0x60f   : > { %5011 = vmatpush3.bf16.msra.mxu0 %v5010_v7 }
 0x610   : > { %5012 = vmatprep.subr.bf16.mxu0 %v5626_v0 }
 0x613   : > { %5014 = vmatpush3.bf16.msra.mxu0 %v5013_v62 }
 0x614   : > { %5015 = vmatprep.subr.bf16.mxu0 %v5626_v0 }
 0x617   : > { %5017 = vmatpush3.bf16.msra.mxu0 %v5016_v5 }
 0x618   : > { %5018 = vmatprep.subr.bf16.mxu0 %v5626_v0 }
 0x61b   : > { %5020 = vmatpush3.bf16.msra.mxu0 %v5019_v9 }
 0x61c   : > { %5021 = vmatprep.subr.bf16.mxu0 %v5626_v0 }
 0x61f   : > { %5023 = vmatpush3.bf16.msra.mxu0 %v5022_v49  ;;  %v5145_v49 = vpack.c.bf16 %v3446_v18, %v3445_v13  ;;  %v2768_v18 = vld [vmem:[#allocation5 + $0x1e8] sm:$0xff] }
 0x620   : > { %5048 = vmatprep.subr.bf16.mxu0 %v5626_v0 }
 0x622   : > { %4274 = vmatmul.mubr.f32.vlgmr.msra.gmra.mrb[20].mxu0 %v6296_v16  ;;  %v6376_v16 = vld [vmem:[%s6734_s10 + $0x3] sm:$0x7] }
 0x623   : > { %5050 = vmatpush3.bf16.msra.mxu0 %v5936_v41  ;;  %4276 = vmatprep.mubr.msk.f32.mxu0 %vm5628_vm0, %v5627_v54  ;;  %v2047_v23 = vrot.slane %v6376_v16, %v5913_v30 }
 0x624   : > { %5051 = vmatprep.subr.bf16.mxu0 %v5626_v0 }
 0x625   : > { %v6390_v35 = vadd.f32 %v6334_v17, %v2047_v23  ;;  %v3449_v23 = vld [vmem:[%s6735_s11 + $0xa0] sm:$0xff] }
 0x626   : > { %4277 = vmatmul.mubr.f32.gmra.mrb[22].mxu0 %v6304_v14  ;;  %v6380_v14 = vrot.slane %v6376_v16, %v6046_v3 }
 0x627   : > { %5053 = vmatpush3.bf16.msra.mxu0 %v5946_v45  ;;  %4279 = vmatprep.mubr.msk.f32.mxu0 %vm5628_vm0, %v5627_v54 }
 0x628   : > { %5054 = vmatprep.subr.bf16.mxu0 %v5626_v0  ;;  %v2128_v15 = vadd.f32 %v6336_v19, %v6380_v14  ;;  %v2133_v42 = vadd.f32 %v6339_v26, %v6380_v14 }
 0x62a   : > { %v2221_v20 = vrot.slane %v2128_v15, 7  ;;  %v2305_v38 = vmul.f32 %v2128_v15, %v6390_v35  ;;  %v2224_v40 = vrot.slane %v2128_v15, 1  ;;  %v2447_v58 = vmul.f32 %v2133_v42, %v6390_v35  ;;  %v3448_v15 = vld [vmem:[%s6735_s11 + $0x98] sm:$0xff]  ;;  %v3459_v42 = vld [vmem:[%s6735_s11 + $0xf0] sm:$0xff] }
 0x62b   : > { %5056 = vmatpush3.bf16.msra.mxu0 %v5963_v48 }
 0x62c   : > { %5057 = vmatprep.subr.bf16.mxu0 %v5626_v0  ;;  %v2223_v36 = vsel %vm925_vm1, 0.0, %v2221_v20  ;;  %v2226_v29 = vsel %vm929_vm2, %v2224_v40, 0.0  ;;  %v3458_v40 = vld [vmem:[%s6735_s11 + $0xe8] sm:$0xff] }
 0x62d   : > { %v2234_v17 = vmul.f32 %v2223_v36, %v6390_v35  ;;  %v2376_v22 = vmul.f32 %v2226_v29, %v6390_v35  ;;  %v3454_v36 = vld [vmem:[%s6735_s11 + $0xc8] sm:$0xff]  ;;  %v3460_v29 = vld [vmem:[%s6735_s11 + $0xf8] sm:$0xff] }
 0x62f   : > { %5059 = vmatpush3.bf16.msra.mxu0 %v5979_v1 }
 0x630   : > { %5060 = vmatprep.subr.bf16.mxu0 %v5626_v0 }
 0x633   : > { %5062 = vmatpush3.bf16.msra.mxu0 %v5995_v53 }
 0x634   : > { %5063 = vmatprep.subr.bf16.mxu0 %v5626_v0 }
 0x637   : > { %5065 = vmatpush3.bf16.msra.mxu0 %v6007_v57 }
 0x638   : > { %5066 = vmatprep.subr.bf16.mxu0 %v5626_v0 }
 0x63b   : > { %5068 = vmatpush3.bf16.msra.mxu0 %v6019_v60 }
 0x63c   : > { %5069 = vmatprep.subr.bf16.mxu0 %v5626_v0 }
 0x63f   : > { %5071 = vmatpush3.bf16.msra.mxu0 %v6034_v63 }
 0x640   : > { %5096 = vmatprep.subr.bf16.mxu0 %v5626_v0 }
 0x6d5   : > { %v1953_v25 = vpop.f32.mrb[18].mxu0 }
 0x6d6   : > { %v1954_v32 = vadd.f32 %v1953_v25, %v1886_v31  ;;  %v4240_v28 = vpop.f32.mrb[19].mxu0  ;;  %v3450_v25 = vld [vmem:[%s6735_s11 + $0xa8] sm:$0xff] }
 0x6d7   : > { %v5151_v20 = vpack.c.bf16 %v3450_v25, %v3449_v23  ;;  %v3452_v28 = vld [vmem:[%s6735_s11 + $0xb8] sm:$0xff] }
 0x6d8   : > { %vm1957_vm7 = vcmp.ge.f32.partialorder %v1954_v32, 0.0  ;;  %v1958_v34 = vmul.f32 0.01, %v1954_v32  ;;  %v2774_v25 = vld [vmem:[#allocation5 + $0x218] sm:$0xff] }
 0x6da   : > { %v6393_v43 = vsel %vm1957_vm7, %v1954_v32, %v1958_v34  ;;  %v3451_v32 = vld [vmem:[%s6735_s11 + $0xb0] sm:$0xff] }
 0x6db   : > { %2135 = vmatmul.mubr.f32.gmra.mrb[20].mxu1 %v6393_v43  ;;  %4280 = vmatmul.mubr.f32.gmra.mrb[24].mxu0 %v6393_v43  ;;  %v2729_v19 = vsel %vm925_vm1, %v6393_v43, 0.0  ;;  %v2733_v37 = vmul.f32 %v6393_v43, %v6393_v43  ;;  %v5154_v34 = vpack.c.bf16 %v3452_v28, %v3451_v32  ;;  %v2773_v32 = vld [vmem:[#allocation5 + $0x210] sm:$0xff] }
 0x6dc   : > { %2730 = vadd.xlane.f32.xlu0 %v2729_v19  ;;  %4314 = vmatprep.mubr.msk.f32.mxu1 %vm5628_vm0, %v5627_v54 }
 0x6dd   : > { %v2734_v24 = vsel %vm925_vm1, %v2733_v37, 0.0  ;;  %4349 = vmatprep.mubr.msk.f32.mxu0 %vm5628_vm0, %v5627_v54  ;;  %v3455_v37 = vld [vmem:[%s6735_s11 + $0xd0] sm:$0xff] }
 0x6de   : > { %2735 = vadd.xlane.f32.xlu1 %v2734_v24  ;;  %v3457_v24 = vld [vmem:[%s6735_s11 + $0xe0] sm:$0xff] }
 0x6df   : > { %4315 = vmatmul.mubr.f32.vlgmr.msra.gmra.mrb[22].mxu1 %v2234_v17  ;;  %4350 = vmatmul.mubr.f32.vlgmr.msra.gmra.mrb[26].mxu0 %v2305_v38  ;;  %v3456_v17 = vld [vmem:[%s6735_s11 + $0xd8] sm:$0xff] }
 0x6e0   : > { %5074 = vmatpush3.bf16.msra.mxu1 %v5936_v41  ;;  %5098 = vmatpush3.bf16.msra.mxu0 %v5936_v41  ;;  %v5160_v38 = vpack.c.bf16 %v3456_v17, %v3455_v37  ;;  %v2779_v37 = vld [vmem:[#allocation5 + $0x240] sm:$0xff] }
 0x6e1   : > { %5075 = vmatprep.subr.bf16.mxu1 %v5626_v0  ;;  %5099 = vmatprep.subr.bf16.mxu0 %v5626_v0 }
 0x6e2   : > { %4384 = vmatprep.mubr.msk.f32.mxu1 %vm5628_vm0, %v5627_v54  ;;  %4419 = vmatprep.mubr.msk.f32.mxu0 %vm5628_vm0, %v5627_v54 }
 0x6e4   : > { %5077 = vmatpush3.bf16.msra.mxu1 %v5946_v45  ;;  %5101 = vmatpush3.bf16.msra.mxu0 %v5946_v45 }
 0x6e5   : > { %5078 = vmatprep.subr.bf16.mxu1 %v5626_v0  ;;  %5102 = vmatprep.subr.bf16.mxu0 %v5626_v0 }
 0x6e8   : > { %5080 = vmatpush3.bf16.msra.mxu1 %v5963_v48  ;;  %5104 = vmatpush3.bf16.msra.mxu0 %v5963_v48 }
 0x6e9   : > { %5081 = vmatprep.subr.bf16.mxu1 %v5626_v0  ;;  %5105 = vmatprep.subr.bf16.mxu0 %v5626_v0 }
 0x6ec   : > { %5083 = vmatpush3.bf16.msra.mxu1 %v5979_v1  ;;  %5107 = vmatpush3.bf16.msra.mxu0 %v5979_v1 }
 0x6ed   : > { %5084 = vmatprep.subr.bf16.mxu1 %v5626_v0  ;;  %5108 = vmatprep.subr.bf16.mxu0 %v5626_v0 }
 0x6f0   : > { %5086 = vmatpush3.bf16.msra.mxu1 %v5995_v53  ;;  %5110 = vmatpush3.bf16.msra.mxu0 %v5995_v53 }
 0x6f1   : > { %5087 = vmatprep.subr.bf16.mxu1 %v5626_v0  ;;  %5111 = vmatprep.subr.bf16.mxu0 %v5626_v0 }
 0x6f4   : > { %5089 = vmatpush3.bf16.msra.mxu1 %v6007_v57  ;;  %5113 = vmatpush3.bf16.msra.mxu0 %v6007_v57 }
 0x6f5   : > { %v6434_v39 = vpop.f32.mrb[20].mxu0  ;;  %5090 = vmatprep.subr.bf16.mxu1 %v5626_v0  ;;  %5114 = vmatprep.subr.bf16.mxu0 %v5626_v0 }
 0x6f6   : > { %v4275_v33 = vpop.f32.mrb[21].mxu0 }
 0x6f7   : > { %v5163_v33 = vpack.c.bf16 %v3458_v40, %v3457_v24  ;;  %v2786_v40 = vld [vmem:[#allocation5 + $0x278] sm:$0xff] }
 0x6f8   : > { %5092 = vmatpush3.bf16.msra.mxu1 %v6019_v60  ;;  %5116 = vmatpush3.bf16.msra.mxu0 %v6019_v60 }
 0x6f9   : > { %5093 = vmatprep.subr.bf16.mxu1 %v5626_v0  ;;  %5117 = vmatprep.subr.bf16.mxu0 %v5626_v0  ;;  %v6450_v11 = vpop.f32.mrb[22].mxu0 }
 0x6fa   : > { %v4278_v26 = vpop.f32.mrb[23].mxu0 }
 0x6fb   : > { %v2759_v26 = vld [vmem:[#allocation5 + $0x1a0] sm:$0xff] }
 0x6fc   : > { %5095 = vmatpush3.bf16.msra.mxu1 %v6034_v63  ;;  %5119 = vmatpush3.bf16.msra.mxu0 %v6034_v63 }
 0x6fd   : > { %5120 = vmatprep.subr.bf16.mxu1 %v5626_v0  ;;  %5144 = vmatprep.subr.bf16.mxu0 %v5626_v0 }
 0x6ff   : > { %4385 = vmatmul.mubr.f32.vlgmr.msra.gmra.mrb[24].mxu1 %v2376_v22  ;;  %4420 = vmatmul.mubr.f32.vlgmr.msra.gmra.mrb[28].mxu0 %v2447_v58  ;;  %v5166_v58 = vpack.c.bf16 %v3460_v29, %v3459_v42  ;;  %v2756_v22 = vld [vmem:[#allocation5 + $0x188] sm:$0xff]  ;;  %v2785_v42 = vld [vmem:[#allocation5 + $0x270] sm:$0xff] }
 0x700   : > { %5122 = vmatpush3.bf16.msra.mxu1 %v5936_v41  ;;  %4454 = vmatprep.mubr.msk.f32.mxu1 %vm5628_vm0, %v5627_v54 }
 0x701   : > { %5123 = vmatprep.subr.bf16.mxu1 %v5626_v0  ;;  %4489 = vmatprep.mubr.msk.f32.mxu0 %vm5628_vm0, %v5627_v54 }
 0x702   : > { %5146 = vmatpush3.bf16.msra.mxu0 %v5145_v49  ;;  %v2771_v49 = vld [vmem:[#allocation5 + $0x200] sm:$0xff] }
 0x703   : > { %5147 = vmatprep.subr.bf16.mxu0 %v5626_v0 }
 0x704   : > { %5125 = vmatpush3.bf16.msra.mxu1 %v5946_v45 }
 0x705   : > { %5126 = vmatprep.subr.bf16.mxu1 %v5626_v0 }
 0x708   : > { %5128 = vmatpush3.bf16.msra.mxu1 %v5963_v48 }
 0x709   : > { %5129 = vmatprep.subr.bf16.mxu1 %v5626_v0 }
 0x70c   : > { %5131 = vmatpush3.bf16.msra.mxu1 %v5979_v1 }
 0x70d   : > { %5132 = vmatprep.subr.bf16.mxu1 %v5626_v0 }
 0x710   : > { %5134 = vmatpush3.bf16.msra.mxu1 %v5995_v53 }
 0x711   : > { %5135 = vmatprep.subr.bf16.mxu1 %v5626_v0 }
 0x714   : > { %5137 = vmatpush3.bf16.msra.mxu1 %v6007_v57 }
 0x715   : > { %5138 = vmatprep.subr.bf16.mxu1 %v5626_v0 }
 0x718   : > { %5140 = vmatpush3.bf16.msra.mxu1 %v6019_v60 }
 0x719   : > { %5141 = vmatprep.subr.bf16.mxu1 %v5626_v0 }
 0x71c   : > { %5143 = vmatpush3.bf16.msra.mxu1 %v6034_v63 }
 0x7ae   : > { %v2136_v44 = vpop.f32.mrb[20].mxu1  ;;  %v6472_v46 = vpop.f32.mrb[24].mxu0 }
 0x7af   : > { %v2137_v2 = vpop.f32.mrb[21].mxu1  ;;  %v4281_v47 = vpop.f32.mrb[25].mxu0  ;;  %v2755_v44 = vld [vmem:[#allocation5 + $0x180] sm:$0xff] }
 0x7b0   : > { %v2138_v50 = vadd.f32 %v2137_v2, %v6380_v14  ;;  %v3447_v14 = vld [vmem:[%s6735_s11 + $0x90] sm:$0xff]  ;;  %v5168_v2 = vpack.c.bf16 %v2759_v26, %v2756_v22  ;;  %v2758_v47 = vld [vmem:[#allocation5 + $0x198] sm:$0xff] }
 0x7b1   : > { %v5148_v31 = vpack.c.bf16 %v3448_v15, %v3447_v14  ;;  %v2767_v14 = vld [vmem:[#allocation5 + $0x1e0] sm:$0xff]  ;;  %v5176_v15 = vpack.c.bf16 %v2771_v49, %v2768_v18 }
 0x7b2   : > { %v2521_v51 = vrot.slane %v2138_v50, %v5913_v30  ;;  %v6476_v52 = vpop.f32.mrb[22].mxu1  ;;  %v6478_v55 = vpop.f32.mrb[26].mxu0  ;;  %v2757_v50 = vld [vmem:[#allocation5 + $0x190] sm:$0xff]  ;;  %5169 = vmatprep.subr.bf16.mxu1 %v5168_v2 }
 0x7b3   : > { %v2593_v7 = vmax.f32 %v6476_v52, %v6478_v55  ;;  %v4316_v56 = vpop.f32.mrb[23].mxu1  ;;  %v4351_v59 = vpop.f32.mrb[27].mxu0  ;;  %5149 = vmatpush3.bf16.msra.mxu0 %v5148_v31  ;;  %v2770_v31 = vld [vmem:[#allocation5 + $0x1f8] sm:$0xff] }
 0x7b4   : > { %v2522_v62 = vmul.f32 %v2521_v51, %v6390_v35  ;;  %5150 = vmatprep.subr.bf16.mxu0 %v5626_v0  ;;  %v3453_v35 = vld [vmem:[%s6735_s11 + $0xc0] sm:$0xff]  ;;  %v2760_v51 = vld [vmem:[#allocation5 + $0x1a8] sm:$0xff]  ;;  %v2762_v59 = vld [vmem:[#allocation5 + $0x1b8] sm:$0xff]  ;;  %v5178_v23 = vpack.c.bf16 %v2770_v31, %v2767_v14 }
 0x7b5   : > { %v5157_v19 = vpack.c.bf16 %v3454_v36, %v3453_v35  ;;  %v6547_v56 = vpack.c.bf16 %v2760_v51, %v2757_v50  ;;  %v2780_v36 = vld [vmem:[#allocation5 + $0x248] sm:$0xff] }
 0x7b6   : > { %4455 = vmatmul.mubr.f32.vlgmr.msra.gmra.mrb[26].mxu1 %v2522_v62  ;;  %v2765_v62 = vld [vmem:[#allocation5 + $0x1d0] sm:$0xff] }
 0x7b7   : > { %2885 = vmatprep.mubr.f32.mxu1 %v5627_v54  ;;  %5152 = vmatpush3.bf16.msra.mxu0 %v5151_v20  ;;  %v2777_v20 = vld [vmem:[#allocation5 + $0x230] sm:$0xff] }
 0x7b8   : > { %5153 = vmatprep.subr.bf16.mxu0 %v5626_v0  ;;  %v5180_v28 = vpack.c.bf16 %v2777_v20, %v2774_v25 }
 0x7bb   : > { %5155 = vmatpush3.bf16.msra.mxu0 %v5154_v34  ;;  %v2776_v34 = vld [vmem:[#allocation5 + $0x228] sm:$0xff] }
 0x7bc   : > { %5156 = vmatprep.subr.bf16.mxu0 %v5626_v0  ;;  %v5182_v35 = vpack.c.bf16 %v2776_v34, %v2773_v32 }
 0x7bf   : > { %5158 = vmatpush3.bf16.msra.mxu0 %v5157_v19  ;;  %v2783_v19 = vld [vmem:[#allocation5 + $0x260] sm:$0xff] }
 0x7c0   : > { %5159 = vmatprep.subr.bf16.mxu0 %v5626_v0  ;;  %v5184_v17 = vpack.c.bf16 %v2783_v19, %v2780_v36 }
 0x7c3   : > { %5161 = vmatpush3.bf16.msra.mxu0 %v5160_v38  ;;  %v2782_v38 = vld [vmem:[#allocation5 + $0x258] sm:$0xff] }
 0x7c4   : > { %5162 = vmatprep.subr.bf16.mxu0 %v5626_v0  ;;  %v5186_v24 = vpack.c.bf16 %v2782_v38, %v2779_v37 }
 0x7c7   : > { %5164 = vmatpush3.bf16.msra.mxu0 %v5163_v33  ;;  %v2789_v33 = vld [vmem:[#allocation5 + $0x290] sm:$0xff] }
 0x7c8   : > { %5165 = vmatprep.subr.bf16.mxu0 %v5626_v0  ;;  %v5188_v29 = vpack.c.bf16 %v2789_v33, %v2786_v40  ;;  %v2763_v33 = vld [vmem:[#allocation5 + $0x1c0] sm:$0xff] }
 0x7cb   : > { %5167 = vmatpush3.bf16.msra.mxu0 %v5166_v58  ;;  %v2788_v58 = vld [vmem:[#allocation5 + $0x288] sm:$0xff] }
 0x7cc   : > { %5201 = vmatprep.subr.bf16.mxu0 %v6547_v56  ;;  %v5190_v22 = vpack.c.bf16 %v2788_v58, %v2785_v42  ;;  %v2766_v42 = vld [vmem:[#allocation5 + $0x1d8] sm:$0xff] }
 0x7cd   : > { %v5204_v58 = vpack.c.bf16 %v2766_v42, %v2763_v33 }
 0x7d2   : > { %v6484_v27 = vpop.f32.mrb[24].mxu1  ;;  %v6486_v4 = vpop.f32.mrb[28].mxu0 }
 0x7d3   : > { %v2594_v5 = vmax.f32 %v6484_v27, %v6486_v4  ;;  %v4386_v6 = vpop.f32.mrb[25].mxu1  ;;  %v4421_v8 = vpop.f32.mrb[29].mxu0 }
 0x7d4   : > { %v5172_v6 = vpack.c.bf16 %v2765_v62, %v2762_v59  ;;  %v2764_v8 = vld [vmem:[#allocation5 + $0x1c8] sm:$0xff]  ;;  %v2055_v62 = vrot.slane %v6376_v16, %v6184_v21 }
 0x7d5   : > { %v6490_v9 = vmax.f32 %v2593_v7, %v2594_v5  ;;  %v5170_v7 = vpack.c.bf16 %v2758_v47, %v2755_v44  ;;  %v2761_v5 = vld [vmem:[#allocation5 + $0x1b0] sm:$0xff] }
 0x7d6   : > { %v5174_v13 = vpack.c.bf16 %v2764_v8, %v2761_v5 }
 0x7d7   : > { %5171 = vmatpush1.bf16.msra.mxu1 %v5170_v7 }
 0x7d8   : > { %5173 = vmatprep.subr.bf16.mxu1 %v5172_v6 }
 0x7db   : > { %5175 = vmatpush1.bf16.msra.mxu1 %v5174_v13 }
 0x7dc   : > { %5177 = vmatprep.subr.bf16.mxu1 %v5176_v15 }
 0x7df   : > { %5179 = vmatpush1.bf16.msra.mxu1 %v5178_v23  ;;  %v2212_v23 = vadd.f32 %v6450_v11, %v2055_v62 }
 0x7e0   : > { %5181 = vmatprep.subr.bf16.mxu1 %v5180_v28 }
 0x7e3   : > { %5183 = vmatpush1.bf16.msra.mxu1 %v5182_v35 }
 0x7e4   : > { %5185 = vmatprep.subr.bf16.mxu1 %v5184_v17 }
 0x7e7   : > { %5187 = vmatpush1.bf16.msra.mxu1 %v5186_v24 }
 0x7e8   : > { %5189 = vmatprep.subr.bf16.mxu1 %v5188_v29 }
 0x7eb   : > { %5191 = vmatpush1.bf16.msra.mxu1 %v5190_v22  ;;  %v2769_v22 = vld [vmem:[#allocation5 + $0x1f0] sm:$0xff] }
 0x889   : > { %v2589_v26 = vpop.f32.mrb[26].mxu1 }
 0x88a   : > { %v2596_v44 = vmax.f32 %v6490_v9, %v2589_v26  ;;  %v4456_v2 = vpop.f32.mrb[27].mxu1  ;;  %v2207_v9 = vadd.f32 %v6434_v39, %v2055_v62 }
 0x88b   : > { %v2775_v2 = vld [vmem:[#allocation5 + $0x220] sm:$0xff] }
 0x88c   : > { %v2597_v47 = vsub.f32 %v6476_v52, %v2596_v44  ;;  %v2600_v50 = vsub.f32 %v6478_v55, %v2596_v44  ;;  %v2603_v51 = vsub.f32 %v6484_v27, %v2596_v44  ;;  %v2606_v7 = vsub.f32 %v6486_v4, %v2596_v44 }
 0x88d   : > { %v2609_v59 = vsub.f32 %v2589_v26, %v2596_v44  ;;  %v2228_v52 = vrot.slane %v2207_v9, 7  ;;  %v2231_v55 = vrot.slane %v2207_v9, 1  ;;  %v2217_v27 = vadd.f32 %v6472_v46, %v2055_v62  ;;  %v2772_v26 = vld [vmem:[#allocation5 + $0x208] sm:$0xff]  ;;  %v2787_v62 = vld [vmem:[#allocation5 + $0x280] sm:$0xff] }
 0x88e   : > { %v2598_v5 = vmul.f32 1.442695, %v2597_v47  ;;  %v2601_v6 = vmul.f32 1.442695, %v2600_v50  ;;  %v2604_v8 = vmul.f32 1.442695, %v2603_v51  ;;  %v5208_v44 = vpack.c.bf16 %v2772_v26, %v2769_v22 }
 0x88f   : > { %v2607_v13 = vmul.f32 1.442695, %v2606_v7  ;;  %v2610_v18 = vmul.f32 1.442695, %v2609_v59  ;;  %v2230_v49 = vsel %vm925_vm1, 0.0, %v2228_v52  ;;  %v2233_v31 = vsel %vm929_vm2, %v2231_v55, 0.0 }
 0x890   : > { %5410 = vpow2.f32 %v2598_v5  ;;  %v2627_v32 = vrot.slane %v2217_v27, %v5913_v30  ;;  %v2778_v47 = vld [vmem:[#allocation5 + $0x238] sm:$0xff]  ;;  %v2781_v51 = vld [vmem:[#allocation5 + $0x250] sm:$0xff]  ;;  %v2784_v7 = vld [vmem:[#allocation5 + $0x268] sm:$0xff]  ;;  %v2747_v26 = vrot.slane %v6393_v43, 7 }
 0x891   : > { %5412 = vpow2.f32 %v2601_v6  ;;  %v5212_v50 = vpack.c.bf16 %v2778_v47, %v2775_v2  ;;  %v5216_v59 = vpack.c.bf16 %v2784_v7, %v2781_v51  ;;  %v2790_v5 = vld [vmem:[#allocation5 + $0x298] sm:$0xff]  ;;  %v2793_v52 = vld [vmem:[#allocation5 + $0x2b0] sm:$0xff]  ;;  %v2796_v27 = vld [vmem:[#allocation5 + $0x2c8] sm:$0xff] }
 0x892   : > { %5414 = vpow2.f32 %v2604_v8  ;;  %v5220_v6 = vpack.c.bf16 %v2790_v5, %v2787_v62  ;;  %v2795_v8 = vld [vmem:[#allocation5 + $0x2c0] sm:$0xff] }
 0x893   : > { %5416 = vpow2.f32 %v2607_v13 }
 0x894   : > { %5418 = vpow2.f32 %v2610_v18  ;;  %v2791_v18 = vld [vmem:[#allocation5 + $0x2a0] sm:$0xff] }
 0x89a   : > { %v5411_v4 = vpop.eup %5410 }
 0x89b   : > { %v5413_v16 = vpop.eup %5412  ;;  %v2617_v14 = vmul.f32 %v5411_v4, %v2230_v49  ;;  %v2798_v49 = vld [vmem:[#allocation5 + $0x2d8] sm:$0xff] }
 0x89c   : > { %v5415_v15 = vpop.eup %5414  ;;  %v2612_v25 = vadd.f32 %v5413_v16, %v5411_v4  ;;  %v2618_v20 = vmul.f32 %v5413_v16, %v2207_v9  ;;  %v2794_v9 = vld [vmem:[#allocation5 + $0x2b8] sm:$0xff]  ;;  %v5224_v4 = vpack.c.bf16 %v2796_v27, %v2793_v52  ;;  %v2801_v16 = vld [vmem:[#allocation5 + $0x2f0] sm:$0xff]  ;;  %v3173_v27 = vld [vmem:[#allocation7 + $0x80] sm:$0xff] }
 0x89d   : > { %v5417_v39 = vpop.eup %5416  ;;  %v2620_v28 = vmul.f32 %v5415_v15, %v2233_v31  ;;  %v5194_v55 = vpack.c.bf16 %v2794_v9, %v2791_v18  ;;  %v2800_v31 = vld [vmem:[#allocation5 + $0x2e8] sm:$0xff] }
 0x89e   : > { %v5419_v34 = vpop.eup %5418  ;;  %v2613_v35 = vadd.f32 %v5415_v15, %v2612_v25  ;;  %v2619_v36 = vadd.f32 %v2618_v20, %v2617_v14  ;;  %v2622_v46 = vmul.f32 %v5417_v39, %v2212_v23  ;;  %v5196_v14 = vpack.c.bf16 %v2801_v16, %v2798_v49  ;;  %v2797_v15 = vld [vmem:[#allocation5 + $0x2d0] sm:$0xff]  ;;  %v2799_v23 = vld [vmem:[#allocation5 + $0x2e0] sm:$0xff]  ;;  %v2802_v20 = vld [vmem:[#allocation5 + $0x2f8] sm:$0xff] }
 0x89f   : > { %v2628_v19 = vmul.f32 %v5419_v34, %v2627_v32  ;;  %v5198_v25 = vpack.c.bf16 %v2800_v31, %v2797_v15  ;;  %v2731_v32 = vpop.xlane.xlu0 %2730  ;;  %v3175_v49 = vld [vmem:[#allocation7 + $0x90] sm:$0xff]  ;;  %v3177_v31 = vld [vmem:[#allocation7 + $0xa0] sm:$0xff] }
 0x8a0   : > { %v2614_v37 = vadd.f32 %v5417_v39, %v2613_v35  ;;  %v2621_v17 = vadd.f32 %v2620_v28, %v2619_v36  ;;  %v5228_v39 = vpack.c.bf16 %v2802_v20, %v2799_v23  ;;  %v2732_v28 = vmul.f32 0.03125, %v2731_v32  ;;  %v3178_v23 = vld [vmem:[#allocation7 + $0xa8] sm:$0xff]  ;;  %v3180_v20 = vld [vmem:[#allocation7 + $0xb8] sm:$0xff]  ;;  %v3181_v32 = vld [vmem:[#allocation7 + $0xc0] sm:$0xff] }
 0x8a2   : > { %v2615_v38 = vadd.f32 %v5419_v34, %v2614_v37  ;;  %v2623_v24 = vadd.f32 %v2622_v46, %v2621_v17  ;;  %v2736_v34 = vpop.xlane.xlu1 %2735  ;;  %v2739_v35 = vmul.f32 %v2732_v28, %v2732_v28  ;;  %v2738_v17 = vsub.f32 %v6393_v43, %v2732_v28  ;;  %v3182_v28 = vld [vmem:[#allocation7 + $0xc8] sm:$0xff] }
 0x8a3   : > { %v2737_v36 = vmul.f32 0.03125, %v2736_v34  ;;  %v5293_v34 = vpack.c.bf16 %v3182_v28, %v3181_v32 }
 0x8a4   : > { %5420 = vrcp.f32 %v2615_v38  ;;  %v2629_v40 = vadd.f32 %v2628_v19, %v2623_v24  ;;  %v3462_v24 = vld [vmem:[%s6736_s12 + $0x1] ss:$0 sm:$0xff] }
 0x8a5   : > { %v2740_v46 = vsub.f32 %v2737_v36, %v2739_v35  ;;  %v3183_v35 = vld [vmem:[#allocation7 + $0xd0] sm:$0xff]  ;;  %v3184_v36 = vld [vmem:[#allocation7 + $0xd8] sm:$0xff] }
 0x8a7   : > { %v2741_v19 = vadd.f32 1e-06, %v2740_v46  ;;  %v5296_v46 = vpack.c.bf16 %v3184_v36, %v3183_v35 }
 0x8a9   : > { %5422 = vrsqrt.f32 %v2741_v19  ;;  %v3185_v19 = vld [vmem:[#allocation7 + $0xe0] sm:$0xff] }
 0x8ae   : > { %v5421_v11 = vpop.eup %5420 }
 0x8af   : > { %v2630_v29 = vmul.f32 %v5421_v11, %v2629_v40 }
 0x8b1   : > { %4490 = vmatmul.mubr.f32.vlgmr.msra.gmra.mrb[30].mxu0 %v2630_v29 }
 0x8b2   : > { %5203 = vmatpush3.bf16.msra.mxu0 %v6547_v56  ;;  %v2792_v56 = vld [vmem:[#allocation5 + $0x2a8] sm:$0xff] }
 0x8b3   : > { %5205 = vmatprep.subr.bf16.mxu0 %v5204_v58  ;;  %v5192_v13 = vpack.c.bf16 %v2795_v8, %v2792_v56  ;;  %v5423_v37 = vpop.eup %5422 }
 0x8b4   : > { %v2743_v38 = vmul.f32 %v5423_v37, %v2738_v17  ;;  %v3186_v37 = vld [vmem:[#allocation7 + $0xe8] sm:$0xff] }
 0x8b5   : > { %5193 = vmatprep.subr.bf16.mxu1 %v5192_v13  ;;  %v5299_v17 = vpack.c.bf16 %v3186_v37, %v3185_v19 }
 0x8b6   : > { %5207 = vmatpush3.bf16.msra.mxu0 %v5204_v58  ;;  %5195 = vmatpush1.bf16.msra.mxu1 %v5194_v55  ;;  %v2744_v40 = vmul.f32 %v6283_v61, %v2743_v38  ;;  %v3187_v38 = vld [vmem:[#allocation7 + $0xf0] sm:$0xff] }
 0x8b7   : > { %5209 = vmatprep.subr.bf16.mxu0 %v5208_v44  ;;  %5197 = vmatprep.subr.bf16.mxu1 %v5196_v14  ;;  %v3176_v14 = vld [vmem:[#allocation7 + $0x98] sm:$0xff] }
 0x8b8   : > { %v2745_v58 = vadd.f32 %v6292_v10, %v2744_v40  ;;  %v5284_v15 = vpack.c.bf16 %v3176_v14, %v3175_v49 }
 0x8ba   : > { %5211 = vmatpush3.bf16.msra.mxu0 %v5208_v44  ;;  %5199 = vmatpush1.bf16.msra.mxu1 %v5198_v25  ;;  %v2752_v47 = vsel %vm925_vm1, %v2745_v58, %v2747_v26  ;;  %v5287_v25 = vpack.c.bf16 %v3178_v23, %v3177_v31 }
 0x8bb   : > { %5213 = vmatprep.subr.bf16.mxu0 %v5212_v50  ;;  %5232 = vmatprep.subr.bf16.mxu1 %v5626_v0 }
 0x8be   : > { %5215 = vmatpush3.bf16.msra.mxu0 %v5212_v50 }
 0x8bf   : > { %5217 = vmatprep.subr.bf16.mxu0 %v5216_v59 }
 0x8c2   : > { %5219 = vmatpush3.bf16.msra.mxu0 %v5216_v59 }
 0x8c3   : > { %5221 = vmatprep.subr.bf16.mxu0 %v5220_v6 }
 0x8c6   : > { %5223 = vmatpush3.bf16.msra.mxu0 %v5220_v6 }
 0x8c7   : > { %5225 = vmatprep.subr.bf16.mxu0 %v5224_v4 }
 0x8ca   : > { %5227 = vmatpush3.bf16.msra.mxu0 %v5224_v4  ;;  %v3174_v4 = vld [vmem:[#allocation7 + $0x88] sm:$0xff] }
 0x8cb   : > { %5229 = vmatprep.subr.bf16.mxu0 %v5228_v39  ;;  %v5281_v16 = vpack.c.bf16 %v3174_v4, %v3173_v27 }
 0x8ce   : > { %5231 = vmatpush3.bf16.msra.mxu0 %v5228_v39 }
 0x8cf   : > { %5256 = vmatprep.subr.bf16.mxu0 %v5626_v0 }
 0x984   : > { %v2722_v33 = vpop.f32.mrb[30].mxu0 }
 0x985   : > { %v2723_v42 = vadd.f32 %v3462_v24, %v2722_v33  ;;  %v4491_v11 = vpop.f32.mrb[31].mxu0  ;;  %v3188_v24 = vld [vmem:[#allocation7 + $0xf8] sm:$0xff] }
 0x986   : > { %v5302_v40 = vpack.c.bf16 %v3188_v24, %v3187_v38 }
 0x987   : > { %vm2726_vm8 = vcmp.ge.f32.partialorder %v2723_v42, 0.0  ;;  %v2727_v29 = vmul.f32 0.01, %v2723_v42 }
 0x989   : > { %v2728_v22 = vsel %vm2726_vm8, %v2723_v42, %v2727_v29 }
 0x98a   : > { %v2750_v44 = vrot.slane %v2728_v22, 6  ;;  %v3264_v2 = vsel %vm1825_vm4, 0.0, %v2728_v22 }
 0x98b   : > { %3265 = vst [vmem:[%s6580_s28] sm:$0xff] %v3264_v2 }
 0x98c   : > { %v2753_v61 = vsel %vm1450_vm5, %v2752_v47, %v2750_v44 }
 0x98d   : > { %2886 = vmatmul.mubr.f32.vlgmr.msra.gmra.mrb[28].mxu1 %v2753_v61  ;;  %4524 = vmatprep.mubr.f32.mxu0 %v2753_v61 }
 0x98e   : > { %4525 = vmatmul.mubr.f32.vlgmr.msra.gmra.mrb[32].mxu0 %v2750_v44  ;;  %2891 = vmatprep.mubr.f32.mxu1 %v5627_v54 }
 0x98f   : > { %5234 = vmatpush3.bf16.msra.mxu1 %v5936_v41  ;;  %5258 = vmatpush3.bf16.msra.mxu0 %v5936_v41  ;;  %v3463_v41 = vld [vmem:[%s6738_s14 + $0x3] sm:$0x7] }
 0x990   : > { %5235 = vmatprep.subr.bf16.mxu1 %v5626_v0  ;;  %5259 = vmatprep.subr.bf16.mxu0 %v5626_v0 }
 0x991   : > { %2892 = vmatmul.mubr.f32.gmra.mrb[30].mxu1 %v2750_v44  ;;  %4594 = vmatprep.mubr.msk.f32.mxu0 %vm5628_vm0, %v5627_v54 }
 0x992   : > { %4559 = vmatprep.mubr.msk.f32.mxu1 %vm5628_vm0, %v5627_v54 }
 0x993   : > { %5237 = vmatpush3.bf16.msra.mxu1 %v5946_v45  ;;  %5261 = vmatpush3.bf16.msra.mxu0 %v5946_v45  ;;  %v2809_v45 = vrot.slane %v3463_v41, %v5913_v30 }
 0x994   : > { %5238 = vmatprep.subr.bf16.mxu1 %v5626_v0  ;;  %5262 = vmatprep.subr.bf16.mxu0 %v5626_v0 }
 0x997   : > { %5240 = vmatpush3.bf16.msra.mxu1 %v5963_v48  ;;  %5264 = vmatpush3.bf16.msra.mxu0 %v5963_v48  ;;  %v2813_v48 = vrot.slane %v3463_v41, %v6046_v3 }
 0x998   : > { %5241 = vmatprep.subr.bf16.mxu1 %v5626_v0  ;;  %5265 = vmatprep.subr.bf16.mxu0 %v5626_v0 }
 0x99b   : > { %5243 = vmatpush3.bf16.msra.mxu1 %v5979_v1  ;;  %5267 = vmatpush3.bf16.msra.mxu0 %v5979_v1  ;;  %v2817_v1 = vrot.slane %v3463_v41, %v6184_v21 }
 0x99c   : > { %5244 = vmatprep.subr.bf16.mxu1 %v5626_v0  ;;  %5268 = vmatprep.subr.bf16.mxu0 %v5626_v0 }
 0x99f   : > { %5246 = vmatpush3.bf16.msra.mxu1 %v5995_v53  ;;  %5270 = vmatpush3.bf16.msra.mxu0 %v5995_v53 }
 0x9a0   : > { %5247 = vmatprep.subr.bf16.mxu1 %v5626_v0  ;;  %5271 = vmatprep.subr.bf16.mxu0 %v5626_v0 }
 0x9a3   : > { %5249 = vmatpush3.bf16.msra.mxu1 %v6007_v57  ;;  %5273 = vmatpush3.bf16.msra.mxu0 %v6007_v57 }
 0x9a4   : > { %5250 = vmatprep.subr.bf16.mxu1 %v5626_v0  ;;  %5274 = vmatprep.subr.bf16.mxu0 %v5626_v0 }
 0x9a7   : > { %5252 = vmatpush3.bf16.msra.mxu1 %v6019_v60  ;;  %5276 = vmatpush3.bf16.msra.mxu0 %v6019_v60 }
 0x9a8   : > { %5253 = vmatprep.subr.bf16.mxu1 %v5626_v0  ;;  %5277 = vmatprep.subr.bf16.mxu0 %v5626_v0 }
 0x9ab   : > { %5255 = vmatpush3.bf16.msra.mxu1 %v6034_v63  ;;  %5279 = vmatpush3.bf16.msra.mxu0 %v6034_v63 }
 0x9ac   : > { %5280 = vmatprep.subr.bf16.mxu1 %v5626_v0 }
 0xa60   : > { %v2887_v53 = vpop.f32.mrb[28].mxu1 }
 0xa61   : > { %v2888_v57 = vadd.f32 %v2887_v53, %v2809_v45  ;;  %v2889_v60 = vpop.f32.mrb[29].mxu1  ;;  %v4526_v10 = vpop.f32.mrb[32].mxu0 }
 0xa62   : > { %v2890_v43 = vadd.f32 %v2889_v60, %v2813_v48  ;;  %v2969_v50 = vadd.f32 %v4526_v10, %v2817_v1  ;;  %v2963_v51 = vpop.f32.mrb[33].mxu0 }
 0xa63   : > { %v3049_v63 = vrot.slane %v2888_v57, %v5913_v30  ;;  %v6627_v7 = vadd.f32 %v2963_v51, %v2817_v1 }
 0xa64   : > { %v2973_v59 = vrot.slane %v2890_v43, 1  ;;  %v3159_v62 = vrot.slane %v2969_v50, 2  ;;  %v2893_v5 = vpop.f32.mrb[30].mxu1 }
 0xa65   : > { %v3050_v6 = vmul.f32 %v3049_v63, %v2890_v43  ;;  %v3158_v56 = vrot.slane %v6627_v7, 2  ;;  %v2894_v3 = vpop.f32.mrb[31].mxu1 }
 0xa66   : > { %v2975_v8 = vmul.f32 %v2973_v59, %v2888_v57  ;;  %v2895_v21 = vadd.f32 %v2894_v3, %v2813_v48  ;;  %v3154_v57 = vrot.slane %v6627_v7, 1 }
 0xa67   : > { %v6631_v13 = vsel %vm1750_vm6, %v3158_v56, %v3159_v62  ;;  %v3054_v9 = vrot.slane %v3050_v6, 2 }
 0xa68   : > { %v3051_v18 = vmul.f32 %v3049_v63, %v2895_v21  ;;  %4560 = vmatmul.mubr.f32.vlgmr.msra.gmra.mrb[32].mxu1 %v2975_v8 }
 0xa69   : > { %4629 = vmatprep.mubr.msk.f32.mxu1 %vm5628_vm0, %v5627_v54  ;;  %5282 = vmatpush3.bf16.msra.mxu1 %v5281_v16  ;;  %v3179_v54 = vld [vmem:[#allocation7 + $0xb0] sm:$0xff] }
 0xa6a   : > { %v3055_v52 = vrot.slane %v3051_v18, 2  ;;  %5283 = vmatprep.subr.bf16.mxu1 %v5626_v0  ;;  %v5290_v39 = vpack.c.bf16 %v3180_v20, %v3179_v54 }
 0xa6c   : > { %v3056_v55 = vsel %vm1750_vm6, %v3054_v9, %v3055_v52 }
 0xa6d   : > { %4595 = vmatmul.mubr.f32.vlgmr.msra.gmra.mrb[34].mxu0 %v3056_v55  ;;  %5285 = vmatpush3.bf16.msra.mxu1 %v5284_v15 }
 0xa6e   : > { %5286 = vmatprep.subr.bf16.mxu1 %v5626_v0 }
 0xa71   : > { %5288 = vmatpush3.bf16.msra.mxu1 %v5287_v25 }
 0xa72   : > { %5289 = vmatprep.subr.bf16.mxu1 %v5626_v0 }
 0xa75   : > { %5291 = vmatpush3.bf16.msra.mxu1 %v5290_v39 }
 0xa76   : > { %5292 = vmatprep.subr.bf16.mxu1 %v5626_v0 }
 0xa79   : > { %5294 = vmatpush3.bf16.msra.mxu1 %v5293_v34 }
 0xa7a   : > { %5295 = vmatprep.subr.bf16.mxu1 %v5626_v0 }
 0xa7d   : > { %5297 = vmatpush3.bf16.msra.mxu1 %v5296_v46 }
 0xa7e   : > { %5298 = vmatprep.subr.bf16.mxu1 %v5626_v0 }
 0xa81   : > { %5300 = vmatpush3.bf16.msra.mxu1 %v5299_v17 }
 0xa82   : > { %5301 = vmatprep.subr.bf16.mxu1 %v5626_v0 }
 0xa85   : > { %5303 = vmatpush3.bf16.msra.mxu1 %v5302_v40 }
 0xb3b   : > { %v3042_v33 = vpop.f32.mrb[32].mxu1 }
 0xb3c   : > { %v4561_v42 = vpop.f32.mrb[33].mxu1 }
 0xb40   : > { %v3124_v11 = vpop.f32.mrb[34].mxu0 }
 0xb41   : > { %v3128_v29 = vsel %vm1825_vm4, -1e+30, %v3124_v11  ;;  %v4596_v58 = vpop.f32.mrb[35].mxu0 }
 0xb42   : > { %v3129_v22 = vrot.slane %v3128_v29, 4 }
 0xb44   : > { %v3130_v26 = vmax.f32 %v3128_v29, %v3129_v22 }
 0xb46   : > { %v3131_v44 = vrot.slane %v3130_v26, 2 }
 0xb48   : > { %v3132_v2 = vmax.f32 %v3130_v26, %v3131_v44 }
 0xb4a   : > { %v3133_v47 = vrot.slane %v3132_v2, 1 }
 0xb4c   : > { %v3134_v61 = vmax.f32 %v3132_v2, %v3133_v47 }
 0xb4e   : > { %v3135_v41 = vmax.f32 %v3042_v33, %v3134_v61 }
 0xb50   : > { %v3136_v45 = vsub.f32 %v3042_v33, %v3135_v41  ;;  %v3142_v48 = vrot.slane %v3135_v41, %v5913_v30 }
 0xb52   : > { %v3137_v1 = vmul.f32 1.442695, %v3136_v45  ;;  %v3143_v0 = vsub.f32 %v3128_v29, %v3142_v48 }
 0xb54   : > { %5424 = vpow2.f32 %v3137_v1  ;;  %v3144_v53 = vmul.f32 1.442695, %v3143_v0 }
 0xb56   : > { %5426 = vpow2.f32 %v3144_v53 }
 0xb5e   : > { %v5425_v12 = vpop.eup %5424 }
 0xb5f   : > { %v3156_v60 = vmul.f32 %v5425_v12, %v3154_v57 }
 0xb60   : > { %v5427_v10 = vpop.eup %5426 }
 0xb61   : > { %v3146_v43 = vrot.slane %v5427_v10, 4  ;;  %v3162_v50 = vmul.f32 %v5427_v10, %v6631_v13 }
 0xb63   : > { %v3147_v51 = vadd.f32 %v5427_v10, %v3146_v43  ;;  %v3163_v63 = vrot.slane %v3162_v50, 4 }
 0xb65   : > { %v3148_v59 = vrot.slane %v3147_v51, 2  ;;  %v3164_v62 = vadd.f32 %v3163_v63, %v3162_v50 }
 0xb67   : > { %v3149_v30 = vadd.f32 %v3148_v59, %v3147_v51  ;;  %v3165_v5 = vrot.slane %v3164_v62, 2 }
 0xb69   : > { %v3150_v6 = vrot.slane %v3149_v30, 1  ;;  %v3166_v56 = vadd.f32 %v3165_v5, %v3164_v62 }
 0xb6b   : > { %v3151_v3 = vadd.f32 %v3150_v6, %v3149_v30  ;;  %v3167_v7 = vrot.slane %v3166_v56, 1 }
 0xb6d   : > { %v3152_v8 = vadd.f32 %v5425_v12, %v3151_v3  ;;  %v3168_v21 = vadd.f32 %v3167_v7, %v3166_v56 }
 0xb6f   : > { %v3169_v18 = vadd.f32 %v3168_v21, %v3156_v60  ;;  %5428 = vrcp.f32 %v3152_v8 }
 0xb79   : > { %v5429_v9 = vpop.eup %5428 }
 0xb7a   : > { %v3171_v13 = vmul.f32 %v5429_v9, %v3169_v18 }
 0xb7c   : > { %4630 = vmatmul.mubr.f32.vlgmr.msra.gmra.mrb[34].mxu1 %v3171_v13 }
 0xb7d   : > { %5528 = shalt.err (!%p5525_p9)
}
 0xb7e   : > { %s5529_s0 = scalar_lea.hbm %s6652_s21, 128  ;;  %s5533_s20 = scalar_lea.hbm %s6776_s19, 256 }
 0xb7f   : > { %p5530_p2 = scmp.ne.s32.totalorder %s6652_s21, %s5529_s0  ;;  %p5534_p5 = scmp.lt.u32.totalorder %s6652_s21, %s6776_s19 }
 0xb80   : > { %p5535_p10 = scmp.lt.u32.totalorder %s5533_s20, %s5529_s0  ;;  %p5537_p12 = scmp.lt.u32.totalorder %s5529_s0, %s6652_s21 }
 0xb81   : > { %p5531_p3 = pnand %p5530_p2, %p6777_p7 }
 0xb82   : > { %p5536_p4 = por %p5535_p10, %p5534_p5 }
 0xb83   : > { %p5532_p0 = pneg %p5531_p3 }
 0xb84   : > { %p5538_p8 = por %p5537_p12, %p5536_p4 }
 0xb86   : > { %p5539_p11 = pnand %p5538_p8, %p5532_p0 }
 0xb88   : > { %5542 = shalt.err (!%p5539_p11)
}
 0xb89   : > { %5316 = dma.vmem_to_hbm [thread:$0]  (%p6777_p7), %s3286_s23, 128, %s6652_s21, %s3268_s1   ;;  %v3464_v52 = vld [vmem:[%s6740_s16 + $0x1] sm:$0x1] }
 0xb8a   : > { %s3467_s25 = sshll.u32 %s5747_s26, 4  ;;  %s633_s24 = scalar_lea.vmem [#allocation9], %s6571_s18 }
 0xb8b   : > { %s3298_s17 = sshll.u32 %s633_s24, 4  ;;  %s6778_s4 = sld [smem:[#allocation24_spill]]  ;;  %s6683_s17 = int_to_ptr.vmem [resolvable:$true] %s3298_s17 }
 0xb8c   : > { %s3273_s21 = scalar_lea.sflag [#allocation10], %s6571_s18  ;;  %s5543_s23 = scalar_lea.vmem %s6683_s17, 16 }
 0xb8d   : > { %p5544_p13 = scmp.ne.s32.totalorder %s6683_s17, %s5543_s23  ;;  %s5630_s26 = smov [#allocation9]  }
 0xb8e   : > { %s5547_s1 = sshll.u32 %s5630_s26, 4  ;;  %s5548_s1 = int_to_ptr.vmem [resolvable:$false] %s5547_s1 }
 0xb8f   : > { %p5545_p1 = pnand %p5544_p13, %p6777_p7  ;;  %s5549_s2 = scalar_lea.vmem %s5548_s1, 32 }
 0xb90   : > { %p5550_p9 = scmp.lt.s32.totalorder %s6683_s17, %s5548_s1  ;;  %p5551_p2 = scmp.lt.s32.totalorder %s5549_s2, %s5543_s23 }
 0xb91   : > { %s6779_s28 = smov %s6778_s4  ;;  %s6681_s20 = scalar_lea.hbm %s6778_s4, %s3467_s25 }
 0xb92   : > { %p5546_p6 = pneg %p5545_p1  ;;  %p5552_p3 = por %p5551_p2, %p5550_p9 }
 0xb94   : > { %p5553_p0 = pnand %p5552_p3, %p5546_p6 }
 0xc4f   : > { %v3257_v55 = vpop.f32.mrb[34].mxu1 }
 0xc50   : > { %v3258_v27 = vadd.f32 %v3464_v52, %v3257_v55  ;;  %v4631_v4 = vpop.f32.mrb[35].mxu1 }
 0xc52   : > { %vm3261_vm9 = vcmp.ge.f32.partialorder %v3258_v27, 0.0  ;;  %v3262_v49 = vmul.f32 0.01, %v3258_v27 }
 0xc54   : > { %v3263_v16 = vsel %vm3261_vm9, %v3258_v27, %v3262_v49 }
 0xc55   : > { %3266 = vst [vmem:[%s633_s24] sm:$0x1] %v3263_v16 }
 0xc56   : > { %5556 = shalt.err (!%p5553_p0)
}
 0xc57   : > { %s5557_s18 = scalar_lea.hbm %s6681_s20, 16  ;;  %s5561_s30 = scalar_lea.hbm %s6779_s28, 32 }
 0xc58   : > { %p5558_p5 = scmp.ne.s32.totalorder %s6681_s20, %s5557_s18  ;;  %p5562_p12 = scmp.lt.u32.totalorder %s6681_s20, %s6779_s28 }
 0xc59   : > { %p5563_p8 = scmp.lt.u32.totalorder %s5561_s30, %s5557_s18  ;;  %p5565_p13 = scmp.lt.u32.totalorder %s5557_s18, %s6681_s20 }
 0xc5a   : > { %p5559_p10 = pnand %p5558_p5, %p6777_p7 }
 0xc5b   : > { %p5564_p11 = por %p5563_p8, %p5562_p12 }
 0xc5c   : > { %p5560_p4 = pneg %p5559_p10 }
 0xc5d   : > { %p5566_p1 = por %p5565_p13, %p5564_p11 }
 0xc5f   : > { %p5567_p6 = pnand %p5566_p1, %p5560_p4 }
 0xc61   : > { %5570 = shalt.err (!%p5567_p6)
}
 0xc62   : > { %5317 = dma.vmem_to_hbm [thread:$0]  (%p6777_p7), %s6683_s17, 16, %s6681_s20, %s3273_s21  }
 0xc63 PF: > { %s6780_s22 = sld [smem:[#allocation17_spill]]  ;;  %s6781_s0 = sld [smem:[#allocation15_spill]] }
 0xc64   : > { %s6782_s4 = sld [smem:[#allocation20_spill]] }
 0xc69   : > { %p5343_p9 = scmp.ge.s32.totalorder %s6780_s22, 2  ;;  %s3310_s23 = sand.u32 1, %s6781_s0  }
 0xc6a   : > { %p6783_p2 = scmp.ne.s32.totalorder %s6782_s4, 0  ;;  %s3311_s26 = scalar_lea.sflag [#allocation4], %s3310_s23 }
 0xc6c   : > { %p5331_p3 = pnand %p5343_p9, %p6783_p2 }
 0xc6e   : > { %5596 = dma.done.wait (!%p5331_p3), %s3311_s26, 128  }
 0xc6f   : > { %5598 = vsyncadd (!%p5331_p3), %s3311_s26, 4294967168  ;;  %s3320_s1 = scalar_lea.sflag [#allocation10], %s3310_s23 }
 0xc70   : > { %5600 = dma.done.wait (!%p5331_p3), %s3320_s1, 16  }
 0xc71   : > { %5602 = vsyncadd (!%p5331_p3), %s3320_s1, 4294967280  ;;  %s6784_s4 = sld [smem:[#allocation18_spill]]  ;;  %s6785_s29 = sld [smem:[#allocation16_spill]] }
 0xc72   : > { %s6786_s25 = sld [smem:[#allocation19_spill]]  ;;  %s6787_s24 = smov %s5609_s3 }
 0xc77   : > { %p34_p7 = scmp.ge.s32.totalorder %s6784_s4, 4   ;;  %s6788_s3 = smov %s6785_s29 }
 0xc79   :  { %36 = sbr.rel (!%p34_p7) target bundleno = 12 (0xc), region = 166 }
 0xc80   :  { %3324 = vsyncpa [#allocation3], 1 }
 0xc81   :  { %3326 = vsyncpa [#allocation3 + $0x1], 1 }
 0xc82   :  { %3327 = vsyncpa [#allocation6], 1 }
 0xc83   :  { %3328 = vsyncpa [#allocation4], 1 }
 0xc84   :  { %3330 = vsyncpa [#allocation4 + $0x1], 1 }
 0xc85   :  { %3331 = vsyncpa [#allocation10], 1 }
 0xc86   :  { %3333 = vsyncpa [#allocation10 + $0x1], 1 }

</bundles_post_ra>
